<compile_context>
chip_gen: v7x
topology: tpu7x:2x2x1
jax: 0.10.0
libtpu: 0.0.40
codegen_flags: <defaults>
</compile_context>

<pallas_src>
import functools

import jax
import jax.numpy as jnp
from jax.experimental import pallas as pl
from jax.experimental.pallas import tpu as pltpu


_VMEM_SIZING_BUDGET = 24 * 1024 * 1024   # conservative tile-sizing budget (all gens)
_VMEM_LIMIT_BYTES = 32 * 1024 * 1024     # explicit scoped-VMEM request


# --------------------------------------------------------------------------- #
# Kernels
# --------------------------------------------------------------------------- #
def _bn_stats_kernel(x_ref, gamma_ref, beta_ref, scale_ref, shift_ref, *, eps, count):
    """Pass 1: per-channel sum / sum-of-squares, finalized to folded scale/shift.

    x_ref:              (N, tc, tl)  input block
    gamma_ref/beta_ref: (tc, 1)      affine params (f32)
    scale_ref/shift_ref:(tc, 1) f32  outputs; double as s1/s2 accumulators until
                                     the final spatial step (block index is
                                     constant along the spatial grid axis, so the
                                     buffers stay resident until then).
    """
    li = pl.program_id(1)

    x = x_ref[...].astype(jnp.float32)
    s1 = jnp.sum(jnp.sum(x, axis=0), axis=1, keepdims=True)        # (tc, 1)
    s2 = jnp.sum(jnp.sum(x * x, axis=0), axis=1, keepdims=True)    # (tc, 1)

    @pl.when(li == 0)
    def _():
        scale_ref[...] = jnp.zeros_like(scale_ref)
        shift_ref[...] = jnp.zeros_like(shift_ref)

    scale_ref[...] += s1
    shift_ref[...] += s2

    @pl.when(li == pl.num_programs(1) - 1)
    def _():
        inv_count = 1.0 / count
        mean = scale_ref[...] * inv_count
        var = shift_ref[...] * inv_count - mean * mean              # biased var (PyTorch training)
        inv = jax.lax.rsqrt(var + eps)
        scale = gamma_ref[...].astype(jnp.float32) * inv
        shift = beta_ref[...].astype(jnp.float32) - mean * scale
        scale_ref[...] = scale
        shift_ref[...] = shift


def _bn_apply_relu_kernel(x_ref, scale_ref, shift_ref, o_ref):
    """Pass 2: y = max(x * scale + shift, 0) over an (N, tc, tl) block."""
    x = x_ref[...].astype(jnp.float32)
    scale = scale_ref[...][None, :, :]   # (1, tc, 1)
    shift = shift_ref[...][None, :, :]   # (1, tc, 1)
    y = x * scale + shift
    o_ref[...] = jnp.maximum(y, 0.0).astype(o_ref.dtype)


# --------------------------------------------------------------------------- #
# Tile selection (VMEM-aware, generation-safe)
# --------------------------------------------------------------------------- #
def _pick_l_tile(hw):
    """Lane-axis tile over H*W: must divide hw and be a multiple of 128, or be
    the full axis (full-dim exemption)."""
    if hw % 128 != 0:
        return hw
    for tl in (2048, 1024, 512, 384, 256, 128):
        if hw % tl == 0:
            return tl
    return hw


def _pick_channel_tile(c, n, tl, in_bytes, out_bytes, sublane):
    """Largest channel tile (multiple of `sublane`, dividing C) that fits the
    VMEM sizing budget, capped at C//2 so the grid has >= 2 channel steps
    (keeps both v7x TensorCores busy via the 'parallel' axis)."""
    # Per channel row of one block: double-buffered input, double-buffered
    # output, plus the in-kernel f32 upcast temporary.
    per_row = n * tl * (2 * in_bytes + 2 * out_bytes + 4)
    cap = max(sublane, _VMEM_SIZING_BUDGET // max(per_row, 1))
    if c >= 2 * sublane:
        cap = min(cap, c // 2)
    best = 0
    t = sublane
    limit = min(c, cap)
    while t <= limit:
        if c % t == 0:
            best = t
        t += sublane
    if best:
        return best
    # No aligned divisor fits: tiny / oddly-shaped channel counts fall back to
    # the full channel axis (full-dim exemption), else the minimum aligned tile.
    return c if (c < sublane or c % sublane != 0) else sublane


# --------------------------------------------------------------------------- #
# Wrapper
# --------------------------------------------------------------------------- #
def batchnorm_relu(x_nchw, gamma, beta, *, eps=1e-5, donate_input=False):
    """Training-mode BatchNorm2d(affine=True) followed by ReLU.

    x_nchw: (N, C, H, W)   gamma, beta: (C,)
    Returns (N, C, H, W) with the same dtype as x_nchw.
    """
    n, c, h, w = x_nchw.shape
    hw = h * w
    count = float(n * hw)

    # Free reshape (no transpose): NCHW -> (N, C, H*W).
    x3 = x_nchw.reshape(n, c, hw)
    gamma2 = gamma.reshape(c, 1).astype(jnp.float32)
    beta2 = beta.reshape(c, 1).astype(jnp.float32)

    in_bytes = x_nchw.dtype.itemsize
    out_bytes = in_bytes
    sublane = 16 if in_bytes < 4 else 8   # bf16/fp8 pack more rows per sublane

    tl = _pick_l_tile(hw)
    num_l = hw // tl
    tc = _pick_channel_tile(c, n, tl, in_bytes, out_bytes, sublane)
    num_c = c // tc if c % tc == 0 else 1

    x_spec = pl.BlockSpec((n, tc, tl), lambda ci, li: (0, ci, li))
    cvec_spec = pl.BlockSpec((tc, 1), lambda ci, li: (ci, 0))

    # ---- pass 1: batch statistics -> folded per-channel scale / shift ----
    scale, shift = pl.pallas_call(
        functools.partial(_bn_stats_kernel, eps=float(eps), count=count),
        out_shape=(
            jax.ShapeDtypeStruct((c, 1), jnp.float32),
            jax.ShapeDtypeStruct((c, 1), jnp.float32),
        ),
        grid_spec=pltpu.PrefetchScalarGridSpec(
            num_scalar_prefetch=0,
            grid=(num_c, num_l),
            in_specs=[x_spec, cvec_spec, cvec_spec],
            out_specs=[cvec_spec, cvec_spec],
        ),
        compiler_params=pltpu.CompilerParams(
            dimension_semantics=("parallel", "arbitrary"),
            vmem_limit_bytes=_VMEM_LIMIT_BYTES,
        ),
    )(x3, gamma2, beta2)

    # ---- pass 2: normalize + affine + ReLU (single multiply-add + max) ----
    apply_kwargs = {}
    if donate_input:
        apply_kwargs["input_output_aliases"] = {0: 0}   # reuse x's HBM for the output

    out3 = pl.pallas_call(
        _bn_apply_relu_kernel,
        out_shape=jax.ShapeDtypeStruct((n, c, hw), x_nchw.dtype),
        grid_spec=pltpu.PrefetchScalarGridSpec(
            num_scalar_prefetch=0,
            grid=(num_c, num_l),
            in_specs=[x_spec, cvec_spec, cvec_spec],
            out_specs=x_spec,
        ),
        compiler_params=pltpu.CompilerParams(
            dimension_semantics=("parallel", "parallel"),
            vmem_limit_bytes=_VMEM_LIMIT_BYTES,
        ),
        **apply_kwargs,
    )(x3, scale, shift)

    return out3.reshape(n, c, h, w)


# --------------------------------------------------------------------------- #
# Reference + self-test
# --------------------------------------------------------------------------- #
def _reference(x_nchw, gamma, beta, eps=1e-5):
    xf = x_nchw.astype(jnp.float32)
    mean = jnp.mean(xf, axis=(0, 2, 3), keepdims=True)
    var = jnp.mean((xf - mean) ** 2, axis=(0, 2, 3), keepdims=True)
    y = (xf - mean) * jax.lax.rsqrt(var + eps)
    y = y * gamma.reshape(1, -1, 1, 1) + beta.reshape(1, -1, 1, 1)
    return jnp.maximum(y, 0.0).astype(x_nchw.dtype)


if __name__ == "__main__":
    # Shapes from the original module: x138 = (1, 1232, 14, 14), BatchNorm2d(1232).
    N, C, H, W = 1, 1232, 14, 14
    key = jax.random.PRNGKey(0)
    kx, kg, kb = jax.random.split(key, 3)

    x = jax.random.normal(kx, (N, C, H, W), dtype=jnp.float32)
    # PyTorch default init is weight=1, bias=0; perturb slightly so the affine
    # path is actually exercised.
    gamma = jnp.ones((C,), jnp.float32) + 0.1 * jax.random.normal(kg, (C,), dtype=jnp.float32)
    beta = 0.1 * jax.random.normal(kb, (C,), dtype=jnp.float32)

    out = batchnorm_relu(x, gamma, beta, eps=1e-5)
    out = jax.block_until_ready(out)

    ref = _reference(x, gamma, beta, eps=1e-5)
    assert out.shape == (N, C, H, W) and out.dtype == x.dtype
    err = float(jnp.max(jnp.abs(out - ref)))
    assert err < 5e-4, f"max abs err {err}"

    print("KERNEL_OK")
</pallas_src>

<mosaic_0001>
module attributes {stable_mosaic.version = 11 : i64} {
  func.func @_bn_stats_kernel(%arg0: i32, %arg1: i32, %arg2: memref<1x616x196xf32, #tpu.memory_space<vmem>>, %arg3: memref<616x1xf32, #tpu.memory_space<vmem>>, %arg4: memref<616x1xf32, #tpu.memory_space<vmem>>, %arg5: memref<616x1xf32, #tpu.memory_space<vmem>>, %arg6: memref<616x1xf32, #tpu.memory_space<vmem>>) attributes {dimension_semantics = [#tpu.dimension_semantics<parallel>, #tpu.dimension_semantics<arbitrary>], iteration_bounds = array<i64: 2, 1>, scalar_prefetch = 0 : i64, scratch_operands = 0 : i64, tpu.core_type = #tpu.core_type<tc>, window_params = [{transform_indices = @transform_0, window_bounds = array<i64: 1, 616, 196>}, {transform_indices = @transform_1, window_bounds = array<i64: 616, 1>}, {transform_indices = @transform_2, window_bounds = array<i64: 616, 1>}, {transform_indices = @transform_3, window_bounds = array<i64: 616, 1>}, {transform_indices = @transform_4, window_bounds = array<i64: 616, 1>}]} {
    %c0 = arith.constant 0 : index
    %c0_0 = arith.constant 0 : index
    %c0_1 = arith.constant 0 : index
    %0 = vector.load %arg2[%c0, %c0_0, %c0_1] : memref<1x616x196xf32, #tpu.memory_space<vmem>>, vector<1x616x196xf32>
    %cst = arith.constant dense<0.000000e+00> : vector<616x196xf32>
    %1 = vector.multi_reduction <add>, %0, %cst [0] : vector<1x616x196xf32> to vector<616x196xf32>
    %cst_2 = arith.constant dense<0.000000e+00> : vector<616xf32>
    %2 = vector.multi_reduction <add>, %1, %cst_2 [1] : vector<616x196xf32> to vector<616xf32>
    %3 = vector.shape_cast %2 : vector<616xf32> to vector<616x1xf32>
    %4 = arith.mulf %0, %0 : vector<1x616x196xf32>
    %cst_3 = arith.constant dense<0.000000e+00> : vector<616x196xf32>
    %5 = vector.multi_reduction <add>, %4, %cst_3 [0] : vector<1x616x196xf32> to vector<616x196xf32>
    %cst_4 = arith.constant dense<0.000000e+00> : vector<616xf32>
    %6 = vector.multi_reduction <add>, %5, %cst_4 [1] : vector<616x196xf32> to vector<616xf32>
    %7 = vector.shape_cast %6 : vector<616xf32> to vector<616x1xf32>
    %c0_i32 = arith.constant 0 : i32
    %8 = arith.cmpi eq, %arg1, %c0_i32 : i32
    %9 = arith.extui %8 : i1 to i32
    %c0_i32_5 = arith.constant 0 : i32
    %10 = arith.cmpi ne, %9, %c0_i32_5 : i32
    scf.if %10 {
      %cst_16 = arith.constant 0.000000e+00 : f32
      %20 = vector.broadcast %cst_16 : f32 to vector<616x1xf32>
      %c0_17 = arith.constant 0 : index
      %c0_18 = arith.constant 0 : index
      %21 = vector.load %arg5[%c0_17, %c0_18] : memref<616x1xf32, #tpu.memory_space<vmem>>, vector<616x1xf32>
      tpu.vector_store %arg5[%c0_17, %c0_18], %20 {strides = array<i32>} : memref<616x1xf32, #tpu.memory_space<vmem>>, vector<616x1xf32>,
      %cst_19 = arith.constant 0.000000e+00 : f32
      %22 = vector.broadcast %cst_19 : f32 to vector<616x1xf32>
      %c0_20 = arith.constant 0 : index
      %c0_21 = arith.constant 0 : index
      %23 = vector.load %arg6[%c0_20, %c0_21] : memref<616x1xf32, #tpu.memory_space<vmem>>, vector<616x1xf32>
      tpu.vector_store %arg6[%c0_20, %c0_21], %22 {strides = array<i32>} : memref<616x1xf32, #tpu.memory_space<vmem>>, vector<616x1xf32>,
    } else {
    }
    %c0_6 = arith.constant 0 : index
    %c0_7 = arith.constant 0 : index
    %11 = vector.load %arg5[%c0_6, %c0_7] : memref<616x1xf32, #tpu.memory_space<vmem>>, vector<616x1xf32>
    %12 = arith.addf %11, %3 : vector<616x1xf32>
    %c0_8 = arith.constant 0 : index
    %c0_9 = arith.constant 0 : index
    %13 = vector.load %arg5[%c0_8, %c0_9] : memref<616x1xf32, #tpu.memory_space<vmem>>, vector<616x1xf32>
    tpu.vector_store %arg5[%c0_8, %c0_9], %12 {strides = array<i32>} : memref<616x1xf32, #tpu.memory_space<vmem>>, vector<616x1xf32>,
    %c0_10 = arith.constant 0 : index
    %c0_11 = arith.constant 0 : index
    %14 = vector.load %arg6[%c0_10, %c0_11] : memref<616x1xf32, #tpu.memory_space<vmem>>, vector<616x1xf32>
    %15 = arith.addf %14, %7 : vector<616x1xf32>
    %c0_12 = arith.constant 0 : index
    %c0_13 = arith.constant 0 : index
    %16 = vector.load %arg6[%c0_12, %c0_13] : memref<616x1xf32, #tpu.memory_space<vmem>>, vector<616x1xf32>
    tpu.vector_store %arg6[%c0_12, %c0_13], %15 {strides = array<i32>} : memref<616x1xf32, #tpu.memory_space<vmem>>, vector<616x1xf32>,
    %c0_i32_14 = arith.constant 0 : i32
    %17 = arith.cmpi eq, %arg1, %c0_i32_14 : i32
    %18 = arith.extui %17 : i1 to i32
    %c0_i32_15 = arith.constant 0 : i32
    %19 = arith.cmpi ne, %18, %c0_i32_15 : i32
    scf.if %19 {
      %c0_16 = arith.constant 0 : index
      %c0_17 = arith.constant 0 : index
      %20 = vector.load %arg5[%c0_16, %c0_17] : memref<616x1xf32, #tpu.memory_space<vmem>>, vector<616x1xf32>
      %cst_18 = arith.constant 0.00510204071 : f32
      %21 = vector.broadcast %cst_18 : f32 to vector<616x1xf32>
      %22 = arith.mulf %20, %21 : vector<616x1xf32>
      %c0_19 = arith.constant 0 : index
      %c0_20 = arith.constant 0 : index
      %23 = vector.load %arg6[%c0_19, %c0_20] : memref<616x1xf32, #tpu.memory_space<vmem>>, vector<616x1xf32>
      %cst_21 = arith.constant 0.00510204071 : f32
      %24 = vector.broadcast %cst_21 : f32 to vector<616x1xf32>
      %25 = arith.mulf %23, %24 : vector<616x1xf32>
      %26 = arith.mulf %22, %22 : vector<616x1xf32>
      %27 = arith.subf %25, %26 : vector<616x1xf32>
      %cst_22 = arith.constant 9.99999974E-6 : f32
      %28 = vector.broadcast %cst_22 : f32 to vector<616x1xf32>
      %29 = arith.addf %27, %28 : vector<616x1xf32>
      %30 = math.rsqrt %29 : vector<616x1xf32>
      %c0_23 = arith.constant 0 : index
      %c0_24 = arith.constant 0 : index
      %31 = vector.load %arg3[%c0_23, %c0_24] : memref<616x1xf32, #tpu.memory_space<vmem>>, vector<616x1xf32>
      %32 = arith.mulf %31, %30 : vector<616x1xf32>
      %c0_25 = arith.constant 0 : index
      %c0_26 = arith.constant 0 : index
      %33 = vector.load %arg4[%c0_25, %c0_26] : memref<616x1xf32, #tpu.memory_space<vmem>>, vector<616x1xf32>
      %34 = arith.mulf %22, %32 : vector<616x1xf32>
      %35 = arith.subf %33, %34 : vector<616x1xf32>
      %c0_27 = arith.constant 0 : index
      %c0_28 = arith.constant 0 : index
      %36 = vector.load %arg5[%c0_27, %c0_28] : memref<616x1xf32, #tpu.memory_space<vmem>>, vector<616x1xf32>
      tpu.vector_store %arg5[%c0_27, %c0_28], %32 {strides = array<i32>} : memref<616x1xf32, #tpu.memory_space<vmem>>, vector<616x1xf32>,
      %c0_29 = arith.constant 0 : index
      %c0_30 = arith.constant 0 : index
      %37 = vector.load %arg6[%c0_29, %c0_30] : memref<616x1xf32, #tpu.memory_space<vmem>>, vector<616x1xf32>
      tpu.vector_store %arg6[%c0_29, %c0_30], %35 {strides = array<i32>} : memref<616x1xf32, #tpu.memory_space<vmem>>, vector<616x1xf32>,
    } else {
    }
    return
  }
  func.func @transform_0(%arg0: i32, %arg1: i32) -> (i32, i32, i32) {
    %c0_i32 = arith.constant 0 : i32
    %c0_i32_0 = arith.constant 0 : i32
    return %c0_i32, %arg0, %arg1 : i32, i32, i32
  }
  func.func @transform_1(%arg0: i32, %arg1: i32) -> (i32, i32) {
    %c0_i32 = arith.constant 0 : i32
    %c0_i32_0 = arith.constant 0 : i32
    return %arg0, %c0_i32 : i32, i32
  }
  func.func @transform_2(%arg0: i32, %arg1: i32) -> (i32, i32) {
    %c0_i32 = arith.constant 0 : i32
    %c0_i32_0 = arith.constant 0 : i32
    return %arg0, %c0_i32 : i32, i32
  }
  func.func @transform_3(%arg0: i32, %arg1: i32) -> (i32, i32) {
    %c0_i32 = arith.constant 0 : i32
    %c0_i32_0 = arith.constant 0 : i32
    return %arg0, %c0_i32 : i32, i32
  }
  func.func @transform_4(%arg0: i32, %arg1: i32) -> (i32, i32) {
    %c0_i32 = arith.constant 0 : i32
    %c0_i32_0 = arith.constant 0 : i32
    return %arg0, %c0_i32 : i32, i32
  }
}

</mosaic_0001>

<bundles_post_ra>
// kernel: tpu_custom_call.1
= control target key start
LH: loop header
LB: loop body
LE: loop exit
PB: predicated region body
PF: predicated region fallthrough
CT: control target
= control target key end

     0   :  { %s3713_s15 = smov 0   ;;  %s3715_s16 = smov 0   ;;  %s7228_s0 = inlined_call_operand.vmem [shape: f32[1,1232,196], index: 0, kind: input, shape index: {}]   ;;  %s7229_s1 = inlined_call_operand.vmem [shape: f32[1232,1], index: 1, kind: input, shape index: {}]   ;;  %s7230_s2 = inlined_call_operand.vmem [shape: f32[1232,1], index: 2, kind: input, shape index: {}]   ;;  %s7231_s3 = inlined_call_operand.vmem [shape: f32[1232,1], index: 3, kind: output, shape index: {0}]   ;;  %s7232_s4 = inlined_call_operand.vmem [shape: f32[1232,1], index: 4, kind: output, shape index: {1}]  }
   0x1   :  { %s3717_s17 = smov 0  }
   0x2 LB: > { %s27_s18 = sadd.s32 1, %s3681_s16  ;;  %p3436_p0 = scmp.ge.s32.totalorder %s3685_s17, 1  ;;  %s3685_s17 = sphi %s3717_s17, %s15_s17   ;;  %s3681_s16 = sphi %s3715_s16, %s7516_s16   ;;  %s3677_s15 = sphi %s3713_s15, %s7515_s15  }
   0x3   : > { %p29_p1 = scmp.ge.s32.totalorder %s27_s18, 2  ;;  %p208_p2 = scmp.lt.s32.totalorder %s3685_s17, 3 }
   0x5   : > { %s7518_s18 = smov (%p29_p1, %s27_s18), 0  ;;  %p209_p3 = pnand %p3436_p0, %p208_p2 }
   0x7   : > { %212 = sbr.rel (%p209_p3) target bundleno = 571 (0x23b), region = 32 }
   0xe   : > { %s254_s19 = smul.u32 77, %s3677_s15  ;;  %vm598_vm0 = vcmask 556032   ;;  %vm1527_vm1 = vcmask 7168   ;;  %v7233_v33 = vmov 0.0  }
  0x10   : > { %p256_p4 = scmp.lt.s32.totalorder %s254_s19, 153 }
  0x12   : > { %s7520_s19 = smov (!%p256_p4, %s254_s19), 153 }
  0x13   : > { %s3445_s20 = sshll.u32 %s7520_s19, 4  ;;  %s3767_s24 = sshll.u32 %s7520_s19, 3 }
  0x14   : > { %s3734_s23 = scalar_lea.vmem %s7228_s0, %s3445_s20  ;;  %s3787_s27 = scalar_lea.vmem %s7231_s3, %s3767_s24 }
  0x15   : > { %v3737_v0 = vld [vmem:[%s3734_s23 + $0x20] sm:$0xff]  ;;  %v3740_v1 = vld [vmem:[%s3734_s23 + $0x28] sm:$0xff]  ;;  %v296_v5 = vld [vmem:[%s3734_s23 + $0x30] sm:$0xff]  ;;  %1530 = vst.msk [vmem:[%s3787_s27 + $0x10] sm:$0xff] %vm1527_vm1, %v7233_v33  ;;  %s5133_s30 = scalar_lea.vmem %s7232_s4, %s3767_s24  ;;  %s6179_s7 = scalar_lea.vmem %s7229_s1, %s3767_s24 }
  0x16   : > { %v3743_v2 = vld [vmem:[%s3734_s23] sm:$0xff]  ;;  %v607_v3 = vsel %vm598_vm0, %v3740_v1, 0.0  ;;  %v3748_v4 = vld [vmem:[%s3734_s23 + $0x8] sm:$0xff]  ;;  %v297_v6 = vld [vmem:[%s3734_s23 + $0x38] sm:$0xff]  ;;  %1528 = vst.msk [vmem:[%s3787_s27] sm:$0xff] %vm1527_vm1, %v7233_v33  ;;  %s6216_s10 = scalar_lea.vmem %s7230_s2, %s3767_s24 }
  0x17   : > { %v608_v7 = vadd.f32 %v607_v3, %v3737_v0  ;;  %v599_v8 = vsel %vm598_vm0, %v3748_v4, 0.0  ;;  %v611_v9 = vsel %vm598_vm0, %v297_v6, 0.0  ;;  %v292_v10 = vld [vmem:[%s3734_s23 + $0x10] sm:$0xff]  ;;  %v293_v11 = vld [vmem:[%s3734_s23 + $0x18] sm:$0xff]  ;;  %v299_v15 = vld [vmem:[%s3734_s23 + $0x48] sm:$0xff]  ;;  %1529 = vst.msk [vmem:[%s3787_s27 + $0x8] sm:$0xff] %vm1527_vm1, %v7233_v33 }
  0x18   : > { %v600_v12 = vadd.f32 %v599_v8, %v3743_v2  ;;  %v603_v13 = vsel %vm598_vm0, %v293_v11, 0.0  ;;  %v301_v14 = vld [vmem:[%s3734_s23 + $0x58] sm:$0xff]  ;;  %v612_v16 = vadd.f32 %v611_v9, %v296_v5  ;;  %v300_v18 = vld [vmem:[%s3734_s23 + $0x50] sm:$0xff]  ;;  %v298_v20 = vld [vmem:[%s3734_s23 + $0x40] sm:$0xff]  ;;  %v615_v21 = vsel %vm598_vm0, %v299_v15, 0.0  ;;  %1531 = vst.msk [vmem:[%s3787_s27 + $0x18] sm:$0xff] %vm1527_vm1, %v7233_v33 }
  0x19   : > { %609 = vadd.xlane.f32.xlu1 %v608_v7  ;;  %v604_v17 = vadd.f32 %v603_v13, %v292_v10  ;;  %v619_v19 = vsel %vm598_vm0, %v301_v14, 0.0  ;;  %v305_v22 = vld [vmem:[%s3734_s23 + $0x78] sm:$0xff]  ;;  %v303_v23 = vld [vmem:[%s3734_s23 + $0x68] sm:$0xff]  ;;  %v3770_v25 = vadd.f32 %v615_v21, %v298_v20  ;;  %v304_v26 = vld [vmem:[%s3734_s23 + $0x70] sm:$0xff]  ;;  %1532 = vst.msk [vmem:[%s3787_s27 + $0x20] sm:$0xff] %vm1527_vm1, %v7233_v33 }
  0x1a   : > { %601 = vadd.xlane.f32.xlu0 %v600_v12  ;;  %v620_v24 = vadd.f32 %v619_v19, %v300_v18  ;;  %v627_v27 = vsel %vm598_vm0, %v305_v22, 0.0  ;;  %v3775_v28 = vld [vmem:[%s3734_s23 + $0x60] sm:$0xff]  ;;  %v3778_v29 = vsel %vm598_vm0, %v303_v23, 0.0  ;;  %v3781_v30 = vld [vmem:[%s3734_s23 + $0x98] sm:$0xff]  ;;  %v3790_v31 = vld [vmem:[%s3734_s23 + $0x88] sm:$0xff]  ;;  %1533 = vst.msk [vmem:[%s3787_s27 + $0x28] sm:$0xff] %vm1527_vm1, %v7233_v33 }
  0x1b   : > { %v3792_v32 = vadd.f32 %v627_v27, %v304_v26  ;;  %1534 = vst.msk [vmem:[%s3787_s27 + $0x30] sm:$0xff] %vm1527_vm1, %v7233_v33  ;;  %1535 = vst.msk [vmem:[%s3787_s27 + $0x38] sm:$0xff] %vm1527_vm1, %v7233_v33  ;;  %v624_v34 = vadd.f32 %v3778_v29, %v3775_v28  ;;  %v308_v35 = vld [vmem:[%s3734_s23 + $0x90] sm:$0xff]  ;;  %v635_v36 = vsel %vm598_vm0, %v3781_v30, 0.0  ;;  %v306_v37 = vld [vmem:[%s3734_s23 + $0x80] sm:$0xff]  ;;  %v631_v38 = vsel %vm598_vm0, %v3790_v31, 0.0 }
  0x1c   : > { %1536 = vst.msk [vmem:[%s3787_s27 + $0x40] sm:$0xff] %vm1527_vm1, %v7233_v33  ;;  %1537 = vst.msk [vmem:[%s3787_s27 + $0x48] sm:$0xff] %vm1527_vm1, %v7233_v33  ;;  %v313_v39 = vld [vmem:[%s3734_s23 + $0xb8] sm:$0xff]  ;;  %v311_v40 = vld [vmem:[%s3734_s23 + $0xa8] sm:$0xff]  ;;  %v636_v41 = vadd.f32 %v635_v36, %v308_v35  ;;  %v632_v42 = vadd.f32 %v631_v38, %v306_v37 }
  0x1d   : > { %613 = vadd.xlane.f32.xlu1 %v612_v16  ;;  %1538 = vst.msk [vmem:[%s3787_s27 + $0x50] sm:$0xff] %vm1527_vm1, %v7233_v33  ;;  %1539 = vst.msk [vmem:[%s3787_s27 + $0x58] sm:$0xff] %vm1527_vm1, %v7233_v33  ;;  %v312_v43 = vld [vmem:[%s3734_s23 + $0xb0] sm:$0xff]  ;;  %v643_v44 = vsel %vm598_vm0, %v313_v39, 0.0  ;;  %v310_v45 = vld [vmem:[%s3734_s23 + $0xa0] sm:$0xff]  ;;  %v639_v46 = vsel %vm598_vm0, %v311_v40, 0.0 }
  0x1e   : > { %605 = vadd.xlane.f32.xlu0 %v604_v17  ;;  %1540 = vst.msk [vmem:[%s3787_s27 + $0x60] sm:$0xff] %vm1527_vm1, %v7233_v33  ;;  %1541 = vst.msk [vmem:[%s3787_s27 + $0x68] sm:$0xff] %vm1527_vm1, %v7233_v33  ;;  %v317_v47 = vld [vmem:[%s3734_s23 + $0xd8] sm:$0xff]  ;;  %v315_v48 = vld [vmem:[%s3734_s23 + $0xc8] sm:$0xff]  ;;  %v644_v49 = vadd.f32 %v643_v44, %v312_v43  ;;  %v640_v50 = vadd.f32 %v639_v46, %v310_v45 }
  0x1f   : > { %1542 = vst.msk [vmem:[%s3787_s27 + $0x70] sm:$0xff] %vm1527_vm1, %v7233_v33  ;;  %1543 = vst.msk [vmem:[%s3787_s27 + $0x78] sm:$0xff] %vm1527_vm1, %v7233_v33  ;;  %v316_v51 = vld [vmem:[%s3734_s23 + $0xd0] sm:$0xff]  ;;  %v651_v52 = vsel %vm598_vm0, %v317_v47, 0.0  ;;  %v314_v53 = vld [vmem:[%s3734_s23 + $0xc0] sm:$0xff]  ;;  %v647_v54 = vsel %vm598_vm0, %v315_v48, 0.0 }
  0x20   : > { %1544 = vst.msk [vmem:[%s3787_s27 + $0x80] sm:$0xff] %vm1527_vm1, %v7233_v33  ;;  %1545 = vst.msk [vmem:[%s3787_s27 + $0x88] sm:$0xff] %vm1527_vm1, %v7233_v33  ;;  %v321_v55 = vld [vmem:[%s3734_s23 + $0xf8] sm:$0xff]  ;;  %v319_v56 = vld [vmem:[%s3734_s23 + $0xe8] sm:$0xff]  ;;  %v652_v57 = vadd.f32 %v651_v52, %v316_v51  ;;  %v648_v58 = vadd.f32 %v647_v54, %v314_v53 }
  0x21   : > { %621 = vadd.xlane.f32.xlu1 %v620_v24  ;;  %1546 = vst.msk [vmem:[%s3787_s27 + $0x90] sm:$0xff] %vm1527_vm1, %v7233_v33  ;;  %1547 = vst.msk [vmem:[%s3787_s27 + $0x98] sm:$0xff] %vm1527_vm1, %v7233_v33  ;;  %v320_v59 = vld [vmem:[%s3734_s23 + $0xf0] sm:$0xff]  ;;  %v659_v60 = vsel %vm598_vm0, %v321_v55, 0.0  ;;  %v318_v61 = vld [vmem:[%s3734_s23 + $0xe0] sm:$0xff]  ;;  %v655_v62 = vsel %vm598_vm0, %v319_v56, 0.0 }
  0x22   : > { %1548 = vst.msk [vmem:[%s3787_s27 + $0xa0] sm:$0xff] %vm1527_vm1, %v7233_v33  ;;  %1549 = vst.msk [vmem:[%s3787_s27 + $0xa8] sm:$0xff] %vm1527_vm1, %v7233_v33  ;;  %617 = vadd.xlane.f32.xlu0 %v3770_v25  ;;  %v325_v63 = vld [vmem:[%s3734_s23 + $0x118] sm:$0xff]  ;;  %v323_v3 = vld [vmem:[%s3734_s23 + $0x108] sm:$0xff]  ;;  %v660_v5 = vadd.f32 %v659_v60, %v320_v59  ;;  %v656_v6 = vadd.f32 %v655_v62, %v318_v61 }
  0x23   : > { %1550 = vst.msk [vmem:[%s3787_s27 + $0xb0] sm:$0xff] %vm1527_vm1, %v7233_v33  ;;  %1551 = vst.msk [vmem:[%s3787_s27 + $0xb8] sm:$0xff] %vm1527_vm1, %v7233_v33  ;;  %v324_v7 = vld [vmem:[%s3734_s23 + $0x110] sm:$0xff]  ;;  %v667_v8 = vsel %vm598_vm0, %v325_v63, 0.0  ;;  %v322_v9 = vld [vmem:[%s3734_s23 + $0x100] sm:$0xff]  ;;  %v663_v10 = vsel %vm598_vm0, %v323_v3, 0.0 }
  0x24   : > { %1552 = vst.msk [vmem:[%s3787_s27 + $0xc0] sm:$0xff] %vm1527_vm1, %v7233_v33  ;;  %1553 = vst.msk [vmem:[%s3787_s27 + $0xc8] sm:$0xff] %vm1527_vm1, %v7233_v33  ;;  %v329_v11 = vld [vmem:[%s3734_s23 + $0x138] sm:$0xff]  ;;  %v327_v12 = vld [vmem:[%s3734_s23 + $0x128] sm:$0xff]  ;;  %v668_v13 = vadd.f32 %v667_v8, %v324_v7  ;;  %v664_v14 = vadd.f32 %v663_v10, %v322_v9 }
  0x25   : > { %1554 = vst.msk [vmem:[%s3787_s27 + $0xd0] sm:$0xff] %vm1527_vm1, %v7233_v33  ;;  %1555 = vst.msk [vmem:[%s3787_s27 + $0xd8] sm:$0xff] %vm1527_vm1, %v7233_v33  ;;  %629 = vadd.xlane.f32.xlu1 %v3792_v32  ;;  %v328_v15 = vld [vmem:[%s3734_s23 + $0x130] sm:$0xff]  ;;  %v675_v16 = vsel %vm598_vm0, %v329_v11, 0.0  ;;  %v326_v17 = vld [vmem:[%s3734_s23 + $0x120] sm:$0xff]  ;;  %v671_v18 = vsel %vm598_vm0, %v327_v12, 0.0 }
  0x26   : > { %1556 = vst.msk [vmem:[%s3787_s27 + $0xe0] sm:$0xff] %vm1527_vm1, %v7233_v33  ;;  %1557 = vst.msk [vmem:[%s3787_s27 + $0xe8] sm:$0xff] %vm1527_vm1, %v7233_v33  ;;  %625 = vadd.xlane.f32.xlu0 %v624_v34  ;;  %v4066_v19 = vld [vmem:[%s3734_s23 + $0x158] sm:$0xff]  ;;  %v331_v20 = vld [vmem:[%s3734_s23 + $0x148] sm:$0xff]  ;;  %v676_v21 = vadd.f32 %v675_v16, %v328_v15  ;;  %v672_v22 = vadd.f32 %v671_v18, %v326_v17 }
  0x27   : > { %1558 = vst.msk [vmem:[%s3787_s27 + $0xf0] sm:$0xff] %vm1527_vm1, %v7233_v33  ;;  %1559 = vst.msk [vmem:[%s3787_s27 + $0xf8] sm:$0xff] %vm1527_vm1, %v7233_v33  ;;  %v4070_v23 = vld [vmem:[%s3734_s23 + $0x150] sm:$0xff]  ;;  %v683_v24 = vsel %vm598_vm0, %v4066_v19, 0.0  ;;  %v330_v25 = vld [vmem:[%s3734_s23 + $0x140] sm:$0xff]  ;;  %v679_v26 = vsel %vm598_vm0, %v331_v20, 0.0 }
  0x28   : > { %1560 = vst.msk [vmem:[%s3787_s27 + $0x100] sm:$0xff] %vm1527_vm1, %v7233_v33  ;;  %1561 = vst.msk [vmem:[%s3787_s27 + $0x108] sm:$0xff] %vm1527_vm1, %v7233_v33  ;;  %v4077_v27 = vld [vmem:[%s3734_s23 + $0x178] sm:$0xff]  ;;  %v4080_v28 = vld [vmem:[%s3734_s23 + $0x168] sm:$0xff]  ;;  %v684_v29 = vadd.f32 %v683_v24, %v4070_v23  ;;  %v680_v30 = vadd.f32 %v679_v26, %v330_v25  ;;  %v908_v24 = vmul.f32 %v3748_v4, %v3748_v4 }
  0x29   : > { %1562 = vst.msk [vmem:[%s3787_s27 + $0x110] sm:$0xff] %vm1527_vm1, %v7233_v33  ;;  %1563 = vst.msk [vmem:[%s3787_s27 + $0x118] sm:$0xff] %vm1527_vm1, %v7233_v33  ;;  %637 = vadd.xlane.f32.xlu1 %v636_v41  ;;  %v4084_v31 = vld [vmem:[%s3734_s23 + $0x170] sm:$0xff]  ;;  %v691_v32 = vsel %vm598_vm0, %v4077_v27, 0.0  ;;  %v4089_v34 = vld [vmem:[%s3734_s23 + $0x160] sm:$0xff]  ;;  %v687_v35 = vsel %vm598_vm0, %v4080_v28, 0.0  ;;  %v911_v4 = vmul.f32 %v3737_v0, %v3737_v0 }
  0x2a   : > { %1564 = vst.msk [vmem:[%s3787_s27 + $0x120] sm:$0xff] %vm1527_vm1, %v7233_v33  ;;  %1565 = vst.msk [vmem:[%s3787_s27 + $0x128] sm:$0xff] %vm1527_vm1, %v7233_v33  ;;  %633 = vadd.xlane.f32.xlu0 %v632_v42  ;;  %v4094_v36 = vld [vmem:[%s3734_s23 + $0x198] sm:$0xff]  ;;  %v4097_v37 = vld [vmem:[%s3734_s23 + $0x188] sm:$0xff]  ;;  %v692_v38 = vadd.f32 %v691_v32, %v4084_v31  ;;  %v688_v39 = vadd.f32 %v687_v35, %v4089_v34  ;;  %v907_v32 = vmul.f32 %v3743_v2, %v3743_v2 }
  0x2b   : > { %1566 = vst.msk [vmem:[%s3787_s27 + $0x130] sm:$0xff] %vm1527_vm1, %v7233_v33  ;;  %1567 = vst.msk [vmem:[%s3787_s27 + $0x138] sm:$0xff] %vm1527_vm1, %v7233_v33  ;;  %v4102_v40 = vld [vmem:[%s3734_s23 + $0x190] sm:$0xff]  ;;  %v699_v41 = vsel %vm598_vm0, %v4094_v36, 0.0  ;;  %v4107_v42 = vld [vmem:[%s3734_s23 + $0x180] sm:$0xff]  ;;  %v695_v43 = vsel %vm598_vm0, %v4097_v37, 0.0 }
  0x2c   : > { %1568 = vst.msk [vmem:[%s3787_s27 + $0x140] sm:$0xff] %vm1527_vm1, %v7233_v33  ;;  %1569 = vst.msk [vmem:[%s3787_s27 + $0x148] sm:$0xff] %vm1527_vm1, %v7233_v33  ;;  %v4112_v44 = vld [vmem:[%s3734_s23 + $0x1b8] sm:$0xff]  ;;  %v4115_v45 = vld [vmem:[%s3734_s23 + $0x1a8] sm:$0xff]  ;;  %v700_v46 = vadd.f32 %v699_v41, %v4102_v40  ;;  %v696_v47 = vadd.f32 %v695_v43, %v4107_v42 }
  0x2d   : > { %1570 = vst.msk [vmem:[%s3787_s27 + $0x150] sm:$0xff] %vm1527_vm1, %v7233_v33  ;;  %1571 = vst.msk [vmem:[%s3787_s27 + $0x158] sm:$0xff] %vm1527_vm1, %v7233_v33  ;;  %645 = vadd.xlane.f32.xlu1 %v644_v49  ;;  %v4120_v48 = vld [vmem:[%s3734_s23 + $0x1b0] sm:$0xff]  ;;  %v707_v49 = vsel %vm598_vm0, %v4112_v44, 0.0  ;;  %v703_v51 = vsel %vm598_vm0, %v4115_v45, 0.0  ;;  %v4130_v52 = vld [vmem:[%s3734_s23 + $0x1d8] sm:$0xff] }
  0x2e   : > { %1572 = vst.msk [vmem:[%s3787_s27 + $0x160] sm:$0xff] %vm1527_vm1, %v7233_v33  ;;  %1573 = vst.msk [vmem:[%s3787_s27 + $0x168] sm:$0xff] %vm1527_vm1, %v7233_v33  ;;  %641 = vadd.xlane.f32.xlu0 %v640_v50  ;;  %v4125_v50 = vld [vmem:[%s3734_s23 + $0x1a0] sm:$0xff]  ;;  %v4133_v53 = vld [vmem:[%s3734_s23 + $0x1c8] sm:$0xff]  ;;  %v708_v54 = vadd.f32 %v707_v49, %v4120_v48 }
  0x2f   : > { %1574 = vst.msk [vmem:[%s3787_s27 + $0x170] sm:$0xff] %vm1527_vm1, %v7233_v33  ;;  %1575 = vst.msk [vmem:[%s3787_s27 + $0x178] sm:$0xff] %vm1527_vm1, %v7233_v33  ;;  %v704_v55 = vadd.f32 %v703_v51, %v4125_v50  ;;  %v4138_v56 = vld [vmem:[%s3734_s23 + $0x1d0] sm:$0xff]  ;;  %v711_v59 = vsel %vm598_vm0, %v4133_v53, 0.0  ;;  %v4148_v60 = vld [vmem:[%s3734_s23 + $0x1f8] sm:$0xff] }
  0x30   : > { %1576 = vst.msk [vmem:[%s3787_s27 + $0x180] sm:$0xff] %vm1527_vm1, %v7233_v33  ;;  %1577 = vst.msk [vmem:[%s3787_s27 + $0x188] sm:$0xff] %vm1527_vm1, %v7233_v33  ;;  %v4151_v61 = vld [vmem:[%s3734_s23 + $0x1e8] sm:$0xff]  ;;  %v4156_v3 = vld [vmem:[%s3734_s23 + $0x1f0] sm:$0xff] }
  0x31   : > { %1578 = vst.msk [vmem:[%s3787_s27 + $0x190] sm:$0xff] %vm1527_vm1, %v7233_v33  ;;  %1579 = vst.msk [vmem:[%s3787_s27 + $0x198] sm:$0xff] %vm1527_vm1, %v7233_v33  ;;  %653 = vadd.xlane.f32.xlu1 %v652_v57  ;;  %v715_v57 = vsel %vm598_vm0, %v4130_v52, 0.0  ;;  %v719_v7 = vsel %vm598_vm0, %v4151_v61, 0.0  ;;  %v4166_v8 = vld [vmem:[%s3734_s23 + $0x218] sm:$0xff]  ;;  %v4169_v9 = vld [vmem:[%s3734_s23 + $0x208] sm:$0xff] }
  0x32   : > { %1580 = vst.msk [vmem:[%s3787_s27 + $0x1a0] sm:$0xff] %vm1527_vm1, %v7233_v33  ;;  %1581 = vst.msk [vmem:[%s3787_s27 + $0x1a8] sm:$0xff] %vm1527_vm1, %v7233_v33  ;;  %649 = vadd.xlane.f32.xlu0 %v648_v58  ;;  %v4143_v58 = vld [vmem:[%s3734_s23 + $0x1c0] sm:$0xff]  ;;  %v716_v62 = vadd.f32 %v715_v57, %v4138_v56  ;;  %v4174_v12 = vld [vmem:[%s3734_s23 + $0x210] sm:$0xff]  ;;  %v727_v15 = vsel %vm598_vm0, %v4169_v9, 0.0 }
  0x33   : > { %1582 = vst.msk [vmem:[%s3787_s27 + $0x1b0] sm:$0xff] %vm1527_vm1, %v7233_v33  ;;  %1583 = vst.msk [vmem:[%s3787_s27 + $0x1b8] sm:$0xff] %vm1527_vm1, %v7233_v33  ;;  %v712_v63 = vadd.f32 %v711_v59, %v4143_v58  ;;  %v4184_v16 = vld [vmem:[%s3734_s23 + $0x238] sm:$0xff]  ;;  %v4187_v17 = vld [vmem:[%s3734_s23 + $0x228] sm:$0xff] }
  0x34   : > { %1584 = vst.msk [vmem:[%s3787_s27 + $0x1c0] sm:$0xff] %vm1527_vm1, %v7233_v33  ;;  %1585 = vst.msk [vmem:[%s3787_s27 + $0x1c8] sm:$0xff] %vm1527_vm1, %v7233_v33  ;;  %v4199_v25 = vld [vmem:[%s3734_s23 + $0x220] sm:$0xff]  ;;  %v735_v26 = vsel %vm598_vm0, %v4187_v17, 0.0  ;;  %v4211_v35 = vld [vmem:[%s3734_s23 + $0x248] sm:$0xff] }
  0x35   : > { %1586 = vst.msk [vmem:[%s3787_s27 + $0x1d0] sm:$0xff] %vm1527_vm1, %v7233_v33  ;;  %1587 = vst.msk [vmem:[%s3787_s27 + $0x1d8] sm:$0xff] %vm1527_vm1, %v7233_v33  ;;  %661 = vadd.xlane.f32.xlu1 %v660_v5  ;;  %v723_v5 = vsel %vm598_vm0, %v4148_v60, 0.0  ;;  %v4218_v41 = vld [vmem:[%s3734_s23 + $0x250] sm:$0xff]  ;;  %v4223_v43 = vld [vmem:[%s3734_s23 + $0x240] sm:$0xff]  ;;  %v743_v2 = vsel %vm598_vm0, %v4211_v35, 0.0 }
  0x36   : > { %1588 = vst.msk [vmem:[%s3787_s27 + $0x1e0] sm:$0xff] %vm1527_vm1, %v7233_v33  ;;  %1589 = vst.msk [vmem:[%s3787_s27 + $0x1e8] sm:$0xff] %vm1527_vm1, %v7233_v33  ;;  %657 = vadd.xlane.f32.xlu0 %v656_v6  ;;  %v4161_v6 = vld [vmem:[%s3734_s23 + $0x1e0] sm:$0xff]  ;;  %v724_v10 = vadd.f32 %v723_v5, %v4156_v3  ;;  %v4228_v0 = vld [vmem:[%s3734_s23 + $0x278] sm:$0xff]  ;;  %v744_v57 = vadd.f32 %v743_v2, %v4223_v43  ;;  %v960_v2 = vmul.f32 %v4115_v45, %v4115_v45 }
  0x37   : > { %1590 = vst.msk [vmem:[%s3787_s27 + $0x1f0] sm:$0xff] %vm1527_vm1, %v7233_v33  ;;  %1591 = vst.msk [vmem:[%s3787_s27 + $0x1f8] sm:$0xff] %vm1527_vm1, %v7233_v33  ;;  %v720_v11 = vadd.f32 %v719_v7, %v4161_v6  ;;  %v4242_v59 = vld [vmem:[%s3734_s23 + $0x270] sm:$0xff]  ;;  %v4252_v7 = vld [vmem:[%s3734_s23 + $0x298] sm:$0xff]  ;;  %v4354_v45 = vmul.f32 %v4143_v58, %v4143_v58  ;;  %v4371_v58 = vmul.f32 %v4161_v6, %v4161_v6 }
  0x38   : > { %1592 = vst.msk [vmem:[%s3787_s27 + $0x200] sm:$0xff] %vm1527_vm1, %v7233_v33  ;;  %1593 = vst.msk [vmem:[%s3787_s27 + $0x208] sm:$0xff] %vm1527_vm1, %v7233_v33 }
  0x39   : > { %1594 = vst.msk [vmem:[%s3787_s27 + $0x210] sm:$0xff] %vm1527_vm1, %v7233_v33  ;;  %1595 = vst.msk [vmem:[%s3787_s27 + $0x218] sm:$0xff] %vm1527_vm1, %v7233_v33  ;;  %669 = vadd.xlane.f32.xlu1 %v668_v13  ;;  %v731_v13 = vsel %vm598_vm0, %v4166_v8, 0.0 }
  0x3a   : > { %1596 = vst.msk [vmem:[%s3787_s27 + $0x220] sm:$0xff] %vm1527_vm1, %v7233_v33  ;;  %1597 = vst.msk [vmem:[%s3787_s27 + $0x228] sm:$0xff] %vm1527_vm1, %v7233_v33  ;;  %665 = vadd.xlane.f32.xlu0 %v664_v14  ;;  %v4179_v14 = vld [vmem:[%s3734_s23 + $0x200] sm:$0xff]  ;;  %v732_v18 = vadd.f32 %v731_v13, %v4174_v12  ;;  %v4260_v13 = vmul.f32 %v4070_v23, %v4070_v23  ;;  %v4278_v23 = vmul.f32 %v4077_v27, %v4077_v27 }
  0x3b   : > { %1598 = vst.msk [vmem:[%s3787_s27 + $0x230] sm:$0xff] %vm1527_vm1, %v7233_v33  ;;  %1599 = vst.msk [vmem:[%s3787_s27 + $0x238] sm:$0xff] %vm1527_vm1, %v7233_v33  ;;  %v728_v20 = vadd.f32 %v727_v15, %v4179_v14  ;;  %v4298_v27 = vmul.f32 %v4102_v40, %v4102_v40  ;;  %v4322_v40 = vmul.f32 %v4112_v44, %v4112_v44 }
  0x3c   : > { %1600 = vst.msk [vmem:[%s3787_s27 + $0x240] sm:$0xff] %vm1527_vm1, %v7233_v33  ;;  %1601 = vst.msk [vmem:[%s3787_s27 + $0x248] sm:$0xff] %vm1527_vm1, %v7233_v33  ;;  %v4338_v44 = vmul.f32 %v4138_v56, %v4138_v56  ;;  %v964_v56 = vmul.f32 %v4133_v53, %v4133_v53  ;;  %v968_v53 = vmul.f32 %v4151_v61, %v4151_v61 }
  0x3d   : > { %1602 = vst.msk [vmem:[%s3787_s27 + $0x250] sm:$0xff] %vm1527_vm1, %v7233_v33  ;;  %1603 = vst.msk [vmem:[%s3787_s27 + $0x258] sm:$0xff] %vm1527_vm1, %v7233_v33  ;;  %677 = vadd.xlane.f32.xlu1 %v676_v21  ;;  %v4192_v21 = vld [vmem:[%s3734_s23 + $0x230] sm:$0xff]  ;;  %v4392_v61 = vmul.f32 %v4179_v14, %v4179_v14 }
  0x3e   : > { %1604 = vst.msk [vmem:[%s3787_s27 + $0x260] sm:$0xff] %vm1527_vm1, %v7233_v33  ;;  %673 = vadd.xlane.f32.xlu0 %v672_v22  ;;  %v739_v22 = vsel %vm598_vm0, %v4184_v16, 0.0  ;;  %v4410_v14 = vmul.f32 %v4192_v21, %v4192_v21  ;;  %v975_v33 = vmul.f32 %v4199_v25, %v4199_v25 }
  0x41   : > { %685 = vadd.xlane.f32.xlu1 %v684_v29  ;;  %v4204_v29 = vld [vmem:[%s3734_s23 + $0x258] sm:$0xff] }
  0x42   : > { %681 = vadd.xlane.f32.xlu0 %v680_v30  ;;  %v912_v30 = vmul.f32 %v3740_v1, %v3740_v1  ;;  %v747_v1 = vsel %vm598_vm0, %v4204_v29, 0.0 }
  0x44   : > { %v1223_v51 = vsel %vm598_vm0, %v912_v30, 0.0 }
  0x45   : > { %693 = vadd.xlane.f32.xlu1 %v692_v38  ;;  %v740_v38 = vadd.f32 %v739_v22, %v4192_v21  ;;  %v4270_v22 = vmul.f32 %v4066_v19, %v4066_v19  ;;  %v4290_v19 = vmul.f32 %v4089_v34, %v4089_v34  ;;  %v4317_v34 = vmul.f32 %v4120_v48, %v4120_v48 }
  0x46   : > { %689 = vadd.xlane.f32.xlu0 %v688_v39  ;;  %v736_v39 = vadd.f32 %v735_v26, %v4199_v25  ;;  %v4281_v26 = vld [vmem:[%s3734_s23 + $0x280] sm:$0xff]  ;;  %v4427_v21 = vmul.f32 %v4204_v29, %v4204_v29 }
  0x47   : > { %v4446_v29 = vld [vmem:[%s3734_s23 + $0x300] sm:$0xff] }
  0x49   : > { %701 = vadd.xlane.f32.xlu1 %v700_v46  ;;  %v1215_v46 = vsel %vm598_vm0, %v908_v24, 0.0  ;;  %v4274_v24 = vmul.f32 %v4084_v31, %v4084_v31  ;;  %v4294_v31 = vmul.f32 %v4080_v28, %v4080_v28  ;;  %v4313_v28 = vmul.f32 %v4097_v37, %v4097_v37 }
  0x4a   : > { %697 = vadd.xlane.f32.xlu0 %v696_v47  ;;  %v4232_v47 = vld [vmem:[%s3734_s23 + $0x268] sm:$0xff]  ;;  %v4234_v49 = vadd.f32 %v1215_v46, %v907_v32  ;;  %v4286_v32 = vld [vmem:[%s3734_s23 + $0x2b8] sm:$0xff]  ;;  %v4345_v46 = vld [vmem:[%s3734_s23 + $0x2a0] sm:$0xff] }
  0x4b   : > { %v751_v5 = vsel %vm598_vm0, %v4232_v47, 0.0  ;;  %7294 = vst [vmem:[#allocation4_spill] sm:$0xff] %v4286_v32  ;;  %v771_v48 = vsel %vm598_vm0, %v4286_v32, 0.0 }
  0x4c   : > { %7292 = vst [vmem:[#allocation2_spill] sm:$0xff] %v4234_v49 }
  0x4d   : > { %709 = vadd.xlane.f32.xlu1 %v708_v54  ;;  %v748_v54 = vadd.f32 %v747_v1, %v4218_v41  ;;  %v4330_v1 = vld [vmem:[%s3734_s23 + $0x2b0] sm:$0xff] }
  0x4e   : > { %705 = vadd.xlane.f32.xlu0 %v704_v55  ;;  %v4238_v55 = vadd.f32 %v1223_v51, %v911_v4  ;;  %v4302_v4 = vmul.f32 %v4094_v36, %v4094_v36  ;;  %7295 = vst [vmem:[#allocation5_spill] sm:$0xff] %v4330_v1 }
  0x50   : > { %7293 = vst [vmem:[#allocation3_spill] sm:$0xff] %v4238_v55  ;;  %v4430_v55 = vld [vmem:[%s3734_s23 + $0x2f0] sm:$0xff] }
  0x51   : > { %717 = vadd.xlane.f32.xlu1 %v716_v62  ;;  %v755_v62 = vsel %vm598_vm0, %v4228_v0, 0.0 }
  0x52   : > { %713 = vadd.xlane.f32.xlu0 %v712_v63  ;;  %v4247_v63 = vld [vmem:[%s3734_s23 + $0x260] sm:$0xff] }
  0x53   : > { %v752_v15 = vadd.f32 %v751_v5, %v4247_v63  ;;  %v4377_v5 = vmul.f32 %v4174_v12, %v4174_v12 }
  0x55   : > { %725 = vadd.xlane.f32.xlu1 %v724_v10  ;;  %v4255_v10 = vld [vmem:[%s3734_s23 + $0x288] sm:$0xff] }
  0x56   : > { %721 = vadd.xlane.f32.xlu0 %v720_v11  ;;  %v756_v11 = vadd.f32 %v755_v62, %v4242_v59  ;;  %v759_v30 = vsel %vm598_vm0, %v4255_v10, 0.0  ;;  %v4367_v62 = vld [vmem:[%s3734_s23 + $0x2c8] sm:$0xff] }
  0x57   : > { %v760_v37 = vadd.f32 %v759_v30, %v4281_v26  ;;  %7297 = vst [vmem:[#allocation7_spill] sm:$0xff] %v4367_v62  ;;  %v4401_v30 = vld [vmem:[%s3734_s23 + $0x318] sm:$0xff] }
  0x58   : > { %7301 = vst [vmem:[#allocation11_spill] sm:$0xff] %v4401_v30 }
  0x59   : > { %733 = vadd.xlane.f32.xlu1 %v732_v18  ;;  %v4264_v18 = vld [vmem:[%s3734_s23 + $0x290] sm:$0xff] }
  0x5a   : > { %729 = vadd.xlane.f32.xlu0 %v728_v20  ;;  %v763_v20 = vsel %vm598_vm0, %v4252_v7, 0.0 }
  0x5b   : > { %v764_v36 = vadd.f32 %v763_v20, %v4264_v18  ;;  %v4398_v20 = vld [vmem:[%s3734_s23 + $0x2e8] sm:$0xff] }
  0x5c   : > { %7300 = vst [vmem:[#allocation10_spill] sm:$0xff] %v4398_v20  ;;  %v783_v25 = vsel %vm598_vm0, %v4398_v20, 0.0  ;;  %v1299_v20 = vsel %vm598_vm0, %v4270_v22, 0.0 }
  0x5d   : > { %741 = vadd.xlane.f32.xlu1 %v740_v38  ;;  %v4305_v38 = vld [vmem:[%s3734_s23 + $0x2a8] sm:$0xff]  ;;  %v4472_v22 = vadd.f32 %v1299_v20, %v4260_v13  ;;  %v1315_v13 = vsel %vm598_vm0, %v4302_v4, 0.0 }
  0x5e   : > { %737 = vadd.xlane.f32.xlu0 %v736_v39  ;;  %v4309_v39 = vmul.f32 %v4107_v42, %v4107_v42  ;;  %v4326_v42 = vmul.f32 %v4125_v50, %v4125_v50  ;;  %v4342_v50 = vmul.f32 %v4130_v52, %v4130_v52  ;;  %v767_v51 = vsel %vm598_vm0, %v4305_v38, 0.0  ;;  %v4500_v20 = vld [vmem:[%s3734_s23 + $0x328] sm:$0xff] }
  0x5f   : > { %v4364_v52 = vmul.f32 %v4148_v60, %v4148_v60  ;;  %v4381_v60 = vld [vmem:[%s3734_s23 + $0x2d0] sm:$0xff]  ;;  %v768_v6 = vadd.f32 %v767_v51, %v4345_v46  ;;  %v775_v51 = vsel %vm598_vm0, %v4367_v62, 0.0 }
  0x60   : > { %7298 = vst [vmem:[#allocation8_spill] sm:$0xff] %v4381_v60  ;;  %v1331_v4 = vsel %vm598_vm0, %v4342_v50, 0.0 }
  0x61   : > { %749 = vadd.xlane.f32.xlu1 %v748_v54  ;;  %v4350_v54 = vld [vmem:[%s3734_s23 + $0x2d8] sm:$0xff] }
  0x62   : > { %745 = vadd.xlane.f32.xlu0 %v744_v57  ;;  %7296 = vst [vmem:[#allocation6_spill] sm:$0xff] %v4350_v54  ;;  %v4360_v57 = vmul.f32 %v4156_v3, %v4156_v3  ;;  %v772_v3 = vadd.f32 %v771_v48, %v4330_v1  ;;  %v779_v12 = vsel %vm598_vm0, %v4350_v54, 0.0  ;;  %v4417_v48 = vld [vmem:[%s3734_s23 + $0x2c0] sm:$0xff]  ;;  %v4441_v1 = vld [vmem:[%s3734_s23 + $0x310] sm:$0xff] }
  0x63   : > { %v780_v49 = vadd.f32 %v779_v12, %v4381_v60  ;;  %v4436_v54 = vld [vmem:[%s3734_s23 + $0x2e0] sm:$0xff]  ;;  %v776_v12 = vadd.f32 %v775_v51, %v4417_v48  ;;  %v1303_v60 = vsel %vm598_vm0, %v4294_v31, 0.0 }
  0x65   : > { %757 = vadd.xlane.f32.xlu1 %v756_v11  ;;  %v4384_v11 = vld [vmem:[%s3734_s23 + $0x2f8] sm:$0xff] }
  0x66   : > { %753 = vadd.xlane.f32.xlu0 %v752_v15  ;;  %7299 = vst [vmem:[#allocation9_spill] sm:$0xff] %v4384_v11  ;;  %v4388_v15 = vmul.f32 %v4166_v8, %v4166_v8  ;;  %v972_v8 = vmul.f32 %v4169_v9, %v4169_v9  ;;  %v976_v9 = vmul.f32 %v4187_v17, %v4187_v17  ;;  %v795_v17 = vsel %vm598_vm0, %v4401_v30, 0.0 }
  0x67   : > { %v980_v30 = vmul.f32 %v4211_v35, %v4211_v35  ;;  %v796_v51 = vadd.f32 %v795_v17, %v4441_v1  ;;  %v4552_v17 = vld [vmem:[%s3734_s23 + $0x348] sm:$0xff] }
  0x69   : > { %765 = vadd.xlane.f32.xlu1 %v764_v36  ;;  %v4404_v36 = vld [vmem:[%s3734_s23 + $0x308] sm:$0xff] }
  0x6a   : > { %761 = vadd.xlane.f32.xlu0 %v760_v37  ;;  %7302 = vst [vmem:[#allocation12_spill] sm:$0xff] %v4404_v36  ;;  %v4414_v37 = vmul.f32 %v4184_v16, %v4184_v16  ;;  %v787_v16 = vsel %vm598_vm0, %v4384_v11, 0.0  ;;  %v791_v62 = vsel %vm598_vm0, %v4404_v36, 0.0  ;;  %v4454_v11 = vld [vmem:[%s3734_s23 + $0x338] sm:$0xff]  ;;  %v984_v36 = vmul.f32 %v4232_v47, %v4232_v47 }
  0x6b   : > { %v788_v32 = vadd.f32 %v787_v16, %v4430_v55  ;;  %v792_v31 = vadd.f32 %v791_v62, %v4446_v29  ;;  %v803_v35 = vsel %vm598_vm0, %v4454_v11, 0.0  ;;  %v1311_v47 = vsel %vm598_vm0, %v4313_v28, 0.0 }
  0x6c   : > { %v4482_v16 = vadd.f32 %v1311_v47, %v4309_v39  ;;  %v4493_v28 = vadd.f32 %v1315_v13, %v4298_v27  ;;  %v1335_v39 = vsel %vm598_vm0, %v968_v53, 0.0  ;;  %v4521_v53 = vld [vmem:[%s3734_s23 + $0x330] sm:$0xff]  ;;  %v985_v47 = vmul.f32 %v4242_v59, %v4242_v59 }
  0x6d   : > { %773 = vadd.xlane.f32.xlu1 %v772_v3  ;;  %v979_v3 = vmul.f32 %v4223_v43, %v4223_v43  ;;  %v4466_v43 = vadd.f32 %v1303_v60, %v4290_v19  ;;  %v1307_v19 = vsel %vm598_vm0, %v4278_v23, 0.0  ;;  %v1319_v60 = vsel %vm598_vm0, %v960_v2, 0.0  ;;  %v4597_v59 = vld [vmem:[%s3734_s23 + $0x370] sm:$0xff] }
  0x6e   : > { %769 = vadd.xlane.f32.xlu0 %v768_v6  ;;  %v784_v6 = vadd.f32 %v783_v25, %v4436_v54  ;;  %v4485_v62 = vadd.f32 %v1307_v19, %v4274_v24  ;;  %v1327_v23 = vsel %vm598_vm0, %v964_v56, 0.0  ;;  %v1323_v2 = vsel %vm598_vm0, %v4322_v40, 0.0  ;;  %v4586_v19 = vld [vmem:[%s3734_s23 + $0x368] sm:$0xff] }
  0x6f   : > { %v4503_v24 = vadd.f32 %v1327_v23, %v4354_v45  ;;  %v4509_v27 = vadd.f32 %v1335_v39, %v4371_v58  ;;  %v4514_v40 = vadd.f32 %v1331_v4, %v4338_v44  ;;  %v1343_v56 = vsel %vm598_vm0, %v972_v8, 0.0  ;;  %v4534_v8 = vld [vmem:[%s3734_s23 + $0x320] sm:$0xff] }
  0x70   : > { %v1339_v45 = vsel %vm598_vm0, %v4364_v52, 0.0  ;;  %v4524_v58 = vadd.f32 %v1343_v56, %v4392_v61  ;;  %v1347_v44 = vsel %vm598_vm0, %v4388_v15, 0.0  ;;  %v799_v52 = vsel %vm598_vm0, %v4500_v20, 0.0  ;;  %v4604_v39 = vld [vmem:[%s3734_s23 + $0x360] sm:$0xff]  ;;  %v4609_v56 = vld [vmem:[%s3734_s23 + $0x398] sm:$0xff] }
  0x71   : > { %781 = vadd.xlane.f32.xlu1 %v780_v49  ;;  %v4488_v49 = vadd.f32 %v1319_v60, %v4326_v42  ;;  %v4506_v42 = vadd.f32 %v1323_v2, %v4317_v34  ;;  %v1351_v34 = vsel %vm598_vm0, %v976_v9, 0.0  ;;  %v4527_v50 = vadd.f32 %v1339_v45, %v4360_v57  ;;  %v4539_v9 = vld [vmem:[%s3734_s23 + $0x358] sm:$0xff] }
  0x72   : > { %777 = vadd.xlane.f32.xlu0 %v776_v12  ;;  %v4542_v25 = vadd.f32 %v1347_v44, %v4377_v5  ;;  %v1359_v57 = vsel %vm598_vm0, %v980_v30, 0.0  ;;  %v981_v15 = vmul.f32 %v4218_v41, %v4218_v41  ;;  %v983_v61 = vmul.f32 %v4247_v63, %v4247_v63  ;;  %v4618_v44 = vld [vmem:[%s3734_s23 + $0x388] sm:$0xff] }
  0x73   : > { %v4554_v12 = vadd.f32 %v1359_v57, %v979_v3  ;;  %v804_v30 = vadd.f32 %v803_v35, %v4521_v53  ;;  %v800_v41 = vadd.f32 %v799_v52, %v4534_v8  ;;  %v811_v63 = vsel %vm598_vm0, %v4539_v9, 0.0  ;;  %v4576_v35 = vld [vmem:[%s3734_s23 + $0x378] sm:$0xff] }
  0x74   : > { %v988_v3 = vmul.f32 %v4255_v10, %v4255_v10  ;;  %v987_v10 = vmul.f32 %v4281_v26, %v4281_v26  ;;  %v819_v26 = vsel %vm598_vm0, %v4576_v35, 0.0  ;;  %v992_v2 = vmul.f32 %v4305_v38, %v4305_v38 }
  0x75   : > { %789 = vadd.xlane.f32.xlu1 %v788_v32  ;;  %v4529_v32 = vadd.f32 %v1351_v34, %v975_v33  ;;  %v1355_v33 = vsel %vm598_vm0, %v4414_v37, 0.0  ;;  %7303 = vst [vmem:[#allocation13_spill] sm:$0xff] %v4554_v12  ;;  %v986_v37 = vmul.f32 %v4228_v0, %v4228_v0  ;;  %v1367_v0 = vsel %vm598_vm0, %v984_v36, 0.0 }
  0x76   : > { %785 = vadd.xlane.f32.xlu0 %v784_v6  ;;  %v4557_v5 = vadd.f32 %v1355_v33, %v4410_v14  ;;  %v4564_v6 = vld [vmem:[%s3734_s23 + $0x350] sm:$0xff]  ;;  %v4571_v14 = vld [vmem:[%s3734_s23 + $0x340] sm:$0xff]  ;;  %v4588_v60 = vadd.f32 %v1367_v0, %v983_v61  ;;  %v815_v4 = vsel %vm598_vm0, %v4586_v19, 0.0  ;;  %v989_v34 = vmul.f32 %v4264_v18, %v4264_v18 }
  0x77   : > { %v812_v36 = vadd.f32 %v811_v63, %v4564_v6  ;;  %v1371_v45 = vsel %vm598_vm0, %v986_v37, 0.0  ;;  %v991_v38 = vmul.f32 %v4345_v46, %v4345_v46  ;;  %v820_v33 = vadd.f32 %v819_v26, %v4597_v59  ;;  %v4629_v18 = vld [vmem:[%s3734_s23 + $0x390] sm:$0xff]  ;;  %v7310_v37 = vld [vmem:[#allocation7_spill] sm:$0xff]  ;;  %v4636_v63 = vld [vmem:[%s3734_s23 + $0x380] sm:$0xff] }
  0x78   : > { %7304 = vst [vmem:[#allocation14_spill] sm:$0xff] %v4557_v5  ;;  %7305 = vst [vmem:[#allocation15_spill] sm:$0xff] %v4588_v60  ;;  %v4622_v57 = vadd.f32 %v1371_v45, %v985_v47  ;;  %v827_v46 = vsel %vm598_vm0, %v4609_v56, 0.0  ;;  %v1383_v0 = vsel %vm598_vm0, %v992_v2, 0.0  ;;  %v7311_v47 = vld [vmem:[#allocation5_spill] sm:$0xff]  ;;  %v7314_v2 = vld [vmem:[#allocation6_spill] sm:$0xff] }
  0x79   : > { %797 = vadd.xlane.f32.xlu1 %v796_v51  ;;  %v807_v51 = vsel %vm598_vm0, %v4552_v17, 0.0  ;;  %v4652_v26 = vadd.f32 %v1383_v0, %v991_v38  ;;  %v7316_v0 = vld [vmem:[#allocation8_spill] sm:$0xff]  ;;  %v1685_v5 = vld [vmem:[%s3787_s27 + $0x18] sm:$0xff] }
  0x7a   : > { %793 = vadd.xlane.f32.xlu0 %v792_v31  ;;  %v1363_v31 = vsel %vm598_vm0, %v4427_v21, 0.0  ;;  %v990_v21 = vmul.f32 %v4252_v7, %v4252_v7  ;;  %v808_v23 = vadd.f32 %v807_v51, %v4571_v14  ;;  %v1375_v7 = vsel %vm598_vm0, %v988_v3, 0.0  ;;  %7308 = vst [vmem:[#allocation18_spill] sm:$0xff] %v4622_v57  ;;  %v4641_v51 = vld [vmem:[%s3734_s23 + $0x3b8] sm:$0xff] }
  0x7b   : > { %v4590_v13 = vadd.f32 %v1363_v31, %v981_v15  ;;  %v4620_v52 = vadd.f32 %v1375_v7, %v987_v10  ;;  %v7309_v15 = vld [vmem:[#allocation4_spill] sm:$0xff]  ;;  %v823_v3 = vsel %vm598_vm0, %v4618_v44, 0.0  ;;  %v993_v10 = vmul.f32 %v7311_v47, %v7311_v47 }
  0x7c   : > { %v994_v61 = vmul.f32 %v7309_v15, %v7309_v15  ;;  %v1379_v31 = vsel %vm598_vm0, %v990_v21, 0.0  ;;  %7312 = vst [vmem:[#allocation4_spill] sm:$0xff] %v4652_v26  ;;  %v828_v7 = vadd.f32 %v827_v46, %v4629_v18  ;;  %v998_v21 = vmul.f32 %v7314_v2, %v7314_v2  ;;  %v4661_v15 = vld [vmem:[%s3734_s23 + $0x3b0] sm:$0xff]  ;;  %v4673_v46 = vld [vmem:[%s3734_s23 + $0x3d8] sm:$0xff]  ;;  %v4682_v2 = vld [vmem:[%s3734_s23 + $0x3c8] sm:$0xff] }
  0x7d   : > { %7306 = vst [vmem:[#allocation16_spill] sm:$0xff] %v4590_v13  ;;  %805 = vadd.xlane.f32.xlu1 %v804_v30  ;;  %7307 = vst [vmem:[#allocation17_spill] sm:$0xff] %v4620_v52  ;;  %v816_v30 = vadd.f32 %v815_v4, %v4604_v39  ;;  %v4654_v4 = vadd.f32 %v1379_v31, %v989_v34  ;;  %v824_v45 = vadd.f32 %v823_v3, %v4636_v63  ;;  %v4668_v34 = vld [vmem:[%s3734_s23 + $0x3a0] sm:$0xff]  ;;  %v7320_v52 = vld [vmem:[#allocation12_spill] sm:$0xff] }
  0x7e   : > { %801 = vadd.xlane.f32.xlu0 %v800_v41  ;;  %v996_v41 = vmul.f32 %v7310_v37, %v7310_v37  ;;  %v7315_v37 = vld [vmem:[#allocation10_spill] sm:$0xff]  ;;  %v1387_v3 = vsel %vm598_vm0, %v994_v61, 0.0  ;;  %v997_v31 = vmul.f32 %v7316_v0, %v7316_v0  ;;  %v999_v47 = vmul.f32 %v4436_v54, %v4436_v54  ;;  %v4693_v0 = vld [vmem:[%s3734_s23 + $0x3d0] sm:$0xff] }
  0x7f   : > { %7313 = vst [vmem:[#allocation7_spill] sm:$0xff] %v4654_v4  ;;  %v1000_v38 = vmul.f32 %v7315_v37, %v7315_v37  ;;  %v4686_v4 = vadd.f32 %v1387_v3, %v993_v10  ;;  %v843_v54 = vsel %vm598_vm0, %v4673_v46, 0.0  ;;  %v4700_v10 = vld [vmem:[%s3734_s23 + $0x3c0] sm:$0xff]  ;;  %v4714_v3 = vld [vmem:[%s3734_s23 + $0x3e8] sm:$0xff] }
  0x81   : > { %813 = vadd.xlane.f32.xlu1 %v812_v36  ;;  %v995_v36 = vmul.f32 %v4417_v48, %v4417_v48  ;;  %v835_v48 = vsel %vm598_vm0, %v4641_v51, 0.0  ;;  %7318 = vst [vmem:[#allocation6_spill] sm:$0xff] %v4686_v4 }
  0x82   : > { %809 = vadd.xlane.f32.xlu0 %v808_v23  ;;  %v4650_v23 = vld [vmem:[%s3734_s23 + $0x3a8] sm:$0xff]  ;;  %v836_v26 = vadd.f32 %v835_v48, %v4661_v15  ;;  %v4705_v48 = vld [vmem:[%s3734_s23 + $0x3f8] sm:$0xff] }
  0x85   : > { %821 = vadd.xlane.f32.xlu1 %v820_v33  ;;  %v831_v33 = vsel %vm598_vm0, %v4650_v23, 0.0 }
  0x86   : > { %817 = vadd.xlane.f32.xlu0 %v816_v30  ;;  %v1391_v30 = vsel %vm598_vm0, %v996_v41, 0.0  ;;  %v7319_v41 = vld [vmem:[#allocation9_spill] sm:$0xff]  ;;  %v832_v57 = vadd.f32 %v831_v33, %v4668_v34  ;;  %v1395_v33 = vsel %vm598_vm0, %v998_v21, 0.0 }
  0x87   : > { %v4684_v37 = vadd.f32 %v1391_v30, %v995_v36  ;;  %v1002_v61 = vmul.f32 %v7319_v41, %v7319_v41  ;;  %v1004_v36 = vmul.f32 %v7320_v52, %v7320_v52  ;;  %v1001_v30 = vmul.f32 %v4430_v55, %v4430_v55  ;;  %v4725_v55 = vld [vmem:[%s3734_s23 + $0x3f0] sm:$0xff] }
  0x88   : > { %v1003_v52 = vmul.f32 %v4446_v29, %v4446_v29  ;;  %v4718_v4 = vadd.f32 %v1395_v33, %v997_v31  ;;  %v851_v29 = vsel %vm598_vm0, %v4705_v48, 0.0  ;;  %v4732_v31 = vld [vmem:[%s3734_s23 + $0x3e0] sm:$0xff]  ;;  %v4746_v33 = vld [vmem:[%s3734_s23 + $0x408] sm:$0xff] }
  0x89   : > { %7317 = vst [vmem:[#allocation5_spill] sm:$0xff] %v4684_v37  ;;  %829 = vadd.xlane.f32.xlu1 %v828_v7  ;;  %v839_v7 = vsel %vm598_vm0, %v4682_v2, 0.0  ;;  %v844_v37 = vadd.f32 %v843_v54, %v4693_v0  ;;  %v4737_v54 = vld [vmem:[%s3734_s23 + $0x418] sm:$0xff] }
  0x8a   : > { %825 = vadd.xlane.f32.xlu0 %v824_v45  ;;  %v1399_v45 = vsel %vm598_vm0, %v1000_v38, 0.0  ;;  %7322 = vst [vmem:[#allocation8_spill] sm:$0xff] %v4718_v4  ;;  %v7323_v38 = vld [vmem:[#allocation11_spill] sm:$0xff]  ;;  %v840_v13 = vadd.f32 %v839_v7, %v4700_v10  ;;  %v1403_v7 = vsel %vm598_vm0, %v1002_v61, 0.0  ;;  %v1010_v61 = vmul.f32 %v4454_v11, %v4454_v11 }
  0x8b   : > { %v4716_v41 = vadd.f32 %v1399_v45, %v999_v47  ;;  %v1006_v21 = vmul.f32 %v7323_v38, %v7323_v38  ;;  %v1008_v47 = vmul.f32 %v4500_v20, %v4500_v20  ;;  %v1005_v45 = vmul.f32 %v4441_v1, %v4441_v1  ;;  %v4757_v1 = vld [vmem:[%s3734_s23 + $0x410] sm:$0xff] }
  0x8c   : > { %v1007_v20 = vmul.f32 %v4534_v8, %v4534_v8  ;;  %v4750_v4 = vadd.f32 %v1403_v7, %v1001_v30  ;;  %v859_v8 = vsel %vm598_vm0, %v4737_v54, 0.0  ;;  %v4764_v30 = vld [vmem:[%s3734_s23 + $0x400] sm:$0xff] }
  0x8d   : > { %7321 = vst [vmem:[#allocation10_spill] sm:$0xff] %v4716_v41  ;;  %837 = vadd.xlane.f32.xlu1 %v836_v26  ;;  %v847_v26 = vsel %vm598_vm0, %v4714_v3, 0.0  ;;  %v852_v41 = vadd.f32 %v851_v29, %v4725_v55  ;;  %v4769_v29 = vld [vmem:[%s3734_s23 + $0x438] sm:$0xff]  ;;  %v1415_v11 = vsel %vm598_vm0, %v1008_v47, 0.0 }
  0x8e   : > { %833 = vadd.xlane.f32.xlu0 %v832_v57  ;;  %v1407_v57 = vsel %vm598_vm0, %v1004_v36, 0.0  ;;  %7325 = vst [vmem:[#allocation12_spill] sm:$0xff] %v4750_v4  ;;  %v848_v36 = vadd.f32 %v847_v26, %v4732_v31  ;;  %v1009_v26 = vmul.f32 %v4521_v53, %v4521_v53  ;;  %v4780_v7 = vadd.f32 %v1415_v11, %v1007_v20  ;;  %v4789_v53 = vld [vmem:[%s3734_s23 + $0x430] sm:$0xff]  ;;  %v4810_v11 = vld [vmem:[%s3734_s23 + $0x448] sm:$0xff] }
  0x8f   : > { %v4748_v38 = vadd.f32 %v1407_v57, %v1003_v52  ;;  %v1012_v52 = vmul.f32 %v4552_v17, %v4552_v17  ;;  %v1011_v17 = vmul.f32 %v4571_v14, %v4571_v14  ;;  %v4778_v57 = vld [vmem:[%s3734_s23 + $0x428] sm:$0xff]  ;;  %v867_v14 = vsel %vm598_vm0, %v4769_v29, 0.0 }
  0x90   : > { %7326 = vst [vmem:[#allocation11_spill] sm:$0xff] %v4780_v7  ;;  %v1016_v20 = vmul.f32 %v4586_v19, %v4586_v19  ;;  %v1015_v19 = vmul.f32 %v4604_v39, %v4604_v39  ;;  %v868_v7 = vadd.f32 %v867_v14, %v4789_v53  ;;  %v4833_v14 = vld [vmem:[%s3734_s23 + $0x478] sm:$0xff]  ;;  %v4972_v12 = vmul.f32 %v4789_v53, %v4789_v53 }
  0x91   : > { %7324 = vst [vmem:[#allocation9_spill] sm:$0xff] %v4748_v38  ;;  %845 = vadd.xlane.f32.xlu1 %v844_v37  ;;  %v855_v37 = vsel %vm598_vm0, %v4746_v33, 0.0  ;;  %v860_v38 = vadd.f32 %v859_v8, %v4757_v1  ;;  %v4801_v8 = vld [vmem:[%s3734_s23 + $0x458] sm:$0xff]  ;;  %v4988_v53 = vmul.f32 %v4778_v57, %v4778_v57 }
  0x92   : > { %841 = vadd.xlane.f32.xlu0 %v840_v13  ;;  %v1411_v13 = vsel %vm598_vm0, %v1006_v21, 0.0  ;;  %v1014_v21 = vmul.f32 %v4539_v9, %v4539_v9  ;;  %v856_v47 = vadd.f32 %v855_v37, %v4764_v30  ;;  %v1423_v9 = vsel %vm598_vm0, %v1012_v52, 0.0 }
  0x93   : > { %v4782_v4 = vadd.f32 %v1411_v13, %v1005_v45  ;;  %v4796_v45 = vld [vmem:[%s3734_s23 + $0x420] sm:$0xff]  ;;  %v1013_v37 = vmul.f32 %v4564_v6, %v4564_v6  ;;  %v4812_v13 = vadd.f32 %v1423_v9, %v1011_v17  ;;  %v4821_v6 = vld [vmem:[%s3734_s23 + $0x450] sm:$0xff]  ;;  %v875_v39 = vsel %vm598_vm0, %v4801_v8, 0.0  ;;  %v4842_v9 = vld [vmem:[%s3734_s23 + $0x468] sm:$0xff] }
  0x94   : > { %v1020_v17 = vmul.f32 %v4618_v44, %v4618_v44  ;;  %v1019_v44 = vmul.f32 %v4636_v63, %v4636_v63  ;;  %v883_v63 = vsel %vm598_vm0, %v4833_v14, 0.0 }
  0x95   : > { %7327 = vst [vmem:[#allocation19_spill] sm:$0xff] %v4782_v4  ;;  %853 = vadd.xlane.f32.xlu1 %v852_v41  ;;  %v863_v41 = vsel %vm598_vm0, %v4778_v57, 0.0  ;;  %7328 = vst [vmem:[#allocation20_spill] sm:$0xff] %v4812_v13  ;;  %v876_v13 = vadd.f32 %v875_v39, %v4821_v6  ;;  %v4865_v39 = vld [vmem:[%s3734_s23 + $0x498] sm:$0xff] }
  0x96   : > { %849 = vadd.xlane.f32.xlu0 %v848_v36  ;;  %v1419_v36 = vsel %vm598_vm0, %v1010_v61, 0.0  ;;  %v1018_v61 = vmul.f32 %v4576_v35, %v4576_v35  ;;  %v864_v52 = vadd.f32 %v863_v41, %v4796_v45  ;;  %v1431_v35 = vsel %vm598_vm0, %v1016_v20, 0.0  ;;  %v3625_v57 = vld [vmem:[%s3734_s23 + $0x18] sm:$0xff] }
  0x97   : > { %v4814_v4 = vadd.f32 %v1419_v36, %v1009_v26  ;;  %v4828_v26 = vld [vmem:[%s3734_s23 + $0x440] sm:$0xff]  ;;  %v1017_v41 = vmul.f32 %v4597_v59, %v4597_v59  ;;  %v4844_v36 = vadd.f32 %v1431_v35, %v1015_v19  ;;  %v4853_v59 = vld [vmem:[%s3734_s23 + $0x470] sm:$0xff]  ;;  %v1024_v19 = vmul.f32 %v4650_v23, %v4650_v23  ;;  %v4874_v23 = vld [vmem:[%s3734_s23 + $0x488] sm:$0xff] }
  0x98   : > { %v1023_v35 = vmul.f32 %v4668_v34, %v4668_v34  ;;  %v884_v34 = vadd.f32 %v883_v63, %v4853_v59  ;;  %v4904_v63 = vld [vmem:[%s3734_s23 + $0x480] sm:$0xff] }
  0x99   : > { %7329 = vst [vmem:[#allocation21_spill] sm:$0xff] %v4814_v4  ;;  %861 = vadd.xlane.f32.xlu1 %v860_v38  ;;  %v871_v38 = vsel %vm598_vm0, %v4810_v11, 0.0  ;;  %7330 = vst [vmem:[#allocation22_spill] sm:$0xff] %v4844_v36 }
  0x9a   : > { %857 = vadd.xlane.f32.xlu0 %v856_v47  ;;  %v1427_v47 = vsel %vm598_vm0, %v1014_v21, 0.0  ;;  %v1022_v21 = vmul.f32 %v4609_v56, %v4609_v56  ;;  %v872_v20 = vadd.f32 %v871_v38, %v4828_v26  ;;  %v1439_v56 = vsel %vm598_vm0, %v1020_v17, 0.0 }
  0x9b   : > { %v4846_v4 = vadd.f32 %v1427_v47, %v1013_v37  ;;  %v4860_v37 = vld [vmem:[%s3734_s23 + $0x460] sm:$0xff]  ;;  %v1021_v38 = vmul.f32 %v4629_v18, %v4629_v18  ;;  %v4876_v47 = vadd.f32 %v1439_v56, %v1019_v44  ;;  %v1025_v17 = vmul.f32 %v4661_v15, %v4661_v15  ;;  %v4909_v56 = vld [vmem:[%s3734_s23 + $0x4b8] sm:$0xff] }
  0x9c   : > { %v4886_v18 = vmul.f32 %v4693_v0, %v4693_v0  ;;  %v4891_v44 = vmul.f32 %v4673_v46, %v4673_v46  ;;  %v891_v0 = vsel %vm598_vm0, %v4865_v39, 0.0  ;;  %v887_v46 = vsel %vm598_vm0, %v4874_v23, 0.0 }
  0x9d   : > { %7331 = vst [vmem:[#allocation23_spill] sm:$0xff] %v4846_v4  ;;  %869 = vadd.xlane.f32.xlu1 %v868_v7  ;;  %v879_v7 = vsel %vm598_vm0, %v4842_v9, 0.0  ;;  %7332 = vst [vmem:[#allocation24_spill] sm:$0xff] %v4876_v47 }
  0x9e   : > { %865 = vadd.xlane.f32.xlu0 %v864_v52  ;;  %v1435_v52 = vsel %vm598_vm0, %v1018_v61, 0.0  ;;  %v1026_v61 = vmul.f32 %v4641_v51, %v4641_v51  ;;  %v880_v15 = vadd.f32 %v879_v7, %v4860_v37  ;;  %v4897_v51 = vld [vmem:[%s3734_s23 + $0x490] sm:$0xff]  ;;  %v4915_v7 = vmul.f32 %v4725_v55, %v4725_v55 }
  0x9f   : > { %v4878_v4 = vadd.f32 %v1435_v52, %v1017_v41  ;;  %v1027_v41 = vmul.f32 %v4700_v10, %v4700_v10  ;;  %v1447_v10 = vsel %vm598_vm0, %v1024_v19, 0.0  ;;  %v4919_v52 = vmul.f32 %v4705_v48, %v4705_v48  ;;  %v1682_v19 = vld [vmem:[%s3787_s27] sm:$0xff] }
  0xa0   : > { %v4925_v47 = vadd.f32 %v1447_v10, %v1023_v35  ;;  %v1032_v55 = vmul.f32 %v4714_v3, %v4714_v3  ;;  %v4935_v48 = vmul.f32 %v4757_v1, %v4757_v1  ;;  %v892_v60 = vadd.f32 %v891_v0, %v4897_v51  ;;  %v4949_v10 = vld [vmem:[%s3734_s23 + $0x4b0] sm:$0xff] }
  0xa1   : > { %7333 = vst [vmem:[#allocation25_spill] sm:$0xff] %v4878_v4  ;;  %877 = vadd.xlane.f32.xlu1 %v876_v13  ;;  %v1028_v13 = vmul.f32 %v4682_v2, %v4682_v2  ;;  %v1684_v2 = vld [vmem:[%s3787_s27 + $0x10] sm:$0xff]  ;;  %v4923_v4 = vld [vmem:[%s3734_s23 + $0x4a8] sm:$0xff]  ;;  %v888_v35 = vadd.f32 %v887_v46, %v4904_v63  ;;  %v899_v1 = vsel %vm598_vm0, %v4909_v56, 0.0  ;;  %v1451_v46 = vsel %vm598_vm0, %v1026_v61, 0.0 }
  0xa2   : > { %873 = vadd.xlane.f32.xlu0 %v872_v20  ;;  %v1443_v20 = vsel %vm598_vm0, %v1022_v21, 0.0  ;;  %7334 = vst [vmem:[#allocation26_spill] sm:$0xff] %v4925_v47  ;;  %v1031_v21 = vmul.f32 %v4732_v31, %v4732_v31  ;;  %v4945_v31 = vmul.f32 %v4764_v30, %v4764_v30  ;;  %v4959_v30 = vld [vmem:[%s3734_s23 + $0x4c8] sm:$0xff]  ;;  %v4980_v61 = vmul.f32 %v4796_v45, %v4796_v45 }
  0xa3   : > { %v4927_v36 = vadd.f32 %v1443_v20, %v1021_v38  ;;  %v4941_v38 = vmul.f32 %v4737_v54, %v4737_v54  ;;  %v4954_v54 = vld [vmem:[%s3734_s23 + $0x4a0] sm:$0xff]  ;;  %v895_v20 = vsel %vm598_vm0, %v4923_v4, 0.0 }
  0xa5   : > { %7335 = vst [vmem:[#allocation27_spill] sm:$0xff] %v4927_v36  ;;  %885 = vadd.xlane.f32.xlu1 %v884_v34  ;;  %v1036_v36 = vmul.f32 %v4746_v33, %v4746_v33  ;;  %v1683_v33 = vld [vmem:[%s3787_s27 + $0x8] sm:$0xff] }
  0xa6   : > { %881 = vadd.xlane.f32.xlu0 %v880_v15  ;;  %v610_v3 = vpop.xlane.xlu1 %609  ;;  %v1455_v15 = vsel %vm598_vm0, %v1028_v13, 0.0  ;;  %v4976_v13 = vmul.f32 %v4769_v29, %v4769_v29  ;;  %v4992_v29 = vmul.f32 %v4821_v6, %v4821_v6  ;;  %v1463_v6 = vsel %vm598_vm0, %v1032_v55, 0.0 }
  0xa7   : > { %v1761_v34 = vadd.f32 %v1684_v2, %v610_v3  ;;  %v602_v0 = vpop.xlane.xlu0 %601  ;;  %v4966_v2 = vadd.f32 %v1455_v15, %v1027_v41  ;;  %v4968_v3 = vadd.f32 %v1451_v46, %v1025_v17  ;;  %v900_v17 = vadd.f32 %v899_v1, %v4949_v10 }
  0xa8   : > { %v1759_v47 = vadd.f32 %v1682_v19, %v602_v0  ;;  %v896_v41 = vadd.f32 %v895_v20, %v4954_v54  ;;  %v910_v0 = vmul.f32 %v3625_v57, %v3625_v57  ;;  %v5011_v15 = vadd.f32 %v1463_v6, %v1031_v21  ;;  %v3628_v57 = vld [vmem:[%s3734_s23 + $0x38] sm:$0xff] }
  0xa9   : > { %1839 = vst.msk [vmem:[%s3787_s27 + $0x10] sm:$0xff] %vm1527_vm1, %v1761_v34  ;;  %893 = vadd.xlane.f32.xlu1 %v892_v60  ;;  %v903_v60 = vsel %vm598_vm0, %v4959_v30, 0.0  ;;  %v5000_v34 = vld [vmem:[%s3734_s23 + $0x4c0] sm:$0xff]  ;;  %v5018_v55 = vmul.f32 %v4828_v26, %v4828_v26  ;;  %v5030_v21 = vmul.f32 %v4833_v14, %v4833_v14  ;;  %v914_v14 = vmul.f32 %v3628_v57, %v3628_v57 }
  0xaa   : > { %1837 = vst.msk [vmem:[%s3787_s27] sm:$0xff] %vm1527_vm1, %v1759_v47  ;;  %889 = vadd.xlane.f32.xlu0 %v888_v35  ;;  %v614_v45 = vpop.xlane.xlu1 %613  ;;  %v1459_v47 = vsel %vm598_vm0, %v4891_v44, 0.0  ;;  %v5008_v35 = vmul.f32 %v4801_v8, %v4801_v8  ;;  %v5022_v44 = vmul.f32 %v4810_v11, %v4810_v11  ;;  %v5026_v8 = vmul.f32 %v4853_v59, %v4853_v59 }
  0xab   : > { %v1762_v19 = vadd.f32 %v1685_v5, %v614_v45  ;;  %v606_v1 = vpop.xlane.xlu0 %605  ;;  %v1687_v5 = vld [vmem:[%s3787_s27 + $0x28] sm:$0xff]  ;;  %v5014_v46 = vadd.f32 %v1459_v47, %v4886_v18  ;;  %v1686_v18 = vld [vmem:[%s3787_s27 + $0x20] sm:$0xff]  ;;  %v904_v11 = vadd.f32 %v903_v60, %v5000_v34  ;;  %v1467_v60 = vsel %vm598_vm0, %v4919_v52, 0.0 }
  0xac   : > { %v1760_v20 = vadd.f32 %v1683_v33, %v606_v1  ;;  %v3626_v33 = vld [vmem:[%s3734_s23 + $0x10] sm:$0xff]  ;;  %v3627_v1 = vld [vmem:[%s3734_s23 + $0x48] sm:$0xff]  ;;  %v5047_v47 = vmul.f32 %v4860_v37, %v4860_v37  ;;  %v5062_v52 = vmul.f32 %v4897_v51, %v4897_v51  ;;  %v7337_v37 = vld [vmem:[#allocation2_spill] sm:$0xff] }
  0xad   : > { %1840 = vst.msk [vmem:[%s3787_s27 + $0x18] sm:$0xff] %vm1527_vm1, %v1762_v19  ;;  %901 = vadd.xlane.f32.xlu1 %v900_v17  ;;  %v909_v45 = vmul.f32 %v3626_v33, %v3626_v33  ;;  %v916_v59 = vmul.f32 %v3627_v1, %v3627_v1  ;;  %v1219_v17 = vsel %vm598_vm0, %v910_v0, 0.0  ;;  %v1689_v33 = vld [vmem:[%s3787_s27 + $0x38] sm:$0xff]  ;;  %v1688_v0 = vld [vmem:[%s3787_s27 + $0x30] sm:$0xff]  ;;  %v3631_v51 = vld [vmem:[%s3734_s23 + $0x68] sm:$0xff] }
  0xae   : > { %1838 = vst.msk [vmem:[%s3787_s27 + $0x8] sm:$0xff] %vm1527_vm1, %v1760_v20  ;;  %897 = vadd.xlane.f32.xlu0 %v896_v41  ;;  %v622_v26 = vpop.xlane.xlu1 %621  ;;  %v1471_v41 = vsel %vm598_vm0, %v1036_v36, 0.0  ;;  %v5058_v36 = vmul.f32 %v4842_v9, %v4842_v9 }
  0xaf   : > { %v1764_v6 = vadd.f32 %v1687_v5, %v622_v26  ;;  %v618_v19 = vpop.xlane.xlu0 %617  ;;  %v5051_v1 = vadd.f32 %v1471_v41, %v4945_v31  ;;  %v5054_v5 = vadd.f32 %v1467_v60, %v4915_v7  ;;  %v3629_v31 = vld [vmem:[%s3734_s23 + $0x40] sm:$0xff]  ;;  %v3630_v26 = vld [vmem:[%s3734_s23 + $0x30] sm:$0xff]  ;;  %v1220_v7 = vadd.f32 %v1219_v17, %v909_v45  ;;  %v1691_v17 = vld [vmem:[%s3787_s27 + $0x48] sm:$0xff] }
  0xb0   : > { %v1763_v20 = vadd.f32 %v1686_v18, %v618_v19  ;;  %v915_v18 = vmul.f32 %v3629_v31, %v3629_v31  ;;  %v913_v57 = vmul.f32 %v3630_v26, %v3630_v26  ;;  %v1231_v19 = vsel %vm598_vm0, %v916_v59, 0.0 }
  0xb1   : > { %7336 = vst [vmem:[#allocation28_spill] sm:$0xff] %v5054_v5  ;;  %1842 = vst.msk [vmem:[%s3787_s27 + $0x28] sm:$0xff] %vm1527_vm1, %v1764_v6  ;;  %1217 = vadd.xlane.f32.xlu1 %v7337_v37  ;;  %v920_v41 = vmul.f32 %v3631_v51, %v3631_v51  ;;  %v3632_v6 = vld [vmem:[%s3734_s23 + $0x58] sm:$0xff]  ;;  %v1227_v31 = vsel %vm598_vm0, %v914_v14, 0.0  ;;  %v5082_v45 = vmul.f32 %v4865_v39, %v4865_v39  ;;  %v1690_v14 = vld [vmem:[%s3787_s27 + $0x40] sm:$0xff] }
  0xb2   : > { %1841 = vst.msk [vmem:[%s3787_s27 + $0x20] sm:$0xff] %vm1527_vm1, %v1763_v20  ;;  %905 = vadd.xlane.f32.xlu0 %v904_v11  ;;  %v630_v9 = vpop.xlane.xlu1 %629  ;;  %v918_v60 = vmul.f32 %v3632_v6, %v3632_v6  ;;  %v1479_v20 = vsel %vm598_vm0, %v4988_v53, 0.0  ;;  %v1475_v11 = vsel %vm598_vm0, %v4941_v38, 0.0  ;;  %v5093_v53 = vmul.f32 %v4904_v63, %v4904_v63  ;;  %v7338_v38 = vld [vmem:[#allocation3_spill] sm:$0xff] }
  0xb3   : > { %v1766_v37 = vadd.f32 %v1689_v33, %v630_v9  ;;  %v626_v5 = vpop.xlane.xlu0 %625  ;;  %v5086_v26 = vadd.f32 %v1479_v20, %v4980_v61  ;;  %v5089_v33 = vadd.f32 %v1475_v11, %v4935_v48  ;;  %v5099_v39 = vadd.f32 %v1231_v19, %v915_v18  ;;  %v3634_v61 = vld [vmem:[%s3734_s23 + $0x50] sm:$0xff]  ;;  %v3635_v19 = vld [vmem:[%s3734_s23 + $0x88] sm:$0xff]  ;;  %v3636_v11 = vld [vmem:[%s3734_s23 + $0x78] sm:$0xff] }
  0xb4   : > { %v1765_v59 = vadd.f32 %v1688_v0, %v626_v5  ;;  %v3633_v5 = vld [vmem:[%s3734_s23 + $0x60] sm:$0xff]  ;;  %v5105_v48 = vmul.f32 %v3634_v61, %v3634_v61  ;;  %v5109_v9 = vadd.f32 %v1227_v31, %v913_v57  ;;  %v5112_v51 = vsel %vm598_vm0, %v920_v41, 0.0  ;;  %v5142_v41 = vld [vmem:[%s3787_s27 + $0x58] sm:$0xff] }
  0xb5   : > { %1844 = vst.msk [vmem:[%s3787_s27 + $0x38] sm:$0xff] %vm1527_vm1, %v1766_v37  ;;  %1225 = vadd.xlane.f32.xlu1 %v7338_v38  ;;  %v5102_v0 = vmul.f32 %v3633_v5, %v3633_v5  ;;  %v5115_v18 = vsel %vm598_vm0, %v918_v60, 0.0  ;;  %v5118_v6 = vmul.f32 %v3635_v19, %v3635_v19  ;;  %v5123_v38 = vmul.f32 %v3636_v11, %v3636_v11  ;;  %v3639_v19 = vld [vmem:[%s3734_s23 + $0xa8] sm:$0xff] }
  0xb6   : > { %1843 = vst.msk [vmem:[%s3787_s27 + $0x30] sm:$0xff] %vm1527_vm1, %v1765_v59  ;;  %1221 = vadd.xlane.f32.xlu0 %v1220_v7  ;;  %v638_v63 = vpop.xlane.xlu1 %637  ;;  %v1487_v7 = vsel %vm598_vm0, %v5022_v44, 0.0  ;;  %v1483_v57 = vsel %vm598_vm0, %v4976_v13, 0.0  ;;  %v5137_v44 = vmul.f32 %v4874_v23, %v4874_v23  ;;  %v7339_v59 = vmov 0.0   ;;  %v1692_v23 = vld [vmem:[%s3787_s27 + $0x50] sm:$0xff] }
  0xb7   : > { %v5120_v37 = vadd.f32 %v1691_v17, %v638_v63  ;;  %v634_v20 = vpop.xlane.xlu0 %633  ;;  %v5145_v60 = vadd.f32 %v1487_v7, %v5018_v55  ;;  %v5148_v31 = vadd.f32 %v1483_v57, %v4972_v12  ;;  %1605 = vst.msk [vmem:[%s5133_s30] sm:$0xff] %vm1527_vm1, %v7339_v59  ;;  %1606 = vst.msk [vmem:[%s5133_s30 + $0x8] sm:$0xff] %vm1527_vm1, %v7339_v59  ;;  %v1247_v61 = vsel %vm598_vm0, %v5118_v6, 0.0  ;;  %v1695_v57 = vld [vmem:[%s3787_s27 + $0x68] sm:$0xff] }
  0xb8   : > { %v5139_v13 = vadd.f32 %v1690_v14, %v634_v20  ;;  %1607 = vst.msk [vmem:[%s5133_s30 + $0x10] sm:$0xff] %vm1527_vm1, %v7339_v59  ;;  %1608 = vst.msk [vmem:[%s5133_s30 + $0x18] sm:$0xff] %vm1527_vm1, %v7339_v59  ;;  %v5383_v12 = vmul.f32 %v4949_v10, %v4949_v10  ;;  %v1240_v55 = vadd.f32 %v5112_v51, %v5102_v0  ;;  %v3637_v14 = vld [vmem:[%s3734_s23 + $0x80] sm:$0xff]  ;;  %v3640_v51 = vld [vmem:[%s3734_s23 + $0x98] sm:$0xff]  ;;  %v1495_v20 = vsel %vm598_vm0, %v5058_v36, 0.0 }
  0xb9   : > { %1609 = vst.msk [vmem:[%s5133_s30 + $0x20] sm:$0xff] %vm1527_vm1, %v7339_v59  ;;  %1610 = vst.msk [vmem:[%s5133_s30 + $0x28] sm:$0xff] %vm1527_vm1, %v7339_v59  ;;  %1233 = vadd.xlane.f32.xlu1 %v5099_v39  ;;  %v1236_v17 = vadd.f32 %v5115_v18, %v5105_v48  ;;  %v923_v5 = vmul.f32 %v3637_v14, %v3637_v14  ;;  %v3638_v39 = vld [vmem:[%s3734_s23 + $0x70] sm:$0xff]  ;;  %v928_v0 = vmul.f32 %v3639_v19, %v3639_v19 }
  0xba   : > { %1611 = vst.msk [vmem:[%s5133_s30 + $0x30] sm:$0xff] %vm1527_vm1, %v7339_v59  ;;  %1612 = vst.msk [vmem:[%s5133_s30 + $0x38] sm:$0xff] %vm1527_vm1, %v7339_v59  ;;  %1229 = vadd.xlane.f32.xlu0 %v5109_v9  ;;  %v646_v10 = vpop.xlane.xlu1 %645  ;;  %v921_v63 = vmul.f32 %v3638_v39, %v3638_v39  ;;  %v926_v48 = vmul.f32 %v3640_v51, %v3640_v51  ;;  %v1243_v9 = vsel %vm598_vm0, %v5123_v38, 0.0  ;;  %v1491_v6 = vsel %vm598_vm0, %v5008_v35, 0.0  ;;  %v1694_v35 = vld [vmem:[%s3787_s27 + $0x60] sm:$0xff]  ;;  %v3643_v39 = vld [vmem:[%s3734_s23 + $0xc8] sm:$0xff] }
  0xbb   : > { %1613 = vst.msk [vmem:[%s5133_s30 + $0x40] sm:$0xff] %vm1527_vm1, %v7339_v59  ;;  %1614 = vst.msk [vmem:[%s5133_s30 + $0x48] sm:$0xff] %vm1527_vm1, %v7339_v59  ;;  %v1770_v18 = vadd.f32 %v5142_v41, %v646_v10  ;;  %v5413_v11 = vmul.f32 %v4909_v56, %v4909_v56  ;;  %v5420_v41 = vadd.f32 %v1491_v6, %v4992_v29  ;;  %v3641_v56 = vld [vmem:[%s3734_s23 + $0xa0] sm:$0xff]  ;;  %v1255_v10 = vsel %vm598_vm0, %v928_v0, 0.0 }
  0xbc   : > { %1615 = vst.msk [vmem:[%s5133_s30 + $0x50] sm:$0xff] %vm1527_vm1, %v7339_v59  ;;  %1616 = vst.msk [vmem:[%s5133_s30 + $0x58] sm:$0xff] %vm1527_vm1, %v7339_v59  ;;  %v1056_v36 = vmul.f32 %v4923_v4, %v4923_v4  ;;  %v1248_v38 = vadd.f32 %v1247_v61, %v923_v5  ;;  %v1251_v4 = vsel %vm598_vm0, %v926_v48, 0.0  ;;  %v3644_v61 = vld [vmem:[%s3734_s23 + $0xb8] sm:$0xff]  ;;  %v3645_v6 = vld [vmem:[%s3734_s23 + $0xc0] sm:$0xff] }
  0xbd   : > { %1617 = vst.msk [vmem:[%s5133_s30 + $0x60] sm:$0xff] %vm1527_vm1, %v7339_v59  ;;  %1618 = vst.msk [vmem:[%s5133_s30 + $0x68] sm:$0xff] %vm1527_vm1, %v7339_v59  ;;  %1241 = vadd.xlane.f32.xlu1 %v1240_v55  ;;  %v932_v55 = vmul.f32 %v3643_v39, %v3643_v39  ;;  %v930_v51 = vmul.f32 %v3644_v61, %v3644_v61  ;;  %v1697_v48 = vld [vmem:[%s3787_s27 + $0x78] sm:$0xff]  ;;  %v1698_v61 = vld [vmem:[%s3787_s27 + $0x80] sm:$0xff] }
  0xbe   : > { %1619 = vst.msk [vmem:[%s5133_s30 + $0x70] sm:$0xff] %vm1527_vm1, %v7339_v59  ;;  %1620 = vst.msk [vmem:[%s5133_s30 + $0x78] sm:$0xff] %vm1527_vm1, %v7339_v59  ;;  %1237 = vadd.xlane.f32.xlu0 %v1236_v17  ;;  %v654_v29 = vpop.xlane.xlu1 %653  ;;  %v1499_v17 = vsel %vm598_vm0, %v5030_v21, 0.0  ;;  %v1696_v21 = vld [vmem:[%s3787_s27 + $0x70] sm:$0xff]  ;;  %v1511_v39 = vsel %vm598_vm0, %v1056_v36, 0.0 }
  0xbf   : > { %1621 = vst.msk [vmem:[%s5133_s30 + $0x80] sm:$0xff] %vm1527_vm1, %v7339_v59  ;;  %1622 = vst.msk [vmem:[%s5133_s30 + $0x88] sm:$0xff] %vm1527_vm1, %v7339_v59  ;;  %v1772_v19 = vadd.f32 %v1695_v57, %v654_v29 }
  0xc0   : > { %1623 = vst.msk [vmem:[%s5133_s30 + $0x90] sm:$0xff] %vm1527_vm1, %v7339_v59  ;;  %1624 = vst.msk [vmem:[%s5133_s30 + $0x98] sm:$0xff] %vm1527_vm1, %v7339_v59 }
  0xc1   : > { %1625 = vst.msk [vmem:[%s5133_s30 + $0xa0] sm:$0xff] %vm1527_vm1, %v7339_v59  ;;  %1626 = vst.msk [vmem:[%s5133_s30 + $0xa8] sm:$0xff] %vm1527_vm1, %v7339_v59  ;;  %1249 = vadd.xlane.f32.xlu1 %v1248_v38 }
  0xc2   : > { %1627 = vst.msk [vmem:[%s5133_s30 + $0xb0] sm:$0xff] %vm1527_vm1, %v7339_v59  ;;  %1628 = vst.msk [vmem:[%s5133_s30 + $0xb8] sm:$0xff] %vm1527_vm1, %v7339_v59 }
  0xc3   : > { %1629 = vst.msk [vmem:[%s5133_s30 + $0xc0] sm:$0xff] %vm1527_vm1, %v7339_v59  ;;  %1630 = vst.msk [vmem:[%s5133_s30 + $0xc8] sm:$0xff] %vm1527_vm1, %v7339_v59 }
  0xc4   : > { %1631 = vst.msk [vmem:[%s5133_s30 + $0xd0] sm:$0xff] %vm1527_vm1, %v7339_v59  ;;  %1632 = vst.msk [vmem:[%s5133_s30 + $0xd8] sm:$0xff] %vm1527_vm1, %v7339_v59 }
  0xc5   : > { %1633 = vst.msk [vmem:[%s5133_s30 + $0xe0] sm:$0xff] %vm1527_vm1, %v7339_v59  ;;  %1634 = vst.msk [vmem:[%s5133_s30 + $0xe8] sm:$0xff] %vm1527_vm1, %v7339_v59 }
  0xc6   : > { %1635 = vst.msk [vmem:[%s5133_s30 + $0xf0] sm:$0xff] %vm1527_vm1, %v7339_v59  ;;  %1636 = vst.msk [vmem:[%s5133_s30 + $0xf8] sm:$0xff] %vm1527_vm1, %v7339_v59 }
  0xc7   : > { %1637 = vst.msk [vmem:[%s5133_s30 + $0x100] sm:$0xff] %vm1527_vm1, %v7339_v59  ;;  %1638 = vst.msk [vmem:[%s5133_s30 + $0x108] sm:$0xff] %vm1527_vm1, %v7339_v59 }
  0xc8   : > { %1639 = vst.msk [vmem:[%s5133_s30 + $0x110] sm:$0xff] %vm1527_vm1, %v7339_v59  ;;  %1640 = vst.msk [vmem:[%s5133_s30 + $0x118] sm:$0xff] %vm1527_vm1, %v7339_v59 }
  0xc9   : > { %1641 = vst.msk [vmem:[%s5133_s30 + $0x120] sm:$0xff] %vm1527_vm1, %v7339_v59  ;;  %1642 = vst.msk [vmem:[%s5133_s30 + $0x128] sm:$0xff] %vm1527_vm1, %v7339_v59 }
  0xca   : > { %1643 = vst.msk [vmem:[%s5133_s30 + $0x130] sm:$0xff] %vm1527_vm1, %v7339_v59  ;;  %1644 = vst.msk [vmem:[%s5133_s30 + $0x138] sm:$0xff] %vm1527_vm1, %v7339_v59 }
  0xcb   : > { %1645 = vst.msk [vmem:[%s5133_s30 + $0x140] sm:$0xff] %vm1527_vm1, %v7339_v59  ;;  %1646 = vst.msk [vmem:[%s5133_s30 + $0x148] sm:$0xff] %vm1527_vm1, %v7339_v59 }
  0xcc   : > { %1647 = vst.msk [vmem:[%s5133_s30 + $0x150] sm:$0xff] %vm1527_vm1, %v7339_v59  ;;  %1648 = vst.msk [vmem:[%s5133_s30 + $0x158] sm:$0xff] %vm1527_vm1, %v7339_v59 }
  0xcd   : > { %1649 = vst.msk [vmem:[%s5133_s30 + $0x160] sm:$0xff] %vm1527_vm1, %v7339_v59  ;;  %1650 = vst.msk [vmem:[%s5133_s30 + $0x168] sm:$0xff] %vm1527_vm1, %v7339_v59 }
  0xce   : > { %1651 = vst.msk [vmem:[%s5133_s30 + $0x170] sm:$0xff] %vm1527_vm1, %v7339_v59  ;;  %1652 = vst.msk [vmem:[%s5133_s30 + $0x178] sm:$0xff] %vm1527_vm1, %v7339_v59 }
  0xcf   : > { %1653 = vst.msk [vmem:[%s5133_s30 + $0x180] sm:$0xff] %vm1527_vm1, %v7339_v59  ;;  %1654 = vst.msk [vmem:[%s5133_s30 + $0x188] sm:$0xff] %vm1527_vm1, %v7339_v59 }
  0xd0   : > { %1655 = vst.msk [vmem:[%s5133_s30 + $0x190] sm:$0xff] %vm1527_vm1, %v7339_v59  ;;  %1656 = vst.msk [vmem:[%s5133_s30 + $0x198] sm:$0xff] %vm1527_vm1, %v7339_v59 }
  0xd1   : > { %1657 = vst.msk [vmem:[%s5133_s30 + $0x1a0] sm:$0xff] %vm1527_vm1, %v7339_v59  ;;  %1658 = vst.msk [vmem:[%s5133_s30 + $0x1a8] sm:$0xff] %vm1527_vm1, %v7339_v59 }
  0xd2   : > { %1659 = vst.msk [vmem:[%s5133_s30 + $0x1b0] sm:$0xff] %vm1527_vm1, %v7339_v59  ;;  %1660 = vst.msk [vmem:[%s5133_s30 + $0x1b8] sm:$0xff] %vm1527_vm1, %v7339_v59 }
  0xd3   : > { %1661 = vst.msk [vmem:[%s5133_s30 + $0x1c0] sm:$0xff] %vm1527_vm1, %v7339_v59  ;;  %1662 = vst.msk [vmem:[%s5133_s30 + $0x1c8] sm:$0xff] %vm1527_vm1, %v7339_v59 }
  0xd4   : > { %1663 = vst.msk [vmem:[%s5133_s30 + $0x1d0] sm:$0xff] %vm1527_vm1, %v7339_v59  ;;  %1664 = vst.msk [vmem:[%s5133_s30 + $0x1d8] sm:$0xff] %vm1527_vm1, %v7339_v59 }
  0xd5   : > { %1665 = vst.msk [vmem:[%s5133_s30 + $0x1e0] sm:$0xff] %vm1527_vm1, %v7339_v59  ;;  %1666 = vst.msk [vmem:[%s5133_s30 + $0x1e8] sm:$0xff] %vm1527_vm1, %v7339_v59 }
  0xd6   : > { %1667 = vst.msk [vmem:[%s5133_s30 + $0x1f0] sm:$0xff] %vm1527_vm1, %v7339_v59  ;;  %1668 = vst.msk [vmem:[%s5133_s30 + $0x1f8] sm:$0xff] %vm1527_vm1, %v7339_v59 }
  0xd7   : > { %1669 = vst.msk [vmem:[%s5133_s30 + $0x200] sm:$0xff] %vm1527_vm1, %v7339_v59  ;;  %1670 = vst.msk [vmem:[%s5133_s30 + $0x208] sm:$0xff] %vm1527_vm1, %v7339_v59 }
  0xd8   : > { %1671 = vst.msk [vmem:[%s5133_s30 + $0x210] sm:$0xff] %vm1527_vm1, %v7339_v59  ;;  %1672 = vst.msk [vmem:[%s5133_s30 + $0x218] sm:$0xff] %vm1527_vm1, %v7339_v59 }
  0xd9   : > { %1673 = vst.msk [vmem:[%s5133_s30 + $0x220] sm:$0xff] %vm1527_vm1, %v7339_v59  ;;  %1674 = vst.msk [vmem:[%s5133_s30 + $0x228] sm:$0xff] %vm1527_vm1, %v7339_v59 }
  0xda   : > { %1675 = vst.msk [vmem:[%s5133_s30 + $0x230] sm:$0xff] %vm1527_vm1, %v7339_v59  ;;  %1676 = vst.msk [vmem:[%s5133_s30 + $0x238] sm:$0xff] %vm1527_vm1, %v7339_v59 }
  0xdb   : > { %1677 = vst.msk [vmem:[%s5133_s30 + $0x240] sm:$0xff] %vm1527_vm1, %v7339_v59  ;;  %1678 = vst.msk [vmem:[%s5133_s30 + $0x248] sm:$0xff] %vm1527_vm1, %v7339_v59 }
  0xdc   : > { %1679 = vst.msk [vmem:[%s5133_s30 + $0x250] sm:$0xff] %vm1527_vm1, %v7339_v59  ;;  %1680 = vst.msk [vmem:[%s5133_s30 + $0x258] sm:$0xff] %vm1527_vm1, %v7339_v59 }
  0xdd   : > { %1681 = vst.msk [vmem:[%s5133_s30 + $0x260] sm:$0xff] %vm1527_vm1, %v7339_v59  ;;  %1846 = vst.msk [vmem:[%s3787_s27 + $0x48] sm:$0xff] %vm1527_vm1, %v5120_v37  ;;  %v642_v37 = vpop.xlane.xlu0 %641  ;;  %v927_v59 = vmul.f32 %v3641_v56, %v3641_v56 }
  0xde   : > { %1845 = vst.msk [vmem:[%s3787_s27 + $0x40] sm:$0xff] %vm1527_vm1, %v5139_v13  ;;  %v1769_v7 = vadd.f32 %v1692_v23, %v642_v37  ;;  %v5417_v13 = vadd.f32 %v1495_v20, %v5047_v47  ;;  %1848 = vst.msk [vmem:[%s3787_s27 + $0x58] sm:$0xff] %vm1527_vm1, %v1770_v18  ;;  %v3642_v23 = vld [vmem:[%s3734_s23 + $0x90] sm:$0xff]  ;;  %v1244_v47 = vadd.f32 %v1243_v9, %v921_v63  ;;  %v1503_v18 = vsel %vm598_vm0, %v5137_v44, 0.0 }
  0xdf   : > { %v925_v14 = vmul.f32 %v3642_v23, %v3642_v23  ;;  %v1055_v63 = vmul.f32 %v4954_v54, %v4954_v54  ;;  %v5443_v37 = vadd.f32 %v1503_v18, %v5093_v53  ;;  %v5446_v9 = vadd.f32 %v1499_v17, %v5026_v8  ;;  %1850 = vst.msk [vmem:[%s3787_s27 + $0x68] sm:$0xff] %vm1527_vm1, %v1772_v19  ;;  %v662_v53 = vpop.xlane.xlu1 %661  ;;  %v3648_v23 = vld [vmem:[%s3734_s23 + $0xd8] sm:$0xff] }
  0xe0   : > { %1847 = vst.msk [vmem:[%s3787_s27 + $0x50] sm:$0xff] %vm1527_vm1, %v1769_v7  ;;  %v1060_v20 = vmul.f32 %v4959_v30, %v4959_v30  ;;  %v1256_v44 = vadd.f32 %v1255_v10, %v927_v59  ;;  %v931_v54 = vmul.f32 %v3645_v6, %v3645_v6  ;;  %v3646_v7 = vld [vmem:[%s3734_s23 + $0xb0] sm:$0xff]  ;;  %1245 = vadd.xlane.f32.xlu0 %v1244_v47  ;;  %v3647_v30 = vld [vmem:[%s3734_s23 + $0xe8] sm:$0xff]  ;;  %v1259_v10 = vsel %vm598_vm0, %v930_v51, 0.0  ;;  %v3649_v51 = vld [vmem:[%s3734_s23 + $0xe0] sm:$0xff] }
  0xe1   : > { %v650_v5 = vpop.xlane.xlu0 %649  ;;  %v929_v57 = vmul.f32 %v3646_v7, %v3646_v7  ;;  %v1252_v8 = vadd.f32 %v1251_v4, %v925_v14  ;;  %v936_v56 = vmul.f32 %v3647_v30, %v3647_v30  ;;  %v934_v38 = vmul.f32 %v3648_v23, %v3648_v23  ;;  %v1700_v23 = vld [vmem:[%s3787_s27 + $0x90] sm:$0xff] }
  0xe2   : > { %v1771_v0 = vadd.f32 %v1694_v35, %v650_v5  ;;  %v1263_v35 = vsel %vm598_vm0, %v932_v55, 0.0  ;;  %v1774_v59 = vadd.f32 %v1697_v48, %v662_v53  ;;  %v1507_v14 = vsel %vm598_vm0, %v5082_v45, 0.0  ;;  %v1699_v55 = vld [vmem:[%s3787_s27 + $0x88] sm:$0xff]  ;;  %1257 = vadd.xlane.f32.xlu1 %v1256_v44  ;;  %v3650_v45 = vld [vmem:[%s3734_s23 + $0xd0] sm:$0xff] }
  0xe3   : > { %v1059_v47 = vmul.f32 %v5000_v34, %v5000_v34  ;;  %v5467_v19 = vadd.f32 %v1511_v39, %v1055_v63  ;;  %v5470_v5 = vadd.f32 %v1507_v14, %v5062_v52  ;;  %v1264_v36 = vadd.f32 %v1263_v35, %v931_v54  ;;  %v670_v34 = vpop.xlane.xlu1 %669  ;;  %v1701_v35 = vld [vmem:[%s3787_s27 + $0x98] sm:$0xff]  ;;  %v3655_v14 = vld [vmem:[%s3734_s23 + $0x128] sm:$0xff] }
  0xe4   : > { %1849 = vst.msk [vmem:[%s3787_s27 + $0x60] sm:$0xff] %vm1527_vm1, %v1771_v0  ;;  %1852 = vst.msk [vmem:[%s3787_s27 + $0x78] sm:$0xff] %vm1527_vm1, %v1774_v59  ;;  %v935_v18 = vmul.f32 %v3649_v51, %v3649_v51  ;;  %v933_v17 = vmul.f32 %v3650_v45, %v3650_v45  ;;  %1253 = vadd.xlane.f32.xlu0 %v1252_v8  ;;  %v1260_v63 = vadd.f32 %v1259_v10, %v929_v57  ;;  %v3651_v0 = vld [vmem:[%s3734_s23 + $0x108] sm:$0xff]  ;;  %v3653_v59 = vld [vmem:[%s3734_s23 + $0x100] sm:$0xff] }
  0xe5   : > { %v658_v29 = vpop.xlane.xlu0 %657  ;;  %v1271_v52 = vsel %vm598_vm0, %v936_v56, 0.0  ;;  %v940_v48 = vmul.f32 %v3651_v0, %v3651_v0  ;;  %v1776_v6 = vadd.f32 %v1699_v55, %v670_v34  ;;  %v1267_v7 = vsel %vm598_vm0, %v934_v38, 0.0  ;;  %v1703_v45 = vld [vmem:[%s3787_s27 + $0xa8] sm:$0xff] }
  0xe6   : > { %v1773_v4 = vadd.f32 %v1696_v21, %v658_v29  ;;  %v3652_v21 = vld [vmem:[%s3734_s23 + $0xf8] sm:$0xff]  ;;  %v1519_v53 = vsel %vm598_vm0, %v1060_v20, 0.0  ;;  %v1515_v8 = vsel %vm598_vm0, %v5413_v11, 0.0  ;;  %1265 = vadd.xlane.f32.xlu1 %v1264_v36  ;;  %v1272_v38 = vadd.f32 %v1271_v52, %v935_v18 }
  0xe7   : > { %v938_v44 = vmul.f32 %v3652_v21, %v3652_v21  ;;  %v5487_v30 = vadd.f32 %v1519_v53, %v1059_v47  ;;  %v5490_v56 = vadd.f32 %v1515_v8, %v5383_v12  ;;  %1854 = vst.msk [vmem:[%s3787_s27 + $0x88] sm:$0xff] %vm1527_vm1, %v1776_v6  ;;  %v939_v20 = vmul.f32 %v3653_v59, %v3653_v59  ;;  %v678_v11 = vpop.xlane.xlu1 %677  ;;  %v3654_v12 = vld [vmem:[%s3734_s23 + $0xf0] sm:$0xff]  ;;  %v3656_v36 = vld [vmem:[%s3734_s23 + $0x118] sm:$0xff] }
  0xe8   : > { %1851 = vst.msk [vmem:[%s3787_s27 + $0x70] sm:$0xff] %vm1527_vm1, %v1773_v4  ;;  %1261 = vadd.xlane.f32.xlu0 %v1260_v63  ;;  %v1268_v29 = vadd.f32 %v1267_v7, %v933_v17  ;;  %v1279_v10 = vsel %vm598_vm0, %v940_v48, 0.0  ;;  %v937_v39 = vmul.f32 %v3654_v12, %v3654_v12  ;;  %v944_v47 = vmul.f32 %v3655_v14, %v3655_v14  ;;  %v1702_v17 = vld [vmem:[%s3787_s27 + $0xa0] sm:$0xff]  ;;  %v1705_v59 = vld [vmem:[%s3787_s27 + $0xb8] sm:$0xff] }
  0xe9   : > { %v666_v54 = vpop.xlane.xlu0 %665  ;;  %v1778_v4 = vadd.f32 %v1701_v35, %v678_v11  ;;  %v942_v51 = vmul.f32 %v3656_v36, %v3656_v36  ;;  %v1280_v34 = vadd.f32 %v1279_v10, %v939_v20  ;;  %v3657_v63 = vld [vmem:[%s3734_s23 + $0x120] sm:$0xff]  ;;  %v3660_v35 = vld [vmem:[%s3734_s23 + $0x138] sm:$0xff]  ;;  %v1704_v20 = vld [vmem:[%s3787_s27 + $0xb0] sm:$0xff] }
  0xea   : > { %v1775_v57 = vadd.f32 %v1698_v61, %v666_v54  ;;  %v1275_v61 = vsel %vm598_vm0, %v938_v44, 0.0  ;;  %1273 = vadd.xlane.f32.xlu1 %v1272_v38  ;;  %v943_v52 = vmul.f32 %v3657_v63, %v3657_v63  ;;  %v1287_v21 = vsel %vm598_vm0, %v944_v47, 0.0  ;;  %v3658_v44 = vld [vmem:[%s3734_s23 + $0x110] sm:$0xff]  ;;  %v3659_v54 = vld [vmem:[%s3734_s23 + $0x148] sm:$0xff] }
  0xeb   : > { %1856 = vst.msk [vmem:[%s3787_s27 + $0x98] sm:$0xff] %vm1527_vm1, %v1778_v4  ;;  %v686_v0 = vpop.xlane.xlu1 %685  ;;  %v1276_v48 = vadd.f32 %v1275_v61, %v937_v39  ;;  %v941_v6 = vmul.f32 %v3658_v44, %v3658_v44  ;;  %v948_v7 = vmul.f32 %v3659_v54, %v3659_v54  ;;  %v3662_v47 = vld [vmem:[%s3734_s23 + $0x130] sm:$0xff] }
  0xec   : > { %1853 = vst.msk [vmem:[%s3787_s27 + $0x80] sm:$0xff] %vm1527_vm1, %v1775_v57  ;;  %1269 = vadd.xlane.f32.xlu0 %v1268_v29  ;;  %v1780_v53 = vadd.f32 %v1703_v45, %v686_v0  ;;  %v1283_v57 = vsel %vm598_vm0, %v942_v51, 0.0  ;;  %v1288_v11 = vadd.f32 %v1287_v21, %v943_v52  ;;  %v3661_v29 = vld [vmem:[%s3734_s23 + $0x140] sm:$0xff]  ;;  %v945_v4 = vmul.f32 %v3662_v47, %v3662_v47  ;;  %v1709_v21 = vld [vmem:[%s3787_s27 + $0xd8] sm:$0xff]  ;;  %v1708_v44 = vld [vmem:[%s3787_s27 + $0xd0] sm:$0xff] }
  0xed   : > { %v674_v55 = vpop.xlane.xlu0 %673  ;;  %v947_v10 = vmul.f32 %v3661_v29, %v3661_v29  ;;  %v1284_v39 = vadd.f32 %v1283_v57, %v941_v6  ;;  %v1295_v14 = vsel %vm598_vm0, %v948_v7, 0.0  ;;  %v1706_v45 = vld [vmem:[%s3787_s27 + $0xc0] sm:$0xff] }
  0xee   : > { %v1777_v18 = vadd.f32 %v1700_v23, %v674_v55  ;;  %v946_v23 = vmul.f32 %v3660_v35, %v3660_v35  ;;  %1858 = vst.msk [vmem:[%s3787_s27 + $0xa8] sm:$0xff] %vm1527_vm1, %v1780_v53  ;;  %1281 = vadd.xlane.f32.xlu1 %v1280_v34  ;;  %v1710_v57 = vld [vmem:[%s3787_s27 + $0xe0] sm:$0xff] }
  0xef   : > { %v694_v12 = vpop.xlane.xlu1 %693 }
  0xf0   : > { %1855 = vst.msk [vmem:[%s3787_s27 + $0x90] sm:$0xff] %vm1527_vm1, %v1777_v18  ;;  %1277 = vadd.xlane.f32.xlu0 %v1276_v48  ;;  %v1782_v55 = vadd.f32 %v1705_v59, %v694_v12  ;;  %v1291_v36 = vsel %vm598_vm0, %v946_v23, 0.0  ;;  %v1707_v18 = vld [vmem:[%s3787_s27 + $0xc8] sm:$0xff] }
  0xf1   : > { %v682_v8 = vpop.xlane.xlu0 %681  ;;  %v1292_v63 = vadd.f32 %v1291_v36, %v945_v4  ;;  %v1715_v12 = vld [vmem:[%s3787_s27 + $0x108] sm:$0xff]  ;;  %v1717_v4 = vld [vmem:[%s3787_s27 + $0x118] sm:$0xff] }
  0xf2   : > { %v1779_v38 = vadd.f32 %v1702_v17, %v682_v8  ;;  %1860 = vst.msk [vmem:[%s3787_s27 + $0xb8] sm:$0xff] %vm1527_vm1, %v1782_v55  ;;  %1289 = vadd.xlane.f32.xlu1 %v1288_v11  ;;  %v1296_v17 = vadd.f32 %v1295_v14, %v947_v10  ;;  %v1711_v8 = vld [vmem:[%s3787_s27 + $0xe8] sm:$0xff]  ;;  %v1712_v11 = vld [vmem:[%s3787_s27 + $0xf0] sm:$0xff] }
  0xf3   : > { %v702_v34 = vpop.xlane.xlu1 %701  ;;  %v1716_v55 = vld [vmem:[%s3787_s27 + $0x110] sm:$0xff] }
  0xf4   : > { %1857 = vst.msk [vmem:[%s3787_s27 + $0xa0] sm:$0xff] %vm1527_vm1, %v1779_v38  ;;  %1285 = vadd.xlane.f32.xlu0 %v1284_v39  ;;  %v1784_v52 = vadd.f32 %v1707_v18, %v702_v34  ;;  %v1714_v39 = vld [vmem:[%s3787_s27 + $0x100] sm:$0xff]  ;;  %v1721_v34 = vld [vmem:[%s3787_s27 + $0x138] sm:$0xff] }
  0xf5   : > { %v690_v61 = vpop.xlane.xlu0 %689  ;;  %v1718_v18 = vld [vmem:[%s3787_s27 + $0x120] sm:$0xff] }
  0xf6   : > { %v1781_v51 = vadd.f32 %v1704_v20, %v690_v61  ;;  %1862 = vst.msk [vmem:[%s3787_s27 + $0xc8] sm:$0xff] %vm1527_vm1, %v1784_v52  ;;  %1297 = vadd.xlane.f32.xlu1 %v1296_v17  ;;  %v1713_v20 = vld [vmem:[%s3787_s27 + $0xf8] sm:$0xff] }
  0xf7   : > { %v710_v6 = vpop.xlane.xlu1 %709 }
  0xf8   : > { %1859 = vst.msk [vmem:[%s3787_s27 + $0xb0] sm:$0xff] %vm1527_vm1, %v1781_v51  ;;  %1293 = vadd.xlane.f32.xlu0 %v1292_v63  ;;  %v1786_v54 = vadd.f32 %v1709_v21, %v710_v6  ;;  %v1719_v51 = vld [vmem:[%s3787_s27 + $0x128] sm:$0xff]  ;;  %v1720_v63 = vld [vmem:[%s3787_s27 + $0x130] sm:$0xff]  ;;  %v1722_v21 = vld [vmem:[%s3787_s27 + $0x140] sm:$0xff] }
  0xf9   : > { %v698_v0 = vpop.xlane.xlu0 %697 }
  0xfa   : > { %v1783_v48 = vadd.f32 %v1706_v45, %v698_v0  ;;  %1864 = vst.msk [vmem:[%s3787_s27 + $0xd8] sm:$0xff] %vm1527_vm1, %v1786_v54  ;;  %1305 = vadd.xlane.f32.xlu1 %v4466_v43  ;;  %v1725_v54 = vld [vmem:[%s3787_s27 + $0x158] sm:$0xff] }
  0xfb   : > { %v718_v35 = vpop.xlane.xlu1 %717 }
  0xfc   : > { %1861 = vst.msk [vmem:[%s3787_s27 + $0xc0] sm:$0xff] %vm1527_vm1, %v1783_v48  ;;  %1301 = vadd.xlane.f32.xlu0 %v4472_v22  ;;  %v1788_v23 = vadd.f32 %v1711_v8, %v718_v35  ;;  %v1723_v48 = vld [vmem:[%s3787_s27 + $0x148] sm:$0xff] }
  0xfd   : > { %v706_v7 = vpop.xlane.xlu0 %705 }
  0xfe   : > { %v1785_v53 = vadd.f32 %v1708_v44, %v706_v7  ;;  %1866 = vst.msk [vmem:[%s3787_s27 + $0xe8] sm:$0xff] %vm1527_vm1, %v1788_v23  ;;  %1313 = vadd.xlane.f32.xlu1 %v4482_v16  ;;  %v7340_v7 = vld [vmem:[#allocation13_spill] sm:$0xff]  ;;  %v1727_v23 = vld [vmem:[%s3787_s27 + $0x168] sm:$0xff] }
  0xff   : > { %v726_v43 = vpop.xlane.xlu1 %725 }
 0x100   : > { %1863 = vst.msk [vmem:[%s3787_s27 + $0xd0] sm:$0xff] %vm1527_vm1, %v1785_v53  ;;  %1309 = vadd.xlane.f32.xlu0 %v4485_v62  ;;  %v1790_v22 = vadd.f32 %v1713_v20, %v726_v43  ;;  %v1724_v53 = vld [vmem:[%s3787_s27 + $0x150] sm:$0xff] }
 0x101   : > { %v714_v38 = vpop.xlane.xlu0 %713  ;;  %v7343_v20 = vld [vmem:[#allocation16_spill] sm:$0xff] }
 0x102   : > { %v1787_v59 = vadd.f32 %v1710_v57, %v714_v38  ;;  %1868 = vst.msk [vmem:[%s3787_s27 + $0xf8] sm:$0xff] %vm1527_vm1, %v1790_v22  ;;  %1321 = vadd.xlane.f32.xlu1 %v4488_v49  ;;  %v7342_v38 = vld [vmem:[#allocation15_spill] sm:$0xff] }
 0x103   : > { %v734_v16 = vpop.xlane.xlu1 %733 }
 0x104   : > { %1865 = vst.msk [vmem:[%s3787_s27 + $0xe0] sm:$0xff] %vm1527_vm1, %v1787_v59  ;;  %1317 = vadd.xlane.f32.xlu0 %v4493_v28  ;;  %v1792_v62 = vadd.f32 %v1715_v12, %v734_v16  ;;  %v1726_v59 = vld [vmem:[%s3787_s27 + $0x160] sm:$0xff]  ;;  %v7344_v12 = vld [vmem:[#allocation17_spill] sm:$0xff] }
 0x105   : > { %v722_v29 = vpop.xlane.xlu0 %721  ;;  %v7345_v16 = vld [vmem:[#allocation18_spill] sm:$0xff] }
 0x106   : > { %v1789_v10 = vadd.f32 %v1712_v11, %v722_v29  ;;  %1870 = vst.msk [vmem:[%s3787_s27 + $0x108] sm:$0xff] %vm1527_vm1, %v1792_v62  ;;  %1329 = vadd.xlane.f32.xlu1 %v4503_v24 }
 0x107   : > { %v742_v49 = vpop.xlane.xlu1 %741 }
 0x108   : > { %1867 = vst.msk [vmem:[%s3787_s27 + $0xf0] sm:$0xff] %vm1527_vm1, %v1789_v10  ;;  %1325 = vadd.xlane.f32.xlu0 %v4506_v42  ;;  %v1794_v28 = vadd.f32 %v1717_v4, %v742_v49  ;;  %v1729_v10 = vld [vmem:[%s3787_s27 + $0x178] sm:$0xff]  ;;  %v7346_v49 = vld [vmem:[#allocation4_spill] sm:$0xff] }
 0x109   : > { %v730_v14 = vpop.xlane.xlu0 %729 }
 0x10a   : > { %v1791_v47 = vadd.f32 %v1714_v39, %v730_v14  ;;  %1872 = vst.msk [vmem:[%s3787_s27 + $0x118] sm:$0xff] %vm1527_vm1, %v1794_v28  ;;  %1337 = vadd.xlane.f32.xlu1 %v4509_v27  ;;  %v1728_v39 = vld [vmem:[%s3787_s27 + $0x170] sm:$0xff]  ;;  %v1730_v28 = vld [vmem:[%s3787_s27 + $0x180] sm:$0xff] }
 0x10b   : > { %v750_v24 = vpop.xlane.xlu1 %749 }
 0x10c   : > { %1869 = vst.msk [vmem:[%s3787_s27 + $0x100] sm:$0xff] %vm1527_vm1, %v1791_v47  ;;  %1333 = vadd.xlane.f32.xlu0 %v4514_v40  ;;  %v1796_v42 = vadd.f32 %v1719_v51, %v750_v24 }
 0x10d   : > { %v738_v61 = vpop.xlane.xlu0 %737 }
 0x10e   : > { %v1793_v36 = vadd.f32 %v1716_v55, %v738_v61  ;;  %1874 = vst.msk [vmem:[%s3787_s27 + $0x128] sm:$0xff] %vm1527_vm1, %v1796_v42  ;;  %1345 = vadd.xlane.f32.xlu1 %v4524_v58  ;;  %v1731_v55 = vld [vmem:[%s3787_s27 + $0x188] sm:$0xff]  ;;  %v1733_v42 = vld [vmem:[%s3787_s27 + $0x198] sm:$0xff] }
 0x10f   : > { %v758_v27 = vpop.xlane.xlu1 %757  ;;  %v7347_v61 = vld [vmem:[#allocation7_spill] sm:$0xff] }
 0x110   : > { %1871 = vst.msk [vmem:[%s3787_s27 + $0x110] sm:$0xff] %vm1527_vm1, %v1793_v36  ;;  %1341 = vadd.xlane.f32.xlu0 %v4527_v50  ;;  %v1798_v40 = vadd.f32 %v1721_v34, %v758_v27  ;;  %v7349_v34 = vld [vmem:[#allocation6_spill] sm:$0xff] }
 0x111   : > { %v746_v45 = vpop.xlane.xlu0 %745 }
 0x112   : > { %v1795_v17 = vadd.f32 %v1718_v18, %v746_v45  ;;  %1876 = vst.msk [vmem:[%s3787_s27 + $0x138] sm:$0xff] %vm1527_vm1, %v1798_v40  ;;  %1353 = vadd.xlane.f32.xlu1 %v4529_v32  ;;  %v7341_v32 = vld [vmem:[#allocation14_spill] sm:$0xff]  ;;  %v7348_v45 = vld [vmem:[#allocation5_spill] sm:$0xff] }
 0x113   : > { %v766_v58 = vpop.xlane.xlu1 %765 }
 0x114   : > { %1873 = vst.msk [vmem:[%s3787_s27 + $0x120] sm:$0xff] %vm1527_vm1, %v1795_v17  ;;  %1349 = vadd.xlane.f32.xlu0 %v4542_v25  ;;  %v1800_v50 = vadd.f32 %v1723_v48, %v766_v58  ;;  %v1732_v17 = vld [vmem:[%s3787_s27 + $0x190] sm:$0xff]  ;;  %v7350_v48 = vld [vmem:[#allocation10_spill] sm:$0xff] }
 0x115   : > { %v754_v52 = vpop.xlane.xlu0 %753  ;;  %v7351_v58 = vld [vmem:[#allocation8_spill] sm:$0xff] }
 0x116   : > { %v1797_v0 = vadd.f32 %v1720_v63, %v754_v52  ;;  %1878 = vst.msk [vmem:[%s3787_s27 + $0x148] sm:$0xff] %vm1527_vm1, %v1800_v50  ;;  %1361 = vadd.xlane.f32.xlu1 %v7340_v7  ;;  %v1737_v7 = vld [vmem:[%s3787_s27 + $0x1b8] sm:$0xff] }
 0x117   : > { %v774_v25 = vpop.xlane.xlu1 %773 }
 0x118   : > { %1875 = vst.msk [vmem:[%s3787_s27 + $0x130] sm:$0xff] %vm1527_vm1, %v1797_v0  ;;  %1357 = vadd.xlane.f32.xlu0 %v7341_v32  ;;  %v1802_v8 = vadd.f32 %v1725_v54, %v774_v25  ;;  %v1735_v0 = vld [vmem:[%s3787_s27 + $0x1a8] sm:$0xff]  ;;  %v1736_v32 = vld [vmem:[%s3787_s27 + $0x1b0] sm:$0xff] }
 0x119   : > { %v762_v44 = vpop.xlane.xlu0 %761  ;;  %v7353_v25 = vld [vmem:[#allocation12_spill] sm:$0xff] }
 0x11a   : > { %v1799_v6 = vadd.f32 %v1722_v21, %v762_v44  ;;  %1880 = vst.msk [vmem:[%s3787_s27 + $0x158] sm:$0xff] %vm1527_vm1, %v1802_v8  ;;  %1369 = vadd.xlane.f32.xlu1 %v7342_v38  ;;  %v1734_v21 = vld [vmem:[%s3787_s27 + $0x1a0] sm:$0xff]  ;;  %v1739_v38 = vld [vmem:[%s3787_s27 + $0x1c8] sm:$0xff] }
 0x11b   : > { %v782_v11 = vpop.xlane.xlu1 %781 }
 0x11c   : > { %1877 = vst.msk [vmem:[%s3787_s27 + $0x140] sm:$0xff] %vm1527_vm1, %v1799_v6  ;;  %1365 = vadd.xlane.f32.xlu0 %v7343_v20  ;;  %v1804_v43 = vadd.f32 %v1727_v23, %v782_v11  ;;  %v1738_v20 = vld [vmem:[%s3787_s27 + $0x1c0] sm:$0xff]  ;;  %v7355_v11 = vld [vmem:[#allocation19_spill] sm:$0xff] }
 0x11d   : > { %v770_v57 = vpop.xlane.xlu0 %769 }
 0x11e   : > { %v1801_v35 = vadd.f32 %v1724_v53, %v770_v57  ;;  %1882 = vst.msk [vmem:[%s3787_s27 + $0x168] sm:$0xff] %vm1527_vm1, %v1804_v43  ;;  %1377 = vadd.xlane.f32.xlu1 %v7344_v12  ;;  %v7352_v53 = vld [vmem:[#allocation9_spill] sm:$0xff] }
 0x11f   : > { %v790_v62 = vpop.xlane.xlu1 %789  ;;  %v1741_v12 = vld [vmem:[%s3787_s27 + $0x1d8] sm:$0xff] }
 0x120   : > { %1879 = vst.msk [vmem:[%s3787_s27 + $0x150] sm:$0xff] %vm1527_vm1, %v1801_v35  ;;  %1373 = vadd.xlane.f32.xlu0 %v7345_v16  ;;  %v1806_v14 = vadd.f32 %v1729_v10, %v790_v62  ;;  %v1740_v16 = vld [vmem:[%s3787_s27 + $0x1d0] sm:$0xff]  ;;  %v7357_v62 = vld [vmem:[#allocation21_spill] sm:$0xff] }
 0x121   : > { %v778_v22 = vpop.xlane.xlu0 %777 }
 0x122   : > { %v1803_v29 = vadd.f32 %v1726_v59, %v778_v22  ;;  %1884 = vst.msk [vmem:[%s3787_s27 + $0x178] sm:$0xff] %vm1527_vm1, %v1806_v14  ;;  %1385 = vadd.xlane.f32.xlu1 %v7346_v49  ;;  %v7354_v59 = vld [vmem:[#allocation11_spill] sm:$0xff] }
 0x123   : > { %v798_v36 = vpop.xlane.xlu1 %797  ;;  %v1743_v49 = vld [vmem:[%s3787_s27 + $0x1e8] sm:$0xff] }
 0x124   : > { %1881 = vst.msk [vmem:[%s3787_s27 + $0x160] sm:$0xff] %vm1527_vm1, %v1803_v29  ;;  %1381 = vadd.xlane.f32.xlu0 %v7347_v61  ;;  %v1808_v51 = vadd.f32 %v1731_v55, %v798_v36  ;;  %v1742_v61 = vld [vmem:[%s3787_s27 + $0x1e0] sm:$0xff]  ;;  %v7359_v36 = vld [vmem:[#allocation23_spill] sm:$0xff] }
 0x125   : > { %v786_v47 = vpop.xlane.xlu0 %785 }
 0x126   : > { %v1805_v4 = vadd.f32 %v1728_v39, %v786_v47  ;;  %1886 = vst.msk [vmem:[%s3787_s27 + $0x188] sm:$0xff] %vm1527_vm1, %v1808_v51  ;;  %1393 = vadd.xlane.f32.xlu1 %v7348_v45  ;;  %v7356_v39 = vld [vmem:[#allocation20_spill] sm:$0xff]  ;;  %v1745_v45 = vld [vmem:[%s3787_s27 + $0x1f8] sm:$0xff] }
 0x127   : > { %v806_v63 = vpop.xlane.xlu1 %805 }
 0x128   : > { %1883 = vst.msk [vmem:[%s3787_s27 + $0x170] sm:$0xff] %vm1527_vm1, %v1805_v4  ;;  %1389 = vadd.xlane.f32.xlu0 %v7349_v34  ;;  %v1810_v27 = vadd.f32 %v1733_v42, %v806_v63  ;;  %v1744_v34 = vld [vmem:[%s3787_s27 + $0x1f0] sm:$0xff]  ;;  %v7361_v63 = vld [vmem:[#allocation25_spill] sm:$0xff] }
 0x129   : > { %v794_v18 = vpop.xlane.xlu0 %793 }
 0x12a   : > { %v1807_v24 = vadd.f32 %v1730_v28, %v794_v18  ;;  %1888 = vst.msk [vmem:[%s3787_s27 + $0x198] sm:$0xff] %vm1527_vm1, %v1810_v27  ;;  %1401 = vadd.xlane.f32.xlu1 %v7350_v48  ;;  %v7358_v28 = vld [vmem:[#allocation22_spill] sm:$0xff]  ;;  %v1747_v48 = vld [vmem:[%s3787_s27 + $0x208] sm:$0xff] }
 0x12b   : > { %v814_v50 = vpop.xlane.xlu1 %813 }
 0x12c   : > { %1885 = vst.msk [vmem:[%s3787_s27 + $0x180] sm:$0xff] %vm1527_vm1, %v1807_v24  ;;  %1397 = vadd.xlane.f32.xlu0 %v7351_v58  ;;  %v1812_v44 = vadd.f32 %v1735_v0, %v814_v50  ;;  %v1746_v58 = vld [vmem:[%s3787_s27 + $0x200] sm:$0xff]  ;;  %v7363_v50 = vld [vmem:[#allocation27_spill] sm:$0xff] }
 0x12d   : > { %v802_v40 = vpop.xlane.xlu0 %801 }
 0x12e   : > { %v1809_v52 = vadd.f32 %v1732_v17, %v802_v40  ;;  %1890 = vst.msk [vmem:[%s3787_s27 + $0x1a8] sm:$0xff] %vm1527_vm1, %v1812_v44  ;;  %1409 = vadd.xlane.f32.xlu1 %v7352_v53  ;;  %v7360_v17 = vld [vmem:[#allocation24_spill] sm:$0xff]  ;;  %v1749_v53 = vld [vmem:[%s3787_s27 + $0x218] sm:$0xff] }
 0x12f   : > { %v822_v8 = vpop.xlane.xlu1 %821 }
 0x130   : > { %1887 = vst.msk [vmem:[%s3787_s27 + $0x190] sm:$0xff] %vm1527_vm1, %v1809_v52  ;;  %1405 = vadd.xlane.f32.xlu0 %v7353_v25  ;;  %v1814_v57 = vadd.f32 %v1737_v7, %v822_v8 }
 0x131   : > { %v810_v6 = vpop.xlane.xlu0 %809 }
 0x132   : > { %v1811_v54 = vadd.f32 %v1734_v21, %v810_v6  ;;  %1892 = vst.msk [vmem:[%s3787_s27 + $0x1b8] sm:$0xff] %vm1527_vm1, %v1814_v57  ;;  %1417 = vadd.xlane.f32.xlu1 %v7354_v59  ;;  %v7362_v21 = vld [vmem:[#allocation26_spill] sm:$0xff]  ;;  %v1751_v59 = vld [vmem:[%s3787_s27 + $0x228] sm:$0xff] }
 0x133   : > { %v830_v43 = vpop.xlane.xlu1 %829 }
 0x134   : > { %1889 = vst.msk [vmem:[%s3787_s27 + $0x1a0] sm:$0xff] %vm1527_vm1, %v1811_v54  ;;  %1413 = vadd.xlane.f32.xlu0 %v7355_v11  ;;  %v1816_v22 = vadd.f32 %v1739_v38, %v830_v43  ;;  %v2149_v11 = vld [vmem:[%s3787_s27 + $0x8] sm:$0xff] }
 0x135   : > { %v818_v35 = vpop.xlane.xlu0 %817 }
 0x136   : > { %v1813_v23 = vadd.f32 %v1736_v32, %v818_v35  ;;  %1894 = vst.msk [vmem:[%s3787_s27 + $0x1c8] sm:$0xff] %vm1527_vm1, %v1816_v22  ;;  %1425 = vadd.xlane.f32.xlu1 %v7356_v39  ;;  %v1748_v32 = vld [vmem:[%s3787_s27 + $0x210] sm:$0xff]  ;;  %v2148_v35 = vld [vmem:[%s3787_s27] sm:$0xff] }
 0x137   : > { %v838_v14 = vpop.xlane.xlu1 %837  ;;  %v5710_v22 = vmul.f32 0.0051020407, %v2148_v35 }
 0x138   : > { %1891 = vst.msk [vmem:[%s3787_s27 + $0x1b0] sm:$0xff] %vm1527_vm1, %v1813_v23  ;;  %1421 = vadd.xlane.f32.xlu0 %v7357_v62  ;;  %v1818_v47 = vadd.f32 %v1741_v12, %v838_v14  ;;  %v2150_v23 = vld [vmem:[%s3787_s27 + $0x10] sm:$0xff]  ;;  %v2155_v12 = vld [vmem:[%s3787_s27 + $0x38] sm:$0xff] }
 0x139   : > { %v826_v29 = vpop.xlane.xlu0 %825  ;;  %v2154_v14 = vld [vmem:[%s3787_s27 + $0x30] sm:$0xff] }
 0x13a   : > { %v1815_v10 = vadd.f32 %v1738_v20, %v826_v29  ;;  %1896 = vst.msk [vmem:[%s3787_s27 + $0x1d8] sm:$0xff] %vm1527_vm1, %v1818_v47  ;;  %1433 = vadd.xlane.f32.xlu1 %v7358_v28  ;;  %v2151_v20 = vld [vmem:[%s3787_s27 + $0x18] sm:$0xff]  ;;  %v5712_v29 = vmul.f32 0.0051020407, %v2150_v23  ;;  %v2157_v47 = vld [vmem:[%s3787_s27 + $0x48] sm:$0xff] }
 0x13b   : > { %v846_v51 = vpop.xlane.xlu1 %845  ;;  %v5717_v62 = vmul.f32 0.0051020407, %v2151_v20  ;;  %v2159_v28 = vld [vmem:[%s3787_s27 + $0x58] sm:$0xff] }
 0x13c   : > { %1893 = vst.msk [vmem:[%s3787_s27 + $0x1c0] sm:$0xff] %vm1527_vm1, %v1815_v10  ;;  %1429 = vadd.xlane.f32.xlu0 %v7359_v36  ;;  %v1820_v18 = vadd.f32 %v1743_v49, %v846_v51  ;;  %v2152_v10 = vld [vmem:[%s3787_s27 + $0x20] sm:$0xff]  ;;  %v5733_v51 = vmul.f32 0.0051020407, %v2155_v12 }
 0x13d   : > { %v834_v4 = vpop.xlane.xlu0 %833  ;;  %v2156_v49 = vld [vmem:[%s3787_s27 + $0x40] sm:$0xff]  ;;  %v5731_v36 = vmul.f32 0.0051020407, %v2152_v10  ;;  %v2169_v10 = vld [vmem:[%s3787_s27 + $0xa8] sm:$0xff] }
 0x13e   : > { %v1817_v55 = vadd.f32 %v1740_v16, %v834_v4  ;;  %1898 = vst.msk [vmem:[%s3787_s27 + $0x1e8] sm:$0xff] %vm1527_vm1, %v1820_v18  ;;  %1441 = vadd.xlane.f32.xlu1 %v7360_v17  ;;  %v1753_v16 = vld [vmem:[%s3787_s27 + $0x238] sm:$0xff]  ;;  %v5721_v4 = vmul.f32 0.0051020407, %v2149_v11  ;;  %v2158_v18 = vld [vmem:[%s3787_s27 + $0x50] sm:$0xff] }
 0x13f   : > { %v854_v27 = vpop.xlane.xlu1 %853  ;;  %v5747_v17 = vmul.f32 0.0051020407, %v2154_v14 }
 0x140   : > { %1895 = vst.msk [vmem:[%s3787_s27 + $0x1d0] sm:$0xff] %vm1527_vm1, %v1817_v55  ;;  %1437 = vadd.xlane.f32.xlu0 %v7361_v63  ;;  %v1822_v40 = vadd.f32 %v1745_v45, %v854_v27  ;;  %v5741_v45 = vmul.f32 %v5710_v22, %v5710_v22  ;;  %v2160_v63 = vld [vmem:[%s3787_s27 + $0x60] sm:$0xff]  ;;  %v2161_v27 = vld [vmem:[%s3787_s27 + $0x68] sm:$0xff] }
 0x141   : > { %v842_v24 = vpop.xlane.xlu0 %841  ;;  %v5787_v35 = vmul.f32 0.0051020407, %v2160_v63  ;;  %v5789_v23 = vmul.f32 0.0051020407, %v2161_v27  ;;  %v5798_v20 = vmul.f32 %v5747_v17, %v5747_v17  ;;  %v1756_v63 = vld [vmem:[%s3787_s27 + $0x250] sm:$0xff] }
 0x142   : > { %v1819_v42 = vadd.f32 %v1742_v61, %v842_v24  ;;  %1900 = vst.msk [vmem:[%s3787_s27 + $0x1f8] sm:$0xff] %vm1527_vm1, %v1822_v40  ;;  %1449 = vadd.xlane.f32.xlu1 %v7362_v21  ;;  %v1752_v61 = vld [vmem:[%s3787_s27 + $0x230] sm:$0xff]  ;;  %v5759_v21 = vmul.f32 0.0051020407, %v2159_v28 }
 0x143   : > { %v862_v44 = vpop.xlane.xlu1 %861  ;;  %v7364_v24 = vld [vmem:[#allocation28_spill] sm:$0xff]  ;;  %7365 = vst [vmem:[#allocation2_spill] sm:$0xff] %v5789_v23  ;;  %v5839_v27 = vmul.f32 %v5787_v35, %v5787_v35 }
 0x144   : > { %1897 = vst.msk [vmem:[%s3787_s27 + $0x1e0] sm:$0xff] %vm1527_vm1, %v1819_v42  ;;  %1445 = vadd.xlane.f32.xlu0 %v7363_v50  ;;  %v1824_v6 = vadd.f32 %v1747_v48, %v862_v44  ;;  %v5757_v48 = vmul.f32 0.0051020407, %v2156_v49  ;;  %v2163_v50 = vld [vmem:[%s3787_s27 + $0x78] sm:$0xff] }
 0x145   : > { %v850_v52 = vpop.xlane.xlu0 %849 }
 0x146   : > { %v1821_v0 = vadd.f32 %v1744_v34, %v850_v52  ;;  %1902 = vst.msk [vmem:[%s3787_s27 + $0x208] sm:$0xff] %vm1527_vm1, %v1824_v6  ;;  %1457 = vadd.xlane.f32.xlu1 %v4966_v2  ;;  %v1750_v2 = vld [vmem:[%s3787_s27 + $0x220] sm:$0xff]  ;;  %v5749_v34 = vmul.f32 0.0051020407, %v2157_v47  ;;  %v1755_v6 = vld [vmem:[%s3787_s27 + $0x248] sm:$0xff] }
 0x147   : > { %v870_v25 = vpop.xlane.xlu1 %869  ;;  %v2168_v47 = vld [vmem:[%s3787_s27 + $0xa0] sm:$0xff] }
 0x148   : > { %1899 = vst.msk [vmem:[%s3787_s27 + $0x1f0] sm:$0xff] %vm1527_vm1, %v1821_v0  ;;  %1453 = vadd.xlane.f32.xlu0 %v4968_v3  ;;  %v1826_v8 = vadd.f32 %v1749_v53, %v870_v25  ;;  %v2153_v3 = vld [vmem:[%s3787_s27 + $0x28] sm:$0xff]  ;;  %v5755_v0 = vmul.f32 %v5717_v62, %v5717_v62 }
 0x149   : > { %v858_v54 = vpop.xlane.xlu0 %857  ;;  %v5723_v55 = vmul.f32 0.0051020407, %v2153_v3  ;;  %v2165_v25 = vld [vmem:[%s3787_s27 + $0x88] sm:$0xff]  ;;  %v5806_v3 = vmul.f32 0.0051020407, %v2163_v50  ;;  %v2172_v50 = vld [vmem:[%s3787_s27 + $0xc0] sm:$0xff] }
 0x14a   : > { %v1823_v7 = vadd.f32 %v1746_v58, %v858_v54  ;;  %1904 = vst.msk [vmem:[%s3787_s27 + $0x218] sm:$0xff] %vm1527_vm1, %v1826_v8  ;;  %1465 = vadd.xlane.f32.xlu1 %v5011_v15  ;;  %v2162_v58 = vld [vmem:[%s3787_s27 + $0x70] sm:$0xff]  ;;  %v1754_v54 = vld [vmem:[%s3787_s27 + $0x240] sm:$0xff]  ;;  %v5781_v8 = vmul.f32 %v5731_v36, %v5731_v36  ;;  %v5819_v14 = vmul.f32 0.0051020407, %v2165_v25 }
 0x14b   : > { %v878_v43 = vpop.xlane.xlu1 %877  ;;  %v5771_v53 = vmul.f32 %v5723_v55, %v5723_v55  ;;  %v5804_v11 = vmul.f32 0.0051020407, %v2162_v58  ;;  %7367 = vst [vmem:[#allocation13_spill] sm:$0xff] %v5806_v3  ;;  %v5847_v58 = vmul.f32 0.0051020407, %v2169_v10 }
 0x14c   : > { %1901 = vst.msk [vmem:[%s3787_s27 + $0x200] sm:$0xff] %vm1527_vm1, %v1823_v7  ;;  %1461 = vadd.xlane.f32.xlu0 %v5014_v46  ;;  %v1828_v15 = vadd.f32 %v1751_v59, %v878_v43  ;;  %v5767_v7 = vmul.f32 %v5721_v4, %v5721_v4  ;;  %v2167_v59 = vld [vmem:[%s3787_s27 + $0x98] sm:$0xff]  ;;  %v2166_v43 = vld [vmem:[%s3787_s27 + $0x90] sm:$0xff]  ;;  %7368 = vst [vmem:[#allocation14_spill] sm:$0xff] %v5819_v14 }
 0x14d   : > { %v866_v57 = vpop.xlane.xlu0 %865  ;;  %7366 = vst [vmem:[#allocation3_spill] sm:$0xff] %v5804_v11  ;;  %7372 = vst [vmem:[#allocation18_spill] sm:$0xff] %v5847_v58 }
 0x14e   : > { %v1825_v38 = vadd.f32 %v1748_v32, %v866_v57  ;;  %1906 = vst.msk [vmem:[%s3787_s27 + $0x228] sm:$0xff] %vm1527_vm1, %v1828_v15  ;;  %1473 = vadd.xlane.f32.xlu1 %v5051_v1  ;;  %v5745_v1 = vmul.f32 %v5712_v29, %v5712_v29  ;;  %v5773_v32 = vmul.f32 0.0051020407, %v2158_v18  ;;  %v5785_v57 = vmul.f32 %v5733_v51, %v5733_v51  ;;  %v1757_v15 = vld [vmem:[%s3787_s27 + $0x258] sm:$0xff] }
 0x14f   : > { %v886_v42 = vpop.xlane.xlu1 %885  ;;  %v5829_v18 = vmul.f32 0.0051020407, %v2167_v59  ;;  %v2175_v59 = vld [vmem:[%s3787_s27 + $0xd8] sm:$0xff] }
 0x150   : > { %1903 = vst.msk [vmem:[%s3787_s27 + $0x210] sm:$0xff] %vm1527_vm1, %v1825_v38  ;;  %1469 = vadd.xlane.f32.xlu0 %v7364_v24  ;;  %v1830_v40 = vadd.f32 %v1753_v16, %v886_v42  ;;  %v2164_v38 = vld [vmem:[%s3787_s27 + $0x80] sm:$0xff]  ;;  %v5817_v16 = vmul.f32 %v5759_v21, %v5759_v21  ;;  %v5825_v28 = vmul.f32 %v5773_v32, %v5773_v32  ;;  %v2170_v24 = vld [vmem:[%s3787_s27 + $0xb0] sm:$0xff]  ;;  %v2173_v42 = vld [vmem:[%s3787_s27 + $0xc8] sm:$0xff] }
 0x151   : > { %v874_v39 = vpop.xlane.xlu0 %873  ;;  %7370 = vst [vmem:[#allocation16_spill] sm:$0xff] %v5829_v18  ;;  %v5871_v10 = vmul.f32 0.0051020407, %v2170_v24  ;;  %v5887_v24 = vmul.f32 0.0051020407, %v2172_v50 }
 0x152   : > { %v1827_v46 = vadd.f32 %v1750_v2, %v874_v39  ;;  %1908 = vst.msk [vmem:[%s3787_s27 + $0x238] sm:$0xff] %vm1527_vm1, %v1830_v40  ;;  %1481 = vadd.xlane.f32.xlu1 %v5086_v26  ;;  %v5802_v2 = vmul.f32 %v5749_v34, %v5749_v34  ;;  %v5813_v39 = vmul.f32 %v5757_v48, %v5757_v48  ;;  %v5903_v50 = vmul.f32 0.0051020407, %v2175_v59 }
 0x153   : > { %v894_v26 = vpop.xlane.xlu1 %893  ;;  %v5843_v40 = vmul.f32 %v5789_v23, %v5789_v23  ;;  %7375 = vst [vmem:[#allocation5_spill] sm:$0xff] %v5871_v10  ;;  %7378 = vst [vmem:[#allocation8_spill] sm:$0xff] %v5887_v24  ;;  %v1916_v23 = vld [vmem:[%s5133_s30 + $0x10] sm:$0xff] }
 0x154   : > { %1905 = vst.msk [vmem:[%s3787_s27 + $0x220] sm:$0xff] %vm1527_vm1, %v1827_v46  ;;  %1477 = vadd.xlane.f32.xlu0 %v5089_v33  ;;  %v1832_v12 = vadd.f32 %v1755_v6, %v894_v26  ;;  %v2171_v46 = vld [vmem:[%s3787_s27 + $0xb8] sm:$0xff]  ;;  %v5859_v6 = vmul.f32 %v5806_v3, %v5806_v3  ;;  %v1758_v3 = vld [vmem:[%s3787_s27 + $0x260] sm:$0xff]  ;;  %7381 = vst [vmem:[#allocation11_spill] sm:$0xff] %v5903_v50 }
 0x155   : > { %v882_v52 = vpop.xlane.xlu0 %881  ;;  %v5863_v25 = vmul.f32 0.0051020407, %v2171_v46 }
 0x156   : > { %v1829_v44 = vadd.f32 %v1752_v61, %v882_v52  ;;  %v5827_v61 = vmul.f32 0.0051020407, %v2164_v38  ;;  %1910 = vst.msk [vmem:[%s3787_s27 + $0x248] sm:$0xff] %vm1527_vm1, %v1832_v12  ;;  %1489 = vadd.xlane.f32.xlu1 %v5145_v60  ;;  %v5845_v52 = vmul.f32 0.0051020407, %v2166_v43  ;;  %v2174_v38 = vld [vmem:[%s3787_s27 + $0xd0] sm:$0xff]  ;;  %v5869_v43 = vmul.f32 %v5819_v14, %v5819_v14 }
 0x157   : > { %v902_v60 = vpop.xlane.xlu1 %901  ;;  %7374 = vst [vmem:[#allocation7_spill] sm:$0xff] %v5863_v25  ;;  %v5873_v12 = vmul.f32 0.0051020407, %v2173_v42  ;;  %v2179_v42 = vld [vmem:[%s3787_s27 + $0xf8] sm:$0xff]  ;;  %v2178_v14 = vld [vmem:[%s3787_s27 + $0xf0] sm:$0xff] }
 0x158   : > { %1907 = vst.msk [vmem:[%s3787_s27 + $0x230] sm:$0xff] %vm1527_vm1, %v1829_v44  ;;  %7369 = vst [vmem:[#allocation15_spill] sm:$0xff] %v5827_v61  ;;  %1485 = vadd.xlane.f32.xlu0 %v5148_v31  ;;  %v5855_v44 = vmul.f32 %v5804_v11, %v5804_v11  ;;  %v1834_v31 = vadd.f32 %v1757_v15, %v902_v60  ;;  %v5881_v15 = vmul.f32 %v5827_v61, %v5827_v61  ;;  %v2181_v61 = vld [vmem:[%s3787_s27 + $0x108] sm:$0xff] }
 0x159   : > { %v890_v33 = vpop.xlane.xlu0 %889  ;;  %7371 = vst [vmem:[#allocation17_spill] sm:$0xff] %v5845_v52  ;;  %7376 = vst [vmem:[#allocation6_spill] sm:$0xff] %v5873_v12  ;;  %v5885_v60 = vmul.f32 %v5829_v18, %v5829_v18  ;;  %v5901_v18 = vmul.f32 0.0051020407, %v2174_v38 }
 0x15a   : > { %v1831_v49 = vadd.f32 %v1754_v54, %v890_v33  ;;  %v5861_v54 = vmul.f32 0.0051020407, %v2168_v47  ;;  %v2176_v33 = vld [vmem:[%s3787_s27 + $0xe0] sm:$0xff]  ;;  %v2177_v47 = vld [vmem:[%s3787_s27 + $0xe8] sm:$0xff]  ;;  %1912 = vst.msk [vmem:[%s3787_s27 + $0x258] sm:$0xff] %vm1527_vm1, %v1834_v31  ;;  %1497 = vadd.xlane.f32.xlu1 %v5417_v13 }
 0x15b   : > { %7377 = vst [vmem:[#allocation10_spill] sm:$0xff] %v5885_v60  ;;  %7380 = vst [vmem:[#allocation12_spill] sm:$0xff] %v5901_v18  ;;  %v1218_v13 = vpop.xlane.xlu1 %1217  ;;  %v5918_v38 = vmul.f32 0.0051020407, %v2176_v33  ;;  %v5920_v59 = vmul.f32 0.0051020407, %v2177_v47 }
 0x15c   : > { %1909 = vst.msk [vmem:[%s3787_s27 + $0x240] sm:$0xff] %vm1527_vm1, %v1831_v49  ;;  %7373 = vst [vmem:[#allocation4_spill] sm:$0xff] %v5861_v54  ;;  %v1914_v49 = vld [vmem:[%s5133_s30] sm:$0xff]  ;;  %1493 = vadd.xlane.f32.xlu0 %v5420_v41  ;;  %v5912_v31 = vmul.f32 %v5861_v54, %v5861_v54  ;;  %v5927_v54 = vmul.f32 %v5871_v10, %v5871_v10  ;;  %v5933_v33 = vmul.f32 0.0051020407, %v2179_v42  ;;  %v2182_v47 = vld [vmem:[%s3787_s27 + $0x110] sm:$0xff] }
 0x15d   : > { %v898_v26 = vpop.xlane.xlu0 %897  ;;  %7383 = vst [vmem:[#allocation20_spill] sm:$0xff] %v5918_v38  ;;  %7384 = vst [vmem:[#allocation21_spill] sm:$0xff] %v5920_v59  ;;  %v5943_v60 = vmul.f32 0.0051020407, %v2181_v61  ;;  %v2184_v10 = vld [vmem:[%s3787_s27 + $0x120] sm:$0xff]  ;;  %v1915_v42 = vld [vmem:[%s5133_s30 + $0x8] sm:$0xff] }
 0x15e   : > { %v1833_v46 = vadd.f32 %v1756_v63, %v898_v26  ;;  %v5895_v63 = vmul.f32 %v5845_v52, %v5845_v52  ;;  %v5899_v26 = vmul.f32 %v5847_v58, %v5847_v58  ;;  %v5916_v58 = vmul.f32 %v5863_v25, %v5863_v25  ;;  %v2180_v52 = vld [vmem:[%s3787_s27 + $0x100] sm:$0xff]  ;;  %7385 = vst [vmem:[#allocation22_spill] sm:$0xff] %v5927_v54  ;;  %v2187_v54 = vld [vmem:[%s3787_s27 + $0x138] sm:$0xff] }
 0x15f   : > { %v5931_v25 = vmul.f32 %v5873_v12, %v5873_v12  ;;  %7387 = vst [vmem:[#allocation24_spill] sm:$0xff] %v5933_v33  ;;  %7389 = vst [vmem:[#allocation26_spill] sm:$0xff] %v5943_v60  ;;  %1505 = vadd.xlane.f32.xlu1 %v5443_v37  ;;  %v2186_v12 = vld [vmem:[%s3787_s27 + $0x130] sm:$0xff]  ;;  %v1226_v37 = vpop.xlane.xlu1 %1225 }
 0x160   : > { %7379 = vst [vmem:[#allocation9_spill] sm:$0xff] %v5899_v26  ;;  %1911 = vst.msk [vmem:[%s3787_s27 + $0x250] sm:$0xff] %vm1527_vm1, %v1833_v46  ;;  %v2183_v46 = vld [vmem:[%s3787_s27 + $0x118] sm:$0xff]  ;;  %v1991_v26 = vadd.f32 %v1914_v49, %v1218_v13  ;;  %v5939_v49 = vmul.f32 %v5887_v24, %v5887_v24  ;;  %v5941_v13 = vmul.f32 0.0051020407, %v2178_v14  ;;  %1501 = vadd.xlane.f32.xlu0 %v5446_v9 }
 0x161   : > { %7382 = vst [vmem:[#allocation19_spill] sm:$0xff] %v5916_v58  ;;  %v906_v41 = vpop.xlane.xlu0 %905  ;;  %7386 = vst [vmem:[#allocation23_spill] sm:$0xff] %v5931_v25  ;;  %v2185_v58 = vld [vmem:[%s3787_s27 + $0x128] sm:$0xff]  ;;  %v5959_v14 = vmul.f32 0.0051020407, %v2180_v52  ;;  %v5973_v52 = vmul.f32 %v5920_v59, %v5920_v59  ;;  %v1993_v9 = vadd.f32 %v1916_v23, %v1226_v37  ;;  %v2190_v59 = vld [vmem:[%s3787_s27 + $0x150] sm:$0xff]  ;;  %v5999_v37 = vmul.f32 %v5943_v60, %v5943_v60 }
 0x162   : > { %v1835_v11 = vadd.f32 %v1758_v3, %v906_v41  ;;  %7388 = vst [vmem:[#allocation25_spill] sm:$0xff] %v5941_v13  ;;  %2068 = vst.msk [vmem:[%s5133_s30] sm:$0xff] %vm1527_vm1, %v1991_v26  ;;  %v5953_v3 = vmul.f32 %v5901_v18, %v5901_v18  ;;  %v5957_v41 = vmul.f32 %v5903_v50, %v5903_v50  ;;  %v5961_v61 = vmul.f32 0.0051020407, %v2183_v46  ;;  %v2188_v18 = vld [vmem:[%s3787_s27 + $0x140] sm:$0xff]  ;;  %v1917_v25 = vld [vmem:[%s5133_s30 + $0x18] sm:$0xff] }
 0x163   : > { %7391 = vst [vmem:[#allocation28_spill] sm:$0xff] %v5959_v14  ;;  %v5969_v26 = vmul.f32 %v5918_v38, %v5918_v38  ;;  %7394 = vst [vmem:[#allocation31_spill] sm:$0xff] %v5973_v52  ;;  %v5975_v46 = vmul.f32 0.0051020407, %v2182_v47  ;;  %v5977_v50 = vmul.f32 0.0051020407, %v2185_v58  ;;  %v5995_v23 = vmul.f32 %v5941_v13, %v5941_v13  ;;  %1513 = vadd.xlane.f32.xlu1 %v5467_v19  ;;  %v1234_v19 = vpop.xlane.xlu1 %1233 }
 0x164   : > { %7390 = vst [vmem:[#allocation27_spill] sm:$0xff] %v5957_v41  ;;  %7392 = vst [vmem:[#allocation29_spill] sm:$0xff] %v5961_v61  ;;  %v5983_v41 = vmul.f32 %v5933_v33, %v5933_v33  ;;  %v5985_v38 = vmul.f32 0.0051020407, %v2184_v10  ;;  %v2191_v47 = vld [vmem:[%s3787_s27 + $0x158] sm:$0xff]  ;;  %v1918_v52 = vld [vmem:[%s5133_s30 + $0x20] sm:$0xff]  ;;  %1509 = vadd.xlane.f32.xlu0 %v5470_v5 }
 0x165   : > { %1913 = vst.msk [vmem:[%s3787_s27 + $0x260] sm:$0xff] %vm1527_vm1, %v1835_v11  ;;  %7393 = vst [vmem:[#allocation30_spill] sm:$0xff] %v5969_v26  ;;  %v2189_v11 = vld [vmem:[%s3787_s27 + $0x148] sm:$0xff]  ;;  %v1222_v24 = vpop.xlane.xlu0 %1221  ;;  %v5987_v26 = vmul.f32 0.0051020407, %v2187_v54  ;;  %v2195_v13 = vld [vmem:[%s3787_s27 + $0x178] sm:$0xff] }
 0x166   : > { %7395 = vst [vmem:[#allocation32_spill] sm:$0xff] %v5975_v46  ;;  %7396 = vst [vmem:[#allocation33_spill] sm:$0xff] %v5977_v50  ;;  %v1992_v58 = vadd.f32 %v1915_v42, %v1222_v24  ;;  %v6001_v10 = vmul.f32 0.0051020407, %v2186_v12  ;;  %v2193_v54 = vld [vmem:[%s3787_s27 + $0x168] sm:$0xff]  ;;  %v6009_v24 = vmul.f32 %v5959_v14, %v5959_v14  ;;  %v6013_v42 = vmul.f32 %v5961_v61, %v5961_v61  ;;  %v2192_v12 = vld [vmem:[%s3787_s27 + $0x160] sm:$0xff] }
 0x167   : > { %7397 = vst [vmem:[#allocation34_spill] sm:$0xff] %v5983_v41  ;;  %7398 = vst [vmem:[#allocation35_spill] sm:$0xff] %v5985_v38  ;;  %v6015_v33 = vmul.f32 0.0051020407, %v2188_v18  ;;  %v6017_v60 = vmul.f32 0.0051020407, %v2189_v11  ;;  %v6027_v61 = vmul.f32 %v5975_v46, %v5975_v46  ;;  %v6031_v18 = vmul.f32 %v5977_v50, %v5977_v50  ;;  %1521 = vadd.xlane.f32.xlu1 %v5487_v30  ;;  %v1242_v30 = vpop.xlane.xlu1 %1241 }
 0x168   : > { %7399 = vst [vmem:[#allocation36_spill] sm:$0xff] %v5987_v26  ;;  %7400 = vst [vmem:[#allocation37_spill] sm:$0xff] %v5999_v37  ;;  %v6033_v11 = vmul.f32 0.0051020407, %v2190_v59  ;;  %v6035_v14 = vmul.f32 0.0051020407, %v2191_v47  ;;  %v6041_v41 = vmul.f32 %v5985_v38, %v5985_v38  ;;  %v6045_v46 = vmul.f32 %v5987_v26, %v5987_v26  ;;  %1517 = vadd.xlane.f32.xlu0 %v5490_v56 }
 0x169   : > { %7401 = vst [vmem:[#allocation38_spill] sm:$0xff] %v6001_v10  ;;  %2070 = vst.msk [vmem:[%s5133_s30 + $0x10] sm:$0xff] %vm1527_vm1, %v1993_v9  ;;  %v1920_v9 = vld [vmem:[%s5133_s30 + $0x30] sm:$0xff]  ;;  %v1230_v5 = vpop.xlane.xlu0 %1229  ;;  %v1919_v37 = vld [vmem:[%s5133_s30 + $0x28] sm:$0xff]  ;;  %v6047_v50 = vmul.f32 0.0051020407, %v2193_v54  ;;  %v6066_v54 = vmul.f32 %v6015_v33, %v6015_v33 }
 0x16a   : > { %7402 = vst [vmem:[#allocation39_spill] sm:$0xff] %v6013_v42  ;;  %7403 = vst [vmem:[#allocation40_spill] sm:$0xff] %v6015_v33  ;;  %v1995_v42 = vadd.f32 %v1918_v52, %v1234_v19  ;;  %v2196_v59 = vld [vmem:[%s3787_s27 + $0x180] sm:$0xff]  ;;  %v2197_v47 = vld [vmem:[%s3787_s27 + $0x188] sm:$0xff]  ;;  %v6054_v52 = vmul.f32 %v6001_v10, %v6001_v10  ;;  %v6056_v19 = vmul.f32 0.0051020407, %v2192_v12 }
 0x16b   : > { %7404 = vst [vmem:[#allocation41_spill] sm:$0xff] %v6017_v60  ;;  %2069 = vst.msk [vmem:[%s5133_s30 + $0x8] sm:$0xff] %vm1527_vm1, %v1992_v58  ;;  %v2194_v58 = vld [vmem:[%s3787_s27 + $0x170] sm:$0xff]  ;;  %v6058_v38 = vmul.f32 0.0051020407, %v2195_v13  ;;  %v1922_v10 = vld [vmem:[%s5133_s30 + $0x40] sm:$0xff] }
 0x16c   : > { %7405 = vst [vmem:[#allocation42_spill] sm:$0xff] %v6027_v61  ;;  %7406 = vst [vmem:[#allocation43_spill] sm:$0xff] %v6031_v18  ;;  %v2302_v18 = vld [vmem:[%s5133_s30] sm:$0xff]  ;;  %v1994_v61 = vadd.f32 %v1917_v25, %v1230_v5  ;;  %v6070_v25 = vmul.f32 %v6017_v60, %v6017_v60  ;;  %v6072_v12 = vmul.f32 0.0051020407, %v2194_v58  ;;  %v2198_v13 = vld [vmem:[%s3787_s27 + $0x190] sm:$0xff] }
 0x16d   : > { %7407 = vst [vmem:[#allocation44_spill] sm:$0xff] %v6033_v11  ;;  %7408 = vst [vmem:[#allocation45_spill] sm:$0xff] %v6035_v14  ;;  %v2379_v26 = vmul.f32 0.0051020407, %v2302_v18  ;;  %v2201_v5 = vld [vmem:[%s3787_s27 + $0x1a8] sm:$0xff]  ;;  %v6085_v18 = vmul.f32 %v6035_v14, %v6035_v14  ;;  %v1238_v56 = vpop.xlane.xlu0 %1237  ;;  %v2200_v14 = vld [vmem:[%s3787_s27 + $0x1a0] sm:$0xff] }
 0x16e   : > { %7409 = vst [vmem:[#allocation46_spill] sm:$0xff] %v6041_v41  ;;  %7410 = vst [vmem:[#allocation47_spill] sm:$0xff] %v6045_v46  ;;  %v2199_v41 = vld [vmem:[%s3787_s27 + $0x198] sm:$0xff]  ;;  %v6087_v58 = vmul.f32 0.0051020407, %v2196_v59 }
 0x16f   : > { %7411 = vst [vmem:[#allocation48_spill] sm:$0xff] %v6047_v50  ;;  %7412 = vst [vmem:[#allocation49_spill] sm:$0xff] %v6056_v19  ;;  %v6089_v60 = vmul.f32 0.0051020407, %v2197_v47  ;;  %v2533_v33 = vsub.f32 %v2379_v26, %v5741_v45  ;;  %v1996_v47 = vadd.f32 %v1919_v37, %v1238_v56  ;;  %v6104_v45 = vmul.f32 %v6056_v19, %v6056_v19  ;;  %v1923_v19 = vld [vmem:[%s5133_s30 + $0x48] sm:$0xff] }
 0x170   : > { %7413 = vst [vmem:[#allocation50_spill] sm:$0xff] %v6058_v38  ;;  %2072 = vst.msk [vmem:[%s5133_s30 + $0x20] sm:$0xff] %vm1527_vm1, %v1995_v42  ;;  %v6081_v42 = vmul.f32 %v6033_v11, %v6033_v11  ;;  %v6096_v11 = vmul.f32 %v6047_v50, %v6047_v50  ;;  %v2304_v59 = vld [vmem:[%s5133_s30 + $0x10] sm:$0xff]  ;;  %v6106_v26 = vmul.f32 0.0051020407, %v2198_v13  ;;  %v6120_v37 = vmul.f32 %v6058_v38, %v6058_v38 }
 0x171   : > { %7414 = vst [vmem:[#allocation51_spill] sm:$0xff] %v6070_v25  ;;  %7415 = vst [vmem:[#allocation52_spill] sm:$0xff] %v6072_v12  ;;  %v1921_v25 = vld [vmem:[%s5133_s30 + $0x38] sm:$0xff]  ;;  %v2381_v46 = vmul.f32 0.0051020407, %v2304_v59  ;;  %v2202_v13 = vld [vmem:[%s3787_s27 + $0x1b0] sm:$0xff]  ;;  %v6127_v56 = vmul.f32 %v6087_v58, %v6087_v58 }
 0x172   : > { %2071 = vst.msk [vmem:[%s5133_s30 + $0x18] sm:$0xff] %vm1527_vm1, %v1994_v61  ;;  %7416 = vst [vmem:[#allocation53_spill] sm:$0xff] %v6081_v42  ;;  %v1997_v61 = vadd.f32 %v1920_v9, %v1242_v30  ;;  %v6108_v9 = vmul.f32 0.0051020407, %v2201_v5  ;;  %v2203_v30 = vld [vmem:[%s3787_s27 + $0x1b8] sm:$0xff]  ;;  %v2303_v50 = vld [vmem:[%s5133_s30 + $0x8] sm:$0xff] }
 0x173   : > { %7417 = vst [vmem:[#allocation54_spill] sm:$0xff] %v6085_v18  ;;  %7418 = vst [vmem:[#allocation55_spill] sm:$0xff] %v6087_v58  ;;  %v6099_v18 = vmul.f32 0.0051020407, %v2199_v41  ;;  %v2610_v42 = vadd.f32 1e-05, %v2533_v33  ;;  %v6116_v41 = vmul.f32 %v6072_v12, %v6072_v12  ;;  %v1250_v33 = vpop.xlane.xlu1 %1249  ;;  %v2535_v38 = vsub.f32 %v2381_v46, %v5745_v1  ;;  %v1246_v12 = vpop.xlane.xlu0 %1245 }
 0x174   : > { %7419 = vst [vmem:[#allocation56_spill] sm:$0xff] %v6089_v60  ;;  %7421 = vst [vmem:[#allocation58_spill] sm:$0xff] %v6106_v26  ;;  %v2380_v5 = vmul.f32 0.0051020407, %v2303_v50  ;;  %v6133_v59 = vmul.f32 0.0051020407, %v2200_v14  ;;  %v1999_v50 = vadd.f32 %v1922_v10, %v1250_v33 }
 0x175   : > { %7420 = vst [vmem:[#allocation57_spill] sm:$0xff] %v6099_v18  ;;  %7422 = vst [vmem:[#allocation59_spill] sm:$0xff] %v6108_v9  ;;  %3471 = vrsqrt.f32 %v2610_v42  ;;  %v6140_v58 = vmul.f32 %v6099_v18, %v6099_v18  ;;  %v6145_v42 = vmul.f32 0.0051020407, %v2202_v13  ;;  %v6148_v1 = vmul.f32 0.0051020407, %v2203_v30 }
 0x176   : > { %2074 = vst.msk [vmem:[%s5133_s30 + $0x30] sm:$0xff] %vm1527_vm1, %v1997_v61  ;;  %7423 = vst [vmem:[#allocation60_spill] sm:$0xff] %v6120_v37  ;;  %v6131_v61 = vmul.f32 %v6089_v60, %v6089_v60  ;;  %v2205_v37 = vld [vmem:[%s3787_s27 + $0x1c8] sm:$0xff]  ;;  %v2534_v60 = vsub.f32 %v2380_v5, %v5767_v7  ;;  %v2612_v46 = vadd.f32 1e-05, %v2535_v38  ;;  %v6155_v18 = vmul.f32 %v6106_v26, %v6106_v26 }
 0x177   : > { %2073 = vst.msk [vmem:[%s5133_s30 + $0x28] sm:$0xff] %vm1527_vm1, %v1996_v47  ;;  %7424 = vst [vmem:[#allocation61_spill] sm:$0xff] %v6127_v56  ;;  %v1924_v47 = vld [vmem:[%s5133_s30 + $0x50] sm:$0xff]  ;;  %v2306_v14 = vld [vmem:[%s5133_s30 + $0x20] sm:$0xff]  ;;  %v6159_v7 = vmul.f32 %v6108_v9, %v6108_v9  ;;  %v1258_v38 = vpop.xlane.xlu1 %1257  ;;  %v6166_v13 = vmul.f32 %v6133_v59, %v6133_v59  ;;  %v6168_v5 = vmul.f32 0.0051020407, %v2205_v37 }
 0x178   : > { %7425 = vst [vmem:[#allocation62_spill] sm:$0xff] %v6131_v61  ;;  %7426 = vst [vmem:[#allocation63_spill] sm:$0xff] %v6133_v59  ;;  %v1998_v61 = vadd.f32 %v1921_v25, %v1246_v12  ;;  %v2204_v56 = vld [vmem:[%s3787_s27 + $0x1c0] sm:$0xff]  ;;  %v2383_v10 = vmul.f32 0.0051020407, %v2306_v14  ;;  %v2207_v25 = vld [vmem:[%s3787_s27 + $0x1d8] sm:$0xff]  ;;  %3473 = vrsqrt.f32 %v2612_v46  ;;  %v2001_v14 = vadd.f32 %v1924_v47, %v1258_v38 }
 0x179   : > { %7427 = vst [vmem:[#allocation64_spill] sm:$0xff] %v6145_v42  ;;  %7428 = vst [vmem:[#allocation65_spill] sm:$0xff] %v6148_v1  ;;  %v2305_v33 = vld [vmem:[%s5133_s30 + $0x18] sm:$0xff]  ;;  %v2611_v12 = vadd.f32 1e-05, %v2534_v60  ;;  %v1254_v60 = vpop.xlane.xlu0 %1253  ;;  %v1926_v9 = vld [vmem:[%s5133_s30 + $0x60] sm:$0xff] }
 0x17a   : > { %2076 = vst.msk [vmem:[%s5133_s30 + $0x40] sm:$0xff] %vm1527_vm1, %v1999_v50  ;;  %7429 = vst [vmem:[#allocation66_spill] sm:$0xff] %v6159_v7  ;;  %v2382_v30 = vmul.f32 0.0051020407, %v2305_v33  ;;  %v2537_v50 = vsub.f32 %v2383_v10, %v5781_v8  ;;  %v6172_v33 = vmul.f32 0.0051020407, %v2204_v56  ;;  %v2000_v8 = vadd.f32 %v1923_v19, %v1254_v60 }
 0x17b   : > { %2075 = vst.msk [vmem:[%s5133_s30 + $0x38] sm:$0xff] %vm1527_vm1, %v1998_v61  ;;  %7430 = vst [vmem:[#allocation67_spill] sm:$0xff] %v6168_v5  ;;  %v2206_v61 = vld [vmem:[%s3787_s27 + $0x1d0] sm:$0xff]  ;;  %3475 = vrsqrt.f32 %v2611_v12  ;;  %v1925_v10 = vld [vmem:[%s5133_s30 + $0x58] sm:$0xff]  ;;  %v6185_v38 = vmul.f32 0.0051020407, %v2207_v25  ;;  %v6192_v7 = vmul.f32 %v6145_v42, %v6145_v42 }
 0x17c   : > { %7431 = vst [vmem:[#allocation68_spill] sm:$0xff] %v6172_v33  ;;  %v2536_v37 = vsub.f32 %v2382_v30, %v5755_v0  ;;  %v2208_v47 = vld [vmem:[%s3787_s27 + $0x1e0] sm:$0xff]  ;;  %v2614_v56 = vadd.f32 1e-05, %v2537_v50  ;;  %2078 = vst.msk [vmem:[%s5133_s30 + $0x50] sm:$0xff] %vm1527_vm1, %v2001_v14  ;;  %v6196_v0 = vmul.f32 %v6148_v1, %v6148_v1  ;;  %v2209_v19 = vld [vmem:[%s3787_s27 + $0x1e8] sm:$0xff]  ;;  %v1266_v30 = vpop.xlane.xlu1 %1265  ;;  %v6205_v14 = vmul.f32 %v6168_v5, %v6168_v5 }
 0x17d   : > { %v2308_v46 = vld [vmem:[%s5133_s30 + $0x30] sm:$0xff]  ;;  %7432 = vst [vmem:[#allocation69_spill] sm:$0xff] %v6185_v38  ;;  %2077 = vst.msk [vmem:[%s5133_s30 + $0x48] sm:$0xff] %vm1527_vm1, %v2000_v8  ;;  %v6201_v50 = vmul.f32 0.0051020407, %v2206_v61  ;;  %v2764_v60 = vld [vmem:[%s6179_s7] sm:$0xff]  ;;  %v2003_v1 = vadd.f32 %v1926_v9, %v1266_v30 }
 0x17e   : > { %v2385_v59 = vmul.f32 0.0051020407, %v2308_v46  ;;  %v2307_v26 = vld [vmem:[%s5133_s30 + $0x28] sm:$0xff]  ;;  %7433 = vst [vmem:[#allocation70_spill] sm:$0xff] %v6196_v0  ;;  %v2613_v12 = vadd.f32 1e-05, %v2536_v37  ;;  %3477 = vrsqrt.f32 %v2614_v56  ;;  %v1262_v37 = vpop.xlane.xlu0 %1261 }
 0x17f   : > { %v2384_v25 = vmul.f32 0.0051020407, %v2307_v26  ;;  %7434 = vst [vmem:[#allocation71_spill] sm:$0xff] %v6201_v50  ;;  %7435 = vst [vmem:[#allocation72_spill] sm:$0xff] %v6205_v14  ;;  %v6209_v26 = vmul.f32 0.0051020407, %v2208_v47  ;;  %v2002_v56 = vadd.f32 %v1925_v10, %v1262_v37  ;;  %v3472_v47 = vpop.eup %3471 }
 0x180   : > { %v2539_v46 = vsub.f32 %v2385_v59, %v5798_v20  ;;  %v2210_v8 = vld [vmem:[%s3787_s27 + $0x1f0] sm:$0xff]  ;;  %3479 = vrsqrt.f32 %v2613_v12  ;;  %v6221_v59 = vmul.f32 0.0051020407, %v2209_v19  ;;  %v2211_v9 = vld [vmem:[%s3787_s27 + $0x1f8] sm:$0xff]  ;;  %2080 = vst.msk [vmem:[%s5133_s30 + $0x60] sm:$0xff] %vm1527_vm1, %v2003_v1  ;;  %v1927_v0 = vld [vmem:[%s5133_s30 + $0x68] sm:$0xff]  ;;  %v6230_v12 = vmul.f32 %v6172_v33, %v6172_v33 }
 0x181   : > { %7436 = vst [vmem:[#allocation73_spill] sm:$0xff] %v6209_v26  ;;  %v2538_v61 = vsub.f32 %v2384_v25, %v5771_v53  ;;  %v2310_v5 = vld [vmem:[%s5133_s30 + $0x40] sm:$0xff]  ;;  %v1928_v20 = vld [vmem:[%s5133_s30 + $0x70] sm:$0xff]  ;;  %v6234_v53 = vmul.f32 %v6185_v38, %v6185_v38  ;;  %v2841_v10 = vmul.f32 %v3472_v47, %v2764_v60  ;;  %2079 = vst.msk [vmem:[%s5133_s30 + $0x58] sm:$0xff] %vm1527_vm1, %v2002_v56  ;;  %v6238_v1 = vmul.f32 0.0051020407, %v2210_v8 }
 0x182   : > { %v2616_v30 = vadd.f32 1e-05, %v2539_v46  ;;  %v2387_v42 = vmul.f32 0.0051020407, %v2310_v5  ;;  %v2309_v14 = vld [vmem:[%s5133_s30 + $0x38] sm:$0xff]  ;;  %v1274_v5 = vpop.xlane.xlu1 %1273  ;;  %v2918_v46 = vld [vmem:[%s6216_s10] sm:$0xff] }
 0x183   : > { %7437 = vst [vmem:[#allocation74_spill] sm:$0xff] %v6234_v53  ;;  %v2615_v19 = vadd.f32 1e-05, %v2538_v61  ;;  %v2386_v25 = vmul.f32 0.0051020407, %v2309_v14  ;;  %v2766_v37 = vld [vmem:[%s6179_s7 + $0x10] sm:$0xff]  ;;  %v2005_v38 = vadd.f32 %v1928_v20, %v1274_v5  ;;  %v1270_v53 = vpop.xlane.xlu0 %1269  ;;  %v2995_v14 = vmul.f32 %v2841_v10, %v5710_v22 }
 0x184   : > { %3481 = vrsqrt.f32 %v2616_v30  ;;  %v2541_v33 = vsub.f32 %v2387_v42, %v5813_v39  ;;  %v6243_v60 = vmul.f32 0.0051020407, %v2211_v9  ;;  %3149 = vst.msk [vmem:[%s3787_s27] sm:$0xff] %vm1527_vm1, %v2841_v10  ;;  %v2765_v61 = vld [vmem:[%s6179_s7 + $0x8] sm:$0xff]  ;;  %v2312_v56 = vld [vmem:[%s5133_s30 + $0x50] sm:$0xff]  ;;  %v2004_v47 = vadd.f32 %v1927_v0, %v1270_v53  ;;  %v1930_v30 = vld [vmem:[%s5133_s30 + $0x80] sm:$0xff]  ;;  %v3474_v39 = vpop.eup %3473 }
 0x185   : > { %3483 = vrsqrt.f32 %v2615_v19  ;;  %v2540_v8 = vsub.f32 %v2386_v25, %v5785_v57  ;;  %v2389_v20 = vmul.f32 0.0051020407, %v2312_v56  ;;  %v2311_v5 = vld [vmem:[%s5133_s30 + $0x48] sm:$0xff]  ;;  %2082 = vst.msk [vmem:[%s5133_s30 + $0x70] sm:$0xff] %vm1527_vm1, %v2005_v38  ;;  %v1929_v9 = vld [vmem:[%s5133_s30 + $0x78] sm:$0xff]  ;;  %v6258_v22 = vmul.f32 %v6201_v50, %v6201_v50  ;;  %v3476_v0 = vpop.eup %3475  ;;  %v2920_v25 = vld [vmem:[%s6216_s10 + $0x10] sm:$0xff] }
 0x186   : > { %v2618_v42 = vadd.f32 1e-05, %v2541_v33  ;;  %v6262_v57 = vmul.f32 %v6209_v26, %v6209_v26  ;;  %v3072_v53 = vsub.f32 %v2918_v46, %v2995_v14  ;;  %v2843_v33 = vmul.f32 %v3474_v39, %v2766_v37  ;;  %2081 = vst.msk [vmem:[%s5133_s30 + $0x68] sm:$0xff] %vm1527_vm1, %v2004_v47  ;;  %v1282_v38 = vpop.xlane.xlu1 %1281  ;;  %v2768_v50 = vld [vmem:[%s6179_s7 + $0x20] sm:$0xff]  ;;  %v2919_v37 = vld [vmem:[%s6216_s10 + $0x8] sm:$0xff]  ;;  %v2767_v14 = vld [vmem:[%s6179_s7 + $0x18] sm:$0xff] }
 0x187   : > { %7438 = vst [vmem:[#allocation75_spill] sm:$0xff] %v6258_v22  ;;  %v2617_v10 = vadd.f32 1e-05, %v2540_v8  ;;  %v2388_v19 = vmul.f32 0.0051020407, %v2311_v5  ;;  %v2842_v56 = vmul.f32 %v3476_v0, %v2765_v61  ;;  %v2543_v26 = vsub.f32 %v2389_v20, %v5825_v28  ;;  %v1278_v22 = vpop.xlane.xlu0 %1277  ;;  %v2314_v8 = vld [vmem:[%s5133_s30 + $0x60] sm:$0xff] }
 0x188   : > { %7439 = vst [vmem:[#allocation76_spill] sm:$0xff] %v6262_v57  ;;  %3485 = vrsqrt.f32 %v2618_v42  ;;  %v2007_v57 = vadd.f32 %v1930_v30, %v1282_v38  ;;  %3226 = vst.msk [vmem:[%s5133_s30] sm:$0xff] %vm1527_vm1, %v3072_v53  ;;  %v2997_v46 = vmul.f32 %v2843_v33, %v5712_v29  ;;  %v2006_v47 = vadd.f32 %v1929_v9, %v1278_v22  ;;  %v3478_v28 = vpop.eup %3477  ;;  %v2313_v29 = vld [vmem:[%s5133_s30 + $0x58] sm:$0xff]  ;;  %v1932_v20 = vld [vmem:[%s5133_s30 + $0x90] sm:$0xff] }
 0x189   : > { %3151 = vst.msk [vmem:[%s3787_s27 + $0x10] sm:$0xff] %vm1527_vm1, %v2843_v33  ;;  %3487 = vrsqrt.f32 %v2617_v10  ;;  %v2542_v61 = vsub.f32 %v2388_v19, %v5802_v2  ;;  %v2996_v30 = vmul.f32 %v2842_v56, %v5721_v4  ;;  %3150 = vst.msk [vmem:[%s3787_s27 + $0x8] sm:$0xff] %vm1527_vm1, %v2842_v56  ;;  %v2620_v39 = vadd.f32 1e-05, %v2543_v26  ;;  %v1931_v53 = vld [vmem:[%s5133_s30 + $0x88] sm:$0xff]  ;;  %v2922_v33 = vld [vmem:[%s6216_s10 + $0x20] sm:$0xff] }
 0x18a   : > { %v2391_v42 = vmul.f32 0.0051020407, %v2314_v8  ;;  %2084 = vst.msk [vmem:[%s5133_s30 + $0x80] sm:$0xff] %vm1527_vm1, %v2007_v57  ;;  %v6287_v2 = vmul.f32 %v6221_v59, %v6221_v59  ;;  %v3480_v5 = vpop.eup %3479  ;;  %v3074_v9 = vsub.f32 %v2920_v25, %v2997_v46  ;;  %v2845_v22 = vmul.f32 %v3478_v28, %v2768_v50  ;;  %2083 = vst.msk [vmem:[%s5133_s30 + $0x78] sm:$0xff] %vm1527_vm1, %v2006_v47  ;;  %v1290_v26 = vpop.xlane.xlu1 %1289  ;;  %v2770_v19 = vld [vmem:[%s6179_s7 + $0x30] sm:$0xff]  ;;  %v2921_v56 = vld [vmem:[%s6216_s10 + $0x18] sm:$0xff] }
 0x18b   : > { %v2619_v4 = vadd.f32 1e-05, %v2542_v61  ;;  %v2390_v0 = vmul.f32 0.0051020407, %v2313_v29  ;;  %v3073_v57 = vsub.f32 %v2919_v37, %v2996_v30  ;;  %v2844_v10 = vmul.f32 %v3480_v5, %v2767_v14  ;;  %v1286_v25 = vpop.xlane.xlu0 %1285  ;;  %v2769_v46 = vld [vmem:[%s6179_s7 + $0x28] sm:$0xff] }
 0x18c   : > { %3489 = vrsqrt.f32 %v2620_v39  ;;  %v2545_v38 = vsub.f32 %v2391_v42, %v5839_v27  ;;  %3228 = vst.msk [vmem:[%s5133_s30 + $0x10] sm:$0xff] %vm1527_vm1, %v3074_v9  ;;  %v2999_v50 = vmul.f32 %v2845_v22, %v5731_v36  ;;  %3153 = vst.msk [vmem:[%s3787_s27 + $0x20] sm:$0xff] %vm1527_vm1, %v2845_v22  ;;  %v2316_v14 = vld [vmem:[%s5133_s30 + $0x70] sm:$0xff]  ;;  %v2009_v61 = vadd.f32 %v1932_v20, %v1290_v26  ;;  %v1934_v39 = vld [vmem:[%s5133_s30 + $0xa0] sm:$0xff] }
 0x18d   : > { %3491 = vrsqrt.f32 %v2619_v4  ;;  %v2544_v37 = vsub.f32 %v2390_v0, %v5817_v16  ;;  %3227 = vst.msk [vmem:[%s5133_s30 + $0x8] sm:$0xff] %vm1527_vm1, %v3073_v57  ;;  %v2998_v27 = vmul.f32 %v2844_v10, %v5717_v62  ;;  %3152 = vst.msk [vmem:[%s3787_s27 + $0x18] sm:$0xff] %vm1527_vm1, %v2844_v10  ;;  %v2393_v47 = vmul.f32 0.0051020407, %v2316_v14  ;;  %v2315_v28 = vld [vmem:[%s5133_s30 + $0x68] sm:$0xff]  ;;  %v1933_v9 = vld [vmem:[%s5133_s30 + $0x98] sm:$0xff] }
 0x18e   : > { %v3482_v8 = vpop.eup %3481  ;;  %v2622_v36 = vadd.f32 1e-05, %v2545_v38  ;;  %v2008_v30 = vadd.f32 %v1931_v53, %v1286_v25  ;;  %v3076_v42 = vsub.f32 %v2922_v33, %v2999_v50  ;;  %v2392_v5 = vmul.f32 0.0051020407, %v2315_v28  ;;  %2086 = vst.msk [vmem:[%s5133_s30 + $0x90] sm:$0xff] %vm1527_vm1, %v2009_v61  ;;  %v1298_v62 = vpop.xlane.xlu1 %1297  ;;  %v2924_v4 = vld [vmem:[%s6216_s10 + $0x30] sm:$0xff] }
 0x18f   : > { %v3484_v16 = vpop.eup %3483  ;;  %v2847_v29 = vmul.f32 %v3482_v8, %v2770_v19  ;;  %v2621_v20 = vadd.f32 1e-05, %v2544_v37  ;;  %v3075_v22 = vsub.f32 %v2921_v56, %v2998_v27  ;;  %v2772_v26 = vld [vmem:[%s6179_s7 + $0x40] sm:$0xff]  ;;  %v2547_v53 = vsub.f32 %v2393_v47, %v5855_v44  ;;  %v1294_v57 = vpop.xlane.xlu0 %1293  ;;  %v2923_v10 = vld [vmem:[%s6216_s10 + $0x28] sm:$0xff]  ;;  %v2771_v19 = vld [vmem:[%s6179_s7 + $0x38] sm:$0xff] }
 0x190   : > { %v2846_v0 = vmul.f32 %v3484_v16, %v2769_v46  ;;  %3493 = vrsqrt.f32 %v2622_v36  ;;  %2085 = vst.msk [vmem:[%s5133_s30 + $0x88] sm:$0xff] %vm1527_vm1, %v2008_v30  ;;  %3230 = vst.msk [vmem:[%s5133_s30 + $0x20] sm:$0xff] %vm1527_vm1, %v3076_v42  ;;  %v2546_v38 = vsub.f32 %v2392_v5, %v5843_v40  ;;  %v2011_v50 = vadd.f32 %v1934_v39, %v1298_v62  ;;  %v1936_v61 = vld [vmem:[%s5133_s30 + $0xb0] sm:$0xff]  ;;  %v1935_v28 = vld [vmem:[%s5133_s30 + $0xa8] sm:$0xff] }
 0x191   : > { %v3001_v33 = vmul.f32 %v2847_v29, %v5747_v17  ;;  %3155 = vst.msk [vmem:[%s3787_s27 + $0x30] sm:$0xff] %vm1527_vm1, %v2847_v29  ;;  %3495 = vrsqrt.f32 %v2621_v20  ;;  %v2318_v25 = vld [vmem:[%s5133_s30 + $0x80] sm:$0xff]  ;;  %3229 = vst.msk [vmem:[%s5133_s30 + $0x18] sm:$0xff] %vm1527_vm1, %v3075_v22  ;;  %v2624_v17 = vadd.f32 1e-05, %v2547_v53  ;;  %v2317_v37 = vld [vmem:[%s5133_s30 + $0x78] sm:$0xff]  ;;  %v2010_v14 = vadd.f32 %v1933_v9, %v1294_v57 }
 0x192   : > { %v3486_v44 = vpop.eup %3485  ;;  %v3000_v56 = vmul.f32 %v2846_v0, %v5723_v55  ;;  %3154 = vst.msk [vmem:[%s3787_s27 + $0x28] sm:$0xff] %vm1527_vm1, %v2846_v0  ;;  %v2395_v46 = vmul.f32 0.0051020407, %v2318_v25  ;;  %v2623_v36 = vadd.f32 1e-05, %v2546_v38  ;;  %2088 = vst.msk [vmem:[%s5133_s30 + $0xa0] sm:$0xff] %vm1527_vm1, %v2011_v50  ;;  %v1306_v55 = vpop.xlane.xlu1 %1305 }
 0x193   : > { %v3488_v40 = vpop.eup %3487  ;;  %v3078_v8 = vsub.f32 %v2924_v4, %v3001_v33  ;;  %v2849_v27 = vmul.f32 %v3486_v44, %v2772_v26  ;;  %v2394_v47 = vmul.f32 0.0051020407, %v2317_v37  ;;  %v2212_v30 = vld [vmem:[%s3787_s27 + $0x200] sm:$0xff]  ;;  %v2774_v29 = vld [vmem:[%s6179_s7 + $0x50] sm:$0xff]  ;;  %3497 = vrsqrt.f32 %v2624_v17  ;;  %2087 = vst.msk [vmem:[%s5133_s30 + $0x98] sm:$0xff] %vm1527_vm1, %v2010_v14  ;;  %v1302_v5 = vpop.xlane.xlu0 %1301  ;;  %v2925_v9 = vld [vmem:[%s6216_s10 + $0x38] sm:$0xff] }
 0x194   : > { %v3077_v39 = vsub.f32 %v2923_v10, %v3000_v56  ;;  %v2926_v16 = vld [vmem:[%s6216_s10 + $0x40] sm:$0xff]  ;;  %v2848_v42 = vmul.f32 %v3488_v40, %v2771_v19  ;;  %v2549_v20 = vsub.f32 %v2395_v46, %v5881_v15  ;;  %v2773_v22 = vld [vmem:[%s6179_s7 + $0x48] sm:$0xff]  ;;  %3499 = vrsqrt.f32 %v2623_v36  ;;  %v1937_v10 = vld [vmem:[%s5133_s30 + $0xb8] sm:$0xff] }
 0x195   : > { %3232 = vst.msk [vmem:[%s5133_s30 + $0x30] sm:$0xff] %vm1527_vm1, %v3078_v8  ;;  %v3003_v62 = vmul.f32 %v2849_v27, %v5757_v48  ;;  %3157 = vst.msk [vmem:[%s3787_s27 + $0x40] sm:$0xff] %vm1527_vm1, %v2849_v27  ;;  %v2548_v4 = vsub.f32 %v2394_v47, %v5859_v6  ;;  %v2013_v0 = vadd.f32 %v1936_v61, %v1306_v55  ;;  %v1938_v26 = vld [vmem:[%s5133_s30 + $0xc0] sm:$0xff]  ;;  %v2320_v57 = vld [vmem:[%s5133_s30 + $0x90] sm:$0xff]  ;;  %v6360_v19 = vmul.f32 0.0051020407, %v2212_v30 }
 0x196   : > { %v3490_v15 = vpop.eup %3489  ;;  %3231 = vst.msk [vmem:[%s5133_s30 + $0x28] sm:$0xff] %vm1527_vm1, %v3077_v39  ;;  %v3002_v53 = vmul.f32 %v2848_v42, %v5733_v51  ;;  %3156 = vst.msk [vmem:[%s3787_s27 + $0x38] sm:$0xff] %vm1527_vm1, %v2848_v42  ;;  %v2626_v48 = vadd.f32 1e-05, %v2549_v20  ;;  %v2012_v33 = vadd.f32 %v1935_v28, %v1302_v5  ;;  %v2397_v44 = vmul.f32 0.0051020407, %v2320_v57  ;;  %v1314_v56 = vpop.xlane.xlu1 %1313 }
 0x197   : > { %v3492_v6 = vpop.eup %3491  ;;  %v3080_v38 = vsub.f32 %v2926_v16, %v3003_v62  ;;  %v2851_v25 = vmul.f32 %v3490_v15, %v2774_v29  ;;  %v2625_v50 = vadd.f32 1e-05, %v2548_v4  ;;  %v2319_v51 = vld [vmem:[%s5133_s30 + $0x88] sm:$0xff]  ;;  %2090 = vst.msk [vmem:[%s5133_s30 + $0xb0] sm:$0xff] %vm1527_vm1, %v2013_v0  ;;  %v2928_v37 = vld [vmem:[%s6216_s10 + $0x50] sm:$0xff]  ;;  %v2776_v61 = vld [vmem:[%s6179_s7 + $0x60] sm:$0xff]  ;;  %v1310_v8 = vpop.xlane.xlu0 %1309  ;;  %v2015_v28 = vadd.f32 %v1938_v26, %v1314_v56 }
 0x198   : > { %v2213_v17 = vld [vmem:[%s3787_s27 + $0x208] sm:$0xff]  ;;  %v3079_v46 = vsub.f32 %v2925_v9, %v3002_v53  ;;  %v2850_v14 = vmul.f32 %v3492_v6, %v2773_v22  ;;  %3501 = vrsqrt.f32 %v2626_v48  ;;  %v2396_v40 = vmul.f32 0.0051020407, %v2319_v51  ;;  %2089 = vst.msk [vmem:[%s5133_s30 + $0xa8] sm:$0xff] %vm1527_vm1, %v2012_v33  ;;  %v2775_v47 = vld [vmem:[%s6179_s7 + $0x58] sm:$0xff]  ;;  %v1940_v29 = vld [vmem:[%s5133_s30 + $0xd0] sm:$0xff] }
 0x199   : > { %3234 = vst.msk [vmem:[%s5133_s30 + $0x40] sm:$0xff] %vm1527_vm1, %v3080_v38  ;;  %v3005_v27 = vmul.f32 %v2851_v25, %v5773_v32  ;;  %3159 = vst.msk [vmem:[%s3787_s27 + $0x50] sm:$0xff] %vm1527_vm1, %v2851_v25  ;;  %v2927_v36 = vld [vmem:[%s6216_s10 + $0x48] sm:$0xff]  ;;  %3503 = vrsqrt.f32 %v2625_v50  ;;  %v2551_v55 = vsub.f32 %v2397_v44, %v5895_v63  ;;  %v2322_v16 = vld [vmem:[%s5133_s30 + $0xa0] sm:$0xff]  ;;  %v2014_v42 = vadd.f32 %v1937_v10, %v1310_v8 }
 0x19a   : > { %v3494_v30 = vpop.eup %3493  ;;  %3233 = vst.msk [vmem:[%s5133_s30 + $0x38] sm:$0xff] %vm1527_vm1, %v3079_v46  ;;  %v3004_v39 = vmul.f32 %v2850_v14, %v5749_v34  ;;  %3158 = vst.msk [vmem:[%s3787_s27 + $0x48] sm:$0xff] %vm1527_vm1, %v2850_v14  ;;  %v2550_v32 = vsub.f32 %v2396_v40, %v5869_v43  ;;  %v6386_v20 = vmul.f32 0.0051020407, %v2213_v17  ;;  %v2399_v22 = vmul.f32 0.0051020407, %v2322_v16  ;;  %v1322_v43 = vpop.xlane.xlu1 %1321 }
 0x19b   : > { %v3496_v63 = vpop.eup %3495  ;;  %v3082_v5 = vsub.f32 %v2928_v37, %v3005_v27  ;;  %v2853_v62 = vmul.f32 %v3494_v30, %v2776_v61  ;;  %v2628_v9 = vadd.f32 1e-05, %v2551_v55  ;;  %v2321_v34 = vld [vmem:[%s5133_s30 + $0x98] sm:$0xff]  ;;  %2092 = vst.msk [vmem:[%s5133_s30 + $0xc0] sm:$0xff] %vm1527_vm1, %v2015_v28  ;;  %v1939_v4 = vld [vmem:[%s5133_s30 + $0xc8] sm:$0xff]  ;;  %v2930_v26 = vld [vmem:[%s6216_s10 + $0x60] sm:$0xff]  ;;  %v1318_v33 = vpop.xlane.xlu0 %1317  ;;  %v2017_v50 = vadd.f32 %v1940_v29, %v1322_v43 }
 0x19c   : > { %v3081_v0 = vsub.f32 %v2927_v36, %v3004_v39  ;;  %v2852_v15 = vmul.f32 %v3496_v63, %v2775_v47  ;;  %v2778_v53 = vld [vmem:[%s6179_s7 + $0x70] sm:$0xff]  ;;  %v2627_v48 = vadd.f32 1e-05, %v2550_v32  ;;  %v2398_v57 = vmul.f32 0.0051020407, %v2321_v34  ;;  %2091 = vst.msk [vmem:[%s5133_s30 + $0xb8] sm:$0xff] %vm1527_vm1, %v2014_v42 }
 0x19d   : > { %3236 = vst.msk [vmem:[%s5133_s30 + $0x50] sm:$0xff] %vm1527_vm1, %v3082_v5  ;;  %v3007_v10 = vmul.f32 %v2853_v62, %v5787_v35  ;;  %3161 = vst.msk [vmem:[%s3787_s27 + $0x60] sm:$0xff] %vm1527_vm1, %v2853_v62  ;;  %v2929_v6 = vld [vmem:[%s6216_s10 + $0x58] sm:$0xff]  ;;  %v2777_v38 = vld [vmem:[%s6179_s7 + $0x68] sm:$0xff]  ;;  %3505 = vrsqrt.f32 %v2628_v9  ;;  %v2553_v25 = vsub.f32 %v2399_v22, %v5912_v31  ;;  %v3498_v44 = vpop.eup %3497  ;;  %v2016_v46 = vadd.f32 %v1939_v4, %v1318_v33 }
 0x19e   : > { %3235 = vst.msk [vmem:[%s5133_s30 + $0x48] sm:$0xff] %vm1527_vm1, %v3081_v0  ;;  %v3006_v51 = vmul.f32 %v2852_v15, %v5759_v21  ;;  %3160 = vst.msk [vmem:[%s3787_s27 + $0x58] sm:$0xff] %vm1527_vm1, %v2852_v15  ;;  %3507 = vrsqrt.f32 %v2627_v48  ;;  %v7440_v35 = vld [vmem:[#allocation10_spill] sm:$0xff]  ;;  %v2324_v17 = vld [vmem:[%s5133_s30 + $0xb0] sm:$0xff]  ;;  %v3500_v31 = vpop.eup %3499  ;;  %v2855_v61 = vmul.f32 %v3498_v44, %v2778_v53  ;;  %v1330_v27 = vpop.xlane.xlu1 %1329 }
 0x19f   : > { %v2552_v56 = vsub.f32 %v2398_v57, %v7440_v35  ;;  %v1942_v37 = vld [vmem:[%s5133_s30 + $0xe0] sm:$0xff]  ;;  %v3084_v14 = vsub.f32 %v2930_v26, %v3007_v10  ;;  %v2630_v40 = vadd.f32 1e-05, %v2553_v25  ;;  %v2401_v8 = vmul.f32 0.0051020407, %v2324_v17  ;;  %v2323_v21 = vld [vmem:[%s5133_s30 + $0xa8] sm:$0xff]  ;;  %v1326_v16 = vpop.xlane.xlu0 %1325 }
 0x1a0   : > { %2094 = vst.msk [vmem:[%s5133_s30 + $0xd0] sm:$0xff] %vm1527_vm1, %v2017_v50  ;;  %v1941_v36 = vld [vmem:[%s5133_s30 + $0xd8] sm:$0xff]  ;;  %v3083_v47 = vsub.f32 %v2929_v6, %v3006_v51  ;;  %v2932_v55 = vld [vmem:[%s6216_s10 + $0x70] sm:$0xff]  ;;  %v2854_v28 = vmul.f32 %v3500_v31, %v2777_v38  ;;  %v2780_v30 = vld [vmem:[%s6179_s7 + $0x80] sm:$0xff]  ;;  %v2400_v32 = vmul.f32 0.0051020407, %v2323_v21  ;;  %v2019_v22 = vadd.f32 %v1942_v37, %v1330_v27 }
 0x1a1   : > { %v2629_v39 = vadd.f32 1e-05, %v2552_v56  ;;  %2093 = vst.msk [vmem:[%s5133_s30 + $0xc8] sm:$0xff] %vm1527_vm1, %v2016_v46  ;;  %3238 = vst.msk [vmem:[%s5133_s30 + $0x60] sm:$0xff] %vm1527_vm1, %v3084_v14  ;;  %v7441_v42 = vld [vmem:[#allocation3_spill] sm:$0xff]  ;;  %v2779_v5 = vld [vmem:[%s6179_s7 + $0x78] sm:$0xff]  ;;  %3509 = vrsqrt.f32 %v2630_v40  ;;  %v2018_v53 = vadd.f32 %v1941_v36, %v1326_v16 }
 0x1a2   : > { %v3009_v29 = vmul.f32 %v2855_v61, %v7441_v42  ;;  %3163 = vst.msk [vmem:[%s3787_s27 + $0x70] sm:$0xff] %vm1527_vm1, %v2855_v61  ;;  %v2931_v63 = vld [vmem:[%s6216_s10 + $0x68] sm:$0xff]  ;;  %v7442_v62 = vld [vmem:[#allocation22_spill] sm:$0xff]  ;;  %v3502_v34 = vpop.eup %3501  ;;  %3237 = vst.msk [vmem:[%s5133_s30 + $0x58] sm:$0xff] %vm1527_vm1, %v3083_v47  ;;  %v1338_v50 = vpop.xlane.xlu1 %1337 }
 0x1a3   : > { %v2555_v9 = vsub.f32 %v2401_v8, %v7442_v62  ;;  %v7443_v43 = vld [vmem:[#allocation2_spill] sm:$0xff]  ;;  %3162 = vst.msk [vmem:[%s3787_s27 + $0x68] sm:$0xff] %vm1527_vm1, %v2854_v28  ;;  %3511 = vrsqrt.f32 %v2629_v39  ;;  %v7444_v0 = vld [vmem:[#allocation9_spill] sm:$0xff]  ;;  %v1944_v48 = vld [vmem:[%s5133_s30 + $0xf0] sm:$0xff]  ;;  %v3504_v57 = vpop.eup %3503  ;;  %v2857_v10 = vmul.f32 %v3502_v34, %v2780_v30  ;;  %v1334_v37 = vpop.xlane.xlu0 %1333 }
 0x1a4   : > { %v3008_v4 = vmul.f32 %v2854_v28, %v7443_v43  ;;  %v2554_v26 = vsub.f32 %v2400_v32, %v7444_v0  ;;  %v2326_v15 = vld [vmem:[%s5133_s30 + $0xc0] sm:$0xff]  ;;  %v3086_v33 = vsub.f32 %v2932_v55, %v3009_v29  ;;  %v2325_v25 = vld [vmem:[%s5133_s30 + $0xb8] sm:$0xff]  ;;  %2096 = vst.msk [vmem:[%s5133_s30 + $0xe0] sm:$0xff] %vm1527_vm1, %v2019_v22  ;;  %v1943_v44 = vld [vmem:[%s5133_s30 + $0xe8] sm:$0xff]  ;;  %v2856_v56 = vmul.f32 %v3504_v57, %v2779_v5 }
 0x1a5   : > { %v2632_v6 = vadd.f32 1e-05, %v2555_v9  ;;  %v2403_v38 = vmul.f32 0.0051020407, %v2326_v15  ;;  %v2934_v35 = vld [vmem:[%s6216_s10 + $0x80] sm:$0xff]  ;;  %2095 = vst.msk [vmem:[%s5133_s30 + $0xd8] sm:$0xff] %vm1527_vm1, %v2018_v53  ;;  %v2021_v21 = vadd.f32 %v1944_v48, %v1338_v50  ;;  %v2020_v39 = vadd.f32 %v1943_v44, %v1334_v37 }
 0x1a6   : > { %v3085_v51 = vsub.f32 %v2931_v63, %v3008_v4  ;;  %v2631_v17 = vadd.f32 1e-05, %v2554_v26  ;;  %v2402_v46 = vmul.f32 0.0051020407, %v2325_v25  ;;  %3240 = vst.msk [vmem:[%s5133_s30 + $0x70] sm:$0xff] %vm1527_vm1, %v3086_v33  ;;  %v7445_v31 = vld [vmem:[#allocation15_spill] sm:$0xff]  ;;  %v1346_v5 = vpop.xlane.xlu1 %1345  ;;  %v6466_v9 = vmul.f32 %v6238_v1, %v6238_v1 }
 0x1a7   : > { %v3011_v14 = vmul.f32 %v2857_v10, %v7445_v31  ;;  %3165 = vst.msk [vmem:[%s3787_s27 + $0x80] sm:$0xff] %vm1527_vm1, %v2857_v10  ;;  %v2933_v61 = vld [vmem:[%s6216_s10 + $0x78] sm:$0xff]  ;;  %v2782_v40 = vld [vmem:[%s6179_s7 + $0x90] sm:$0xff]  ;;  %3513 = vrsqrt.f32 %v2632_v6  ;;  %v2557_v8 = vsub.f32 %v2403_v38, %v5939_v49  ;;  %3164 = vst.msk [vmem:[%s3787_s27 + $0x78] sm:$0xff] %vm1527_vm1, %v2856_v56  ;;  %v3506_v16 = vpop.eup %3505  ;;  %v1342_v26 = vpop.xlane.xlu0 %1341 }
 0x1a8   : > { %3239 = vst.msk [vmem:[%s5133_s30 + $0x68] sm:$0xff] %vm1527_vm1, %v3085_v51  ;;  %v7446_v27 = vld [vmem:[#allocation13_spill] sm:$0xff]  ;;  %v2781_v47 = vld [vmem:[%s6179_s7 + $0x88] sm:$0xff]  ;;  %3515 = vrsqrt.f32 %v2631_v17  ;;  %v2328_v30 = vld [vmem:[%s5133_s30 + $0xd0] sm:$0xff]  ;;  %v3508_v22 = vpop.eup %3507  ;;  %v2859_v43 = vmul.f32 %v3506_v16, %v2782_v40  ;;  %v6493_v40 = vmul.f32 %v6243_v60, %v6243_v60 }
 0x1a9   : > { %v3010_v36 = vmul.f32 %v2856_v56, %v7446_v27  ;;  %v7447_v55 = vld [vmem:[#allocation19_spill] sm:$0xff]  ;;  %v1946_v32 = vld [vmem:[%s5133_s30 + $0x100] sm:$0xff]  ;;  %v3088_v49 = vsub.f32 %v2934_v35, %v3011_v14  ;;  %v2634_v42 = vadd.f32 1e-05, %v2557_v8  ;;  %v2405_v29 = vmul.f32 0.0051020407, %v2328_v30 }
 0x1aa   : > { %v2556_v28 = vsub.f32 %v2402_v46, %v7447_v55  ;;  %v2327_v63 = vld [vmem:[%s5133_s30 + $0xc8] sm:$0xff]  ;;  %2098 = vst.msk [vmem:[%s5133_s30 + $0xf0] sm:$0xff] %vm1527_vm1, %v2021_v21  ;;  %v1945_v62 = vld [vmem:[%s5133_s30 + $0xf8] sm:$0xff]  ;;  %2097 = vst.msk [vmem:[%s5133_s30 + $0xe8] sm:$0xff] %vm1527_vm1, %v2020_v39  ;;  %v2858_v53 = vmul.f32 %v3508_v22, %v2781_v47  ;;  %v2023_v33 = vadd.f32 %v1946_v32, %v1346_v5 }
 0x1ab   : > { %v3087_v34 = vsub.f32 %v2933_v61, %v3010_v36  ;;  %v2404_v0 = vmul.f32 0.0051020407, %v2327_v63  ;;  %3242 = vst.msk [vmem:[%s5133_s30 + $0x80] sm:$0xff] %vm1527_vm1, %v3088_v49  ;;  %v2936_v15 = vld [vmem:[%s6216_s10 + $0x90] sm:$0xff]  ;;  %v2784_v48 = vld [vmem:[%s6179_s7 + $0xa0] sm:$0xff]  ;;  %3517 = vrsqrt.f32 %v2634_v42  ;;  %v2559_v57 = vsub.f32 %v2405_v29, %v5953_v3  ;;  %v7448_v10 = vld [vmem:[#allocation17_spill] sm:$0xff]  ;;  %v3510_v56 = vpop.eup %3509  ;;  %v1354_v61 = vpop.xlane.xlu1 %1353 }
 0x1ac   : > { %v2633_v4 = vadd.f32 1e-05, %v2556_v28  ;;  %v3013_v6 = vmul.f32 %v2859_v43, %v7448_v10  ;;  %3167 = vst.msk [vmem:[%s3787_s27 + $0x90] sm:$0xff] %vm1527_vm1, %v2859_v43  ;;  %v2935_v38 = vld [vmem:[%s6216_s10 + $0x88] sm:$0xff]  ;;  %v2783_v25 = vld [vmem:[%s6179_s7 + $0x98] sm:$0xff]  ;;  %v2330_v51 = vld [vmem:[%s5133_s30 + $0xe0] sm:$0xff]  ;;  %v2022_v35 = vadd.f32 %v1945_v62, %v1342_v26  ;;  %v2861_v27 = vmul.f32 %v3510_v56, %v2784_v48  ;;  %v1350_v28 = vpop.xlane.xlu0 %1349 }
 0x1ad   : > { %3241 = vst.msk [vmem:[%s5133_s30 + $0x78] sm:$0xff] %vm1527_vm1, %v3087_v34  ;;  %v7449_v50 = vld [vmem:[#allocation23_spill] sm:$0xff]  ;;  %v7450_v3 = vld [vmem:[#allocation14_spill] sm:$0xff]  ;;  %3166 = vst.msk [vmem:[%s3787_s27 + $0x88] sm:$0xff] %vm1527_vm1, %v2858_v53  ;;  %v2636_v46 = vadd.f32 1e-05, %v2559_v57  ;;  %v3512_v8 = vpop.eup %3511 }
 0x1ae   : > { %3519 = vrsqrt.f32 %v2633_v4  ;;  %v2558_v44 = vsub.f32 %v2404_v0, %v7449_v50  ;;  %v3012_v17 = vmul.f32 %v2858_v53, %v7450_v3  ;;  %v2407_v37 = vmul.f32 0.0051020407, %v2330_v51  ;;  %v2329_v31 = vld [vmem:[%s5133_s30 + $0xd8] sm:$0xff]  ;;  %2100 = vst.msk [vmem:[%s5133_s30 + $0x100] sm:$0xff] %vm1527_vm1, %v2023_v33  ;;  %v1948_v14 = vld [vmem:[%s5133_s30 + $0x110] sm:$0xff]  ;;  %2099 = vst.msk [vmem:[%s5133_s30 + $0xf8] sm:$0xff] %vm1527_vm1, %v2022_v35 }
 0x1af   : > { %v3090_v21 = vsub.f32 %v2936_v15, %v3013_v6  ;;  %v2406_v47 = vmul.f32 0.0051020407, %v2329_v31  ;;  %v1947_v55 = vld [vmem:[%s5133_s30 + $0x108] sm:$0xff]  ;;  %v2938_v39 = vld [vmem:[%s6216_s10 + $0xa0] sm:$0xff]  ;;  %v2860_v32 = vmul.f32 %v3512_v8, %v2783_v25  ;;  %v2786_v16 = vld [vmem:[%s6179_s7 + $0xb0] sm:$0xff]  ;;  %3521 = vrsqrt.f32 %v2636_v46  ;;  %3169 = vst.msk [vmem:[%s3787_s27 + $0xa0] sm:$0xff] %vm1527_vm1, %v2861_v27  ;;  %v1362_v6 = vpop.xlane.xlu1 %1361 }
 0x1b0   : > { %v2635_v36 = vadd.f32 1e-05, %v2558_v44  ;;  %v3089_v30 = vsub.f32 %v2935_v38, %v3012_v17  ;;  %v7451_v49 = vld [vmem:[#allocation30_spill] sm:$0xff]  ;;  %v7452_v29 = vld [vmem:[#allocation4_spill] sm:$0xff]  ;;  %v2937_v5 = vld [vmem:[%s6216_s10 + $0x98] sm:$0xff]  ;;  %v2025_v4 = vadd.f32 %v1948_v14, %v1354_v61  ;;  %v2024_v33 = vadd.f32 %v1947_v55, %v1350_v28  ;;  %v1358_v56 = vpop.xlane.xlu0 %1357 }
 0x1b1   : > { %v2561_v42 = vsub.f32 %v2407_v37, %v7451_v49  ;;  %3244 = vst.msk [vmem:[%s5133_s30 + $0x90] sm:$0xff] %vm1527_vm1, %v3090_v21  ;;  %v3015_v63 = vmul.f32 %v2861_v27, %v7452_v29  ;;  %v2785_v62 = vld [vmem:[%s6179_s7 + $0xa8] sm:$0xff]  ;;  %v2332_v43 = vld [vmem:[%s5133_s30 + $0xf0] sm:$0xff]  ;;  %v3514_v0 = vpop.eup %3513  ;;  %3168 = vst.msk [vmem:[%s3787_s27 + $0x98] sm:$0xff] %vm1527_vm1, %v2860_v32 }
 0x1b2   : > { %3523 = vrsqrt.f32 %v2635_v36  ;;  %v7453_v22 = vld [vmem:[#allocation27_spill] sm:$0xff]  ;;  %3243 = vst.msk [vmem:[%s5133_s30 + $0x88] sm:$0xff] %vm1527_vm1, %v3089_v30  ;;  %v7454_v26 = vld [vmem:[#allocation16_spill] sm:$0xff]  ;;  %v2409_v48 = vmul.f32 0.0051020407, %v2332_v43  ;;  %v1950_v10 = vld [vmem:[%s5133_s30 + $0x120] sm:$0xff]  ;;  %v3516_v38 = vpop.eup %3515  ;;  %v2863_v50 = vmul.f32 %v3514_v0, %v2786_v16 }
 0x1b3   : > { %v2560_v34 = vsub.f32 %v2406_v47, %v7453_v22  ;;  %v3014_v15 = vmul.f32 %v2860_v32, %v7454_v26  ;;  %v2638_v53 = vadd.f32 1e-05, %v2561_v42  ;;  %v2331_v57 = vld [vmem:[%s5133_s30 + $0xe8] sm:$0xff]  ;;  %v3092_v25 = vsub.f32 %v2938_v39, %v3015_v63  ;;  %2102 = vst.msk [vmem:[%s5133_s30 + $0x110] sm:$0xff] %vm1527_vm1, %v2025_v4  ;;  %v1949_v35 = vld [vmem:[%s5133_s30 + $0x118] sm:$0xff]  ;;  %v2940_v17 = vld [vmem:[%s6216_s10 + $0xb0] sm:$0xff]  ;;  %v1370_v29 = vpop.xlane.xlu1 %1369 }
 0x1b4   : > { %v2408_v51 = vmul.f32 0.0051020407, %v2331_v57  ;;  %v2862_v46 = vmul.f32 %v3516_v38, %v2785_v62  ;;  %v2788_v37 = vld [vmem:[%s6179_s7 + $0xc0] sm:$0xff]  ;;  %v2563_v31 = vsub.f32 %v2409_v48, %v5995_v23  ;;  %2101 = vst.msk [vmem:[%s5133_s30 + $0x108] sm:$0xff] %vm1527_vm1, %v2024_v33  ;;  %v7455_v14 = vld [vmem:[#allocation5_spill] sm:$0xff]  ;;  %3171 = vst.msk [vmem:[%s3787_s27 + $0xb0] sm:$0xff] %vm1527_vm1, %v2863_v50  ;;  %v2027_v55 = vadd.f32 %v1950_v10, %v1362_v6  ;;  %v1366_v4 = vpop.xlane.xlu0 %1365 }
 0x1b5   : > { %v2637_v44 = vadd.f32 1e-05, %v2560_v34  ;;  %v3091_v3 = vsub.f32 %v2937_v5, %v3014_v15  ;;  %3525 = vrsqrt.f32 %v2638_v53  ;;  %3246 = vst.msk [vmem:[%s5133_s30 + $0xa0] sm:$0xff] %vm1527_vm1, %v3092_v25  ;;  %v3017_v61 = vmul.f32 %v2863_v50, %v7455_v14  ;;  %v2939_v8 = vld [vmem:[%s6216_s10 + $0xa8] sm:$0xff]  ;;  %v2787_v21 = vld [vmem:[%s6179_s7 + $0xb8] sm:$0xff]  ;;  %v2334_v47 = vld [vmem:[%s5133_s30 + $0x100] sm:$0xff]  ;;  %v3518_v28 = vpop.eup %3517 }
 0x1b6   : > { %v7456_v27 = vld [vmem:[#allocation31_spill] sm:$0xff]  ;;  %v7457_v23 = vld [vmem:[#allocation18_spill] sm:$0xff]  ;;  %3170 = vst.msk [vmem:[%s3787_s27 + $0xa8] sm:$0xff] %vm1527_vm1, %v2862_v46  ;;  %v2640_v39 = vadd.f32 1e-05, %v2563_v31  ;;  %v2333_v16 = vld [vmem:[%s5133_s30 + $0xf8] sm:$0xff]  ;;  %v2026_v49 = vadd.f32 %v1949_v35, %v1358_v56  ;;  %v2865_v62 = vmul.f32 %v3518_v28, %v2788_v37  ;;  %v6567_v31 = vmul.f32 %v6360_v19, %v6360_v19 }
 0x1b7   : > { %3527 = vrsqrt.f32 %v2637_v44  ;;  %v2562_v36 = vsub.f32 %v2408_v51, %v7456_v27  ;;  %3245 = vst.msk [vmem:[%s5133_s30 + $0x98] sm:$0xff] %vm1527_vm1, %v3091_v3  ;;  %v3016_v30 = vmul.f32 %v2862_v46, %v7457_v23  ;;  %v2411_v32 = vmul.f32 0.0051020407, %v2334_v47  ;;  %v1952_v42 = vld [vmem:[%s5133_s30 + $0x130] sm:$0xff]  ;;  %2104 = vst.msk [vmem:[%s5133_s30 + $0x120] sm:$0xff] %vm1527_vm1, %v2027_v55  ;;  %v1951_v43 = vld [vmem:[%s5133_s30 + $0x128] sm:$0xff]  ;;  %v1378_v46 = vpop.xlane.xlu1 %1377 }
 0x1b8   : > { %v3520_v63 = vpop.eup %3519  ;;  %v3094_v5 = vsub.f32 %v2940_v17, %v3017_v61  ;;  %v2410_v34 = vmul.f32 0.0051020407, %v2333_v16  ;;  %v2942_v26 = vld [vmem:[%s6216_s10 + $0xc0] sm:$0xff]  ;;  %v2790_v53 = vld [vmem:[%s6179_s7 + $0xd0] sm:$0xff]  ;;  %3529 = vrsqrt.f32 %v2640_v39  ;;  %2103 = vst.msk [vmem:[%s5133_s30 + $0x118] sm:$0xff] %vm1527_vm1, %v2026_v49  ;;  %3173 = vst.msk [vmem:[%s3787_s27 + $0xc0] sm:$0xff] %vm1527_vm1, %v2865_v62  ;;  %v2029_v50 = vadd.f32 %v1952_v42, %v1370_v29  ;;  %v1374_v47 = vpop.xlane.xlu0 %1373 }
 0x1b9   : > { %v2639_v22 = vadd.f32 1e-05, %v2562_v36  ;;  %v3093_v0 = vsub.f32 %v2939_v8, %v3016_v30  ;;  %v2864_v15 = vmul.f32 %v3520_v63, %v2787_v21  ;;  %v2565_v48 = vsub.f32 %v2411_v32, %v6009_v24  ;;  %v7458_v57 = vld [vmem:[#allocation8_spill] sm:$0xff]  ;;  %v2941_v10 = vld [vmem:[%s6216_s10 + $0xb8] sm:$0xff]  ;;  %v2789_v6 = vld [vmem:[%s6179_s7 + $0xc8] sm:$0xff]  ;;  %v3522_v44 = vpop.eup %3521 }
 0x1ba   : > { %3248 = vst.msk [vmem:[%s5133_s30 + $0xb0] sm:$0xff] %vm1527_vm1, %v3094_v5  ;;  %v3019_v33 = vmul.f32 %v2865_v62, %v7458_v57  ;;  %v7459_v38 = vld [vmem:[#allocation34_spill] sm:$0xff]  ;;  %v7460_v24 = vld [vmem:[#allocation7_spill] sm:$0xff]  ;;  %v2336_v56 = vld [vmem:[%s5133_s30 + $0x110] sm:$0xff]  ;;  %v2028_v3 = vadd.f32 %v1951_v43, %v1366_v4  ;;  %v2867_v8 = vmul.f32 %v3522_v44, %v2790_v53 }
 0x1bb   : > { %3531 = vrsqrt.f32 %v2639_v22  ;;  %v2564_v25 = vsub.f32 %v2410_v34, %v7459_v38  ;;  %3247 = vst.msk [vmem:[%s5133_s30 + $0xa8] sm:$0xff] %vm1527_vm1, %v3093_v0  ;;  %v3018_v51 = vmul.f32 %v2864_v15, %v7460_v24  ;;  %3172 = vst.msk [vmem:[%s3787_s27 + $0xb8] sm:$0xff] %vm1527_vm1, %v2864_v15  ;;  %v2642_v35 = vadd.f32 1e-05, %v2565_v48  ;;  %v1954_v17 = vld [vmem:[%s5133_s30 + $0x140] sm:$0xff]  ;;  %v1953_v37 = vld [vmem:[%s5133_s30 + $0x138] sm:$0xff]  ;;  %v1386_v48 = vpop.xlane.xlu1 %1385 }
 0x1bc   : > { %v3524_v14 = vpop.eup %3523  ;;  %v3096_v61 = vsub.f32 %v2942_v26, %v3019_v33  ;;  %v2413_v27 = vmul.f32 0.0051020407, %v2336_v56  ;;  %v2335_v36 = vld [vmem:[%s5133_s30 + $0x108] sm:$0xff]  ;;  %2106 = vst.msk [vmem:[%s5133_s30 + $0x130] sm:$0xff] %vm1527_vm1, %v2029_v50  ;;  %v2214_v55 = vld [vmem:[%s3787_s27 + $0x210] sm:$0xff]  ;;  %v2792_v39 = vld [vmem:[%s6179_s7 + $0xe0] sm:$0xff]  ;;  %v2031_v62 = vadd.f32 %v1954_v17, %v1378_v46  ;;  %v2030_v15 = vadd.f32 %v1953_v37, %v1374_v47  ;;  %v1382_v24 = vpop.xlane.xlu0 %1381 }
 0x1bd   : > { %v2641_v21 = vadd.f32 1e-05, %v2564_v25  ;;  %v3095_v28 = vsub.f32 %v2941_v10, %v3018_v51  ;;  %v2944_v23 = vld [vmem:[%s6216_s10 + $0xd0] sm:$0xff]  ;;  %v2866_v30 = vmul.f32 %v3524_v14, %v2789_v6  ;;  %3533 = vrsqrt.f32 %v2642_v35  ;;  %2105 = vst.msk [vmem:[%s5133_s30 + $0x128] sm:$0xff] %vm1527_vm1, %v2028_v3  ;;  %3175 = vst.msk [vmem:[%s3787_s27 + $0xd0] sm:$0xff] %vm1527_vm1, %v2867_v8  ;;  %v2943_v42 = vld [vmem:[%s6216_s10 + $0xc8] sm:$0xff] }
 0x1be   : > { %v2412_v32 = vmul.f32 0.0051020407, %v2335_v36  ;;  %3250 = vst.msk [vmem:[%s5133_s30 + $0xc0] sm:$0xff] %vm1527_vm1, %v3096_v61  ;;  %v7461_v16 = vld [vmem:[#allocation12_spill] sm:$0xff]  ;;  %v2791_v29 = vld [vmem:[%s6179_s7 + $0xd8] sm:$0xff]  ;;  %v7462_v63 = vld [vmem:[#allocation42_spill] sm:$0xff] }
 0x1bf   : > { %v3021_v49 = vmul.f32 %v2867_v8, %v7461_v16  ;;  %3535 = vrsqrt.f32 %v2641_v21  ;;  %v2567_v5 = vsub.f32 %v2413_v27, %v7462_v63  ;;  %v3526_v22 = vpop.eup %3525  ;;  %3249 = vst.msk [vmem:[%s5133_s30 + $0xb8] sm:$0xff] %vm1527_vm1, %v3095_v28  ;;  %v7463_v34 = vld [vmem:[#allocation6_spill] sm:$0xff]  ;;  %3174 = vst.msk [vmem:[%s3787_s27 + $0xc8] sm:$0xff] %vm1527_vm1, %v2866_v30  ;;  %v7464_v4 = vld [vmem:[#allocation37_spill] sm:$0xff]  ;;  %v6593_v57 = vmul.f32 0.0051020407, %v2214_v55 }
 0x1c0   : > { %v3020_v43 = vmul.f32 %v2866_v30, %v7463_v34  ;;  %v2566_v0 = vsub.f32 %v2412_v32, %v7464_v4  ;;  %v2338_v26 = vld [vmem:[%s5133_s30 + $0x120] sm:$0xff]  ;;  %v1956_v53 = vld [vmem:[%s5133_s30 + $0x150] sm:$0xff]  ;;  %v2869_v6 = vmul.f32 %v3526_v22, %v2792_v39  ;;  %v2337_v50 = vld [vmem:[%s5133_s30 + $0x118] sm:$0xff]  ;;  %2108 = vst.msk [vmem:[%s5133_s30 + $0x140] sm:$0xff] %vm1527_vm1, %v2031_v62 }
 0x1c1   : > { %v3528_v33 = vpop.eup %3527  ;;  %v3098_v10 = vsub.f32 %v2944_v23, %v3021_v49  ;;  %v2644_v38 = vadd.f32 1e-05, %v2567_v5  ;;  %v2415_v25 = vmul.f32 0.0051020407, %v2338_v26  ;;  %v1955_v44 = vld [vmem:[%s5133_s30 + $0x148] sm:$0xff]  ;;  %v2946_v35 = vld [vmem:[%s6216_s10 + $0xe0] sm:$0xff]  ;;  %v2033_v36 = vadd.f32 %v1956_v53, %v1386_v48  ;;  %v1394_v49 = vpop.xlane.xlu1 %1393 }
 0x1c2   : > { %v3097_v51 = vsub.f32 %v2943_v42, %v3020_v43  ;;  %v2868_v56 = vmul.f32 %v3528_v33, %v2791_v29  ;;  %v2794_v3 = vld [vmem:[%s6179_s7 + $0xf0] sm:$0xff]  ;;  %v2643_v17 = vadd.f32 1e-05, %v2566_v0  ;;  %v2414_v46 = vmul.f32 0.0051020407, %v2337_v50  ;;  %2107 = vst.msk [vmem:[%s5133_s30 + $0x138] sm:$0xff] %vm1527_vm1, %v2030_v15  ;;  %v3530_v47 = vpop.eup %3529  ;;  %v1390_v43 = vpop.xlane.xlu0 %1389 }
 0x1c3   : > { %3252 = vst.msk [vmem:[%s5133_s30 + $0xd0] sm:$0xff] %vm1527_vm1, %v3098_v10  ;;  %v7465_v37 = vld [vmem:[#allocation20_spill] sm:$0xff]  ;;  %3177 = vst.msk [vmem:[%s3787_s27 + $0xe0] sm:$0xff] %vm1527_vm1, %v2869_v6  ;;  %v2945_v61 = vld [vmem:[%s6216_s10 + $0xd8] sm:$0xff]  ;;  %3537 = vrsqrt.f32 %v2644_v38  ;;  %v2032_v32 = vadd.f32 %v1955_v44, %v1382_v24  ;;  %v2871_v63 = vmul.f32 %v3530_v47, %v2794_v3 }
 0x1c4   : > { %v3023_v14 = vmul.f32 %v2869_v6, %v7465_v37  ;;  %v2793_v8 = vld [vmem:[%s6179_s7 + $0xe8] sm:$0xff]  ;;  %v7466_v21 = vld [vmem:[#allocation46_spill] sm:$0xff]  ;;  %3251 = vst.msk [vmem:[%s5133_s30 + $0xc8] sm:$0xff] %vm1527_vm1, %v3097_v51  ;;  %3176 = vst.msk [vmem:[%s3787_s27 + $0xd8] sm:$0xff] %vm1527_vm1, %v2868_v56  ;;  %3539 = vrsqrt.f32 %v2643_v17 }
 0x1c5   : > { %v2569_v27 = vsub.f32 %v2415_v25, %v7466_v21  ;;  %v7467_v55 = vld [vmem:[#allocation11_spill] sm:$0xff]  ;;  %v2340_v39 = vld [vmem:[%s5133_s30 + $0x130] sm:$0xff]  ;;  %v1958_v16 = vld [vmem:[%s5133_s30 + $0x160] sm:$0xff]  ;;  %v3532_v42 = vpop.eup %3531  ;;  %2110 = vst.msk [vmem:[%s5133_s30 + $0x150] sm:$0xff] %vm1527_vm1, %v2033_v36 }
 0x1c6   : > { %v3022_v28 = vmul.f32 %v2868_v56, %v7467_v55  ;;  %v7468_v23 = vld [vmem:[#allocation39_spill] sm:$0xff]  ;;  %v3100_v29 = vsub.f32 %v2946_v35, %v3023_v14  ;;  %v2417_v62 = vmul.f32 0.0051020407, %v2340_v39  ;;  %v1957_v34 = vld [vmem:[%s5133_s30 + $0x158] sm:$0xff]  ;;  %v2948_v0 = vld [vmem:[%s6216_s10 + $0xf0] sm:$0xff]  ;;  %v2870_v26 = vmul.f32 %v3532_v42, %v2793_v8  ;;  %2109 = vst.msk [vmem:[%s5133_s30 + $0x148] sm:$0xff] %vm1527_vm1, %v2032_v32  ;;  %v1398_v47 = vpop.xlane.xlu0 %1397 }
 0x1c7   : > { %v2568_v30 = vsub.f32 %v2414_v46, %v7468_v23  ;;  %v2646_v5 = vadd.f32 1e-05, %v2569_v27  ;;  %v2339_v22 = vld [vmem:[%s5133_s30 + $0x128] sm:$0xff]  ;;  %v2796_v15 = vld [vmem:[%s6179_s7 + $0x100] sm:$0xff]  ;;  %v7469_v33 = vld [vmem:[#allocation25_spill] sm:$0xff]  ;;  %3179 = vst.msk [vmem:[%s3787_s27 + $0xf0] sm:$0xff] %vm1527_vm1, %v2871_v63  ;;  %v2035_v50 = vadd.f32 %v1958_v16, %v1394_v49  ;;  %v3534_v44 = vpop.eup %3533  ;;  %v2034_v17 = vadd.f32 %v1957_v34, %v1390_v43 }
 0x1c8   : > { %v3099_v4 = vsub.f32 %v2945_v61, %v3022_v28  ;;  %v2416_v48 = vmul.f32 0.0051020407, %v2339_v22  ;;  %3254 = vst.msk [vmem:[%s5133_s30 + $0xe0] sm:$0xff] %vm1527_vm1, %v3100_v29  ;;  %v3025_v10 = vmul.f32 %v2871_v63, %v7469_v33  ;;  %v2947_v6 = vld [vmem:[%s6216_s10 + $0xe8] sm:$0xff]  ;;  %v2795_v38 = vld [vmem:[%s6179_s7 + $0xf8] sm:$0xff]  ;;  %v2571_v25 = vsub.f32 %v2417_v62, %v6054_v52  ;;  %3178 = vst.msk [vmem:[%s3787_s27 + $0xe8] sm:$0xff] %vm1527_vm1, %v2870_v26  ;;  %v1402_v52 = vpop.xlane.xlu1 %1401 }
 0x1c9   : > { %v2645_v53 = vadd.f32 1e-05, %v2568_v30  ;;  %3541 = vrsqrt.f32 %v2646_v5  ;;  %v7470_v24 = vld [vmem:[#allocation21_spill] sm:$0xff]  ;;  %v7471_v35 = vld [vmem:[#allocation43_spill] sm:$0xff]  ;;  %v2342_v3 = vld [vmem:[%s5133_s30 + $0x140] sm:$0xff]  ;;  %v3536_v37 = vpop.eup %3535  ;;  %v2873_v61 = vmul.f32 %v3534_v44, %v2796_v15  ;;  %2112 = vst.msk [vmem:[%s5133_s30 + $0x160] sm:$0xff] %vm1527_vm1, %v2035_v50 }
 0x1ca   : > { %3253 = vst.msk [vmem:[%s5133_s30 + $0xd8] sm:$0xff] %vm1527_vm1, %v3099_v4  ;;  %v3024_v51 = vmul.f32 %v2870_v26, %v7470_v24  ;;  %v2570_v56 = vsub.f32 %v2416_v48, %v7471_v35  ;;  %v1960_v46 = vld [vmem:[%s5133_s30 + $0x170] sm:$0xff]  ;;  %v3102_v14 = vsub.f32 %v2948_v0, %v3025_v10  ;;  %v2648_v8 = vadd.f32 1e-05, %v2571_v25  ;;  %v2341_v27 = vld [vmem:[%s5133_s30 + $0x138] sm:$0xff]  ;;  %v1959_v36 = vld [vmem:[%s5133_s30 + $0x168] sm:$0xff]  ;;  %v1406_v25 = vpop.xlane.xlu0 %1405 }
 0x1cb   : > { %3543 = vrsqrt.f32 %v2645_v53  ;;  %v2419_v21 = vmul.f32 0.0051020407, %v2342_v3  ;;  %v2950_v28 = vld [vmem:[%s6216_s10 + $0x100] sm:$0xff]  ;;  %v2872_v23 = vmul.f32 %v3536_v37, %v2795_v38  ;;  %v2418_v39 = vmul.f32 0.0051020407, %v2341_v27  ;;  %2111 = vst.msk [vmem:[%s5133_s30 + $0x158] sm:$0xff] %vm1527_vm1, %v2034_v17 }
 0x1cc   : > { %v3101_v55 = vsub.f32 %v2947_v6, %v3024_v51  ;;  %v2647_v30 = vadd.f32 1e-05, %v2570_v56  ;;  %v1962_v32 = vld [vmem:[%s5133_s30 + $0x180] sm:$0xff]  ;;  %3256 = vst.msk [vmem:[%s5133_s30 + $0xf0] sm:$0xff] %vm1527_vm1, %v3102_v14  ;;  %v7472_v16 = vld [vmem:[#allocation28_spill] sm:$0xff]  ;;  %3181 = vst.msk [vmem:[%s3787_s27 + $0x100] sm:$0xff] %vm1527_vm1, %v2873_v61  ;;  %3545 = vrsqrt.f32 %v2648_v8  ;;  %v2037_v5 = vadd.f32 %v1960_v46, %v1402_v52  ;;  %v1410_v15 = vpop.xlane.xlu1 %1409 }
 0x1cd   : > { %v3027_v49 = vmul.f32 %v2873_v61, %v7472_v16  ;;  %v2949_v42 = vld [vmem:[%s6216_s10 + $0xf8] sm:$0xff]  ;;  %v2798_v29 = vld [vmem:[%s6179_s7 + $0x110] sm:$0xff]  ;;  %v2573_v63 = vsub.f32 %v2419_v21, %v6066_v54  ;;  %3180 = vst.msk [vmem:[%s3787_s27 + $0xf8] sm:$0xff] %vm1527_vm1, %v2872_v23  ;;  %v2797_v34 = vld [vmem:[%s6179_s7 + $0x108] sm:$0xff]  ;;  %v2036_v26 = vadd.f32 %v1959_v36, %v1398_v47  ;;  %v3538_v54 = vpop.eup %3537  ;;  %v2039_v38 = vadd.f32 %v1962_v32, %v1410_v15 }
 0x1ce   : > { %3255 = vst.msk [vmem:[%s5133_s30 + $0xe8] sm:$0xff] %vm1527_vm1, %v3101_v55  ;;  %v7473_v62 = vld [vmem:[#allocation24_spill] sm:$0xff]  ;;  %3547 = vrsqrt.f32 %v2647_v30  ;;  %v7474_v43 = vld [vmem:[#allocation47_spill] sm:$0xff]  ;;  %v1961_v53 = vld [vmem:[%s5133_s30 + $0x178] sm:$0xff]  ;;  %v3540_v44 = vpop.eup %3539  ;;  %v2875_v51 = vmul.f32 %v3538_v54, %v2798_v29 }
 0x1cf   : > { %v3026_v22 = vmul.f32 %v2872_v23, %v7473_v62  ;;  %v2572_v4 = vsub.f32 %v2418_v39, %v7474_v43  ;;  %v2344_v0 = vld [vmem:[%s5133_s30 + $0x150] sm:$0xff]  ;;  %v3104_v48 = vsub.f32 %v2950_v28, %v3027_v49  ;;  %v2650_v33 = vadd.f32 1e-05, %v2573_v63  ;;  %v2343_v6 = vld [vmem:[%s5133_s30 + $0x148] sm:$0xff]  ;;  %2114 = vst.msk [vmem:[%s5133_s30 + $0x170] sm:$0xff] %vm1527_vm1, %v2037_v5  ;;  %v2215_v50 = vld [vmem:[%s3787_s27 + $0x218] sm:$0xff]  ;;  %v1414_v62 = vpop.xlane.xlu0 %1413 }
 0x1d0   : > { %v2421_v10 = vmul.f32 0.0051020407, %v2344_v0  ;;  %v2420_v56 = vmul.f32 0.0051020407, %v2343_v6  ;;  %2113 = vst.msk [vmem:[%s5133_s30 + $0x168] sm:$0xff] %vm1527_vm1, %v2036_v26  ;;  %v1964_v3 = vld [vmem:[%s5133_s30 + $0x190] sm:$0xff]  ;;  %v2874_v46 = vmul.f32 %v3540_v44, %v2797_v34  ;;  %v2038_v61 = vadd.f32 %v1961_v53, %v1406_v25  ;;  %v1418_v23 = vpop.xlane.xlu1 %1417 }
 0x1d1   : > { %v3103_v24 = vsub.f32 %v2949_v42, %v3026_v22  ;;  %v2649_v35 = vadd.f32 1e-05, %v2572_v4  ;;  %3258 = vst.msk [vmem:[%s5133_s30 + $0x100] sm:$0xff] %vm1527_vm1, %v3104_v48  ;;  %v2952_v17 = vld [vmem:[%s6216_s10 + $0x110] sm:$0xff]  ;;  %v2800_v52 = vld [vmem:[%s6179_s7 + $0x120] sm:$0xff]  ;;  %3549 = vrsqrt.f32 %v2650_v33  ;;  %v7475_v37 = vld [vmem:[#allocation53_spill] sm:$0xff]  ;;  %v2041_v63 = vadd.f32 %v1964_v3, %v1418_v23 }
 0x1d2   : > { %v2575_v14 = vsub.f32 %v2421_v10, %v7475_v37  ;;  %2116 = vst.msk [vmem:[%s5133_s30 + $0x180] sm:$0xff] %vm1527_vm1, %v2039_v38  ;;  %v7476_v8 = vld [vmem:[#allocation32_spill] sm:$0xff]  ;;  %3183 = vst.msk [vmem:[%s3787_s27 + $0x110] sm:$0xff] %vm1527_vm1, %v2875_v51  ;;  %v2951_v27 = vld [vmem:[%s6216_s10 + $0x108] sm:$0xff]  ;;  %v6691_v30 = vmul.f32 0.0051020407, %v2215_v50 }
 0x1d3   : > { %3257 = vst.msk [vmem:[%s5133_s30 + $0xf8] sm:$0xff] %vm1527_vm1, %v3103_v24  ;;  %v3029_v21 = vmul.f32 %v2875_v51, %v7476_v8  ;;  %v2799_v36 = vld [vmem:[%s6179_s7 + $0x118] sm:$0xff]  ;;  %3551 = vrsqrt.f32 %v2649_v35  ;;  %v7477_v47 = vld [vmem:[#allocation51_spill] sm:$0xff]  ;;  %v2346_v28 = vld [vmem:[%s5133_s30 + $0x160] sm:$0xff]  ;;  %v3542_v39 = vpop.eup %3541 }
 0x1d4   : > { %v2574_v55 = vsub.f32 %v2420_v56, %v7477_v47  ;;  %v7478_v32 = vld [vmem:[#allocation26_spill] sm:$0xff]  ;;  %3182 = vst.msk [vmem:[%s3787_s27 + $0x108] sm:$0xff] %vm1527_vm1, %v2874_v46  ;;  %v2652_v49 = vadd.f32 1e-05, %v2575_v14  ;;  %v2423_v42 = vmul.f32 0.0051020407, %v2346_v28  ;;  %v2877_v43 = vmul.f32 %v3542_v39, %v2800_v52  ;;  %v1426_v35 = vpop.xlane.xlu1 %1425  ;;  %v1422_v14 = vpop.xlane.xlu0 %1421 }
 0x1d5   : > { %v3028_v16 = vmul.f32 %v2874_v46, %v7478_v32  ;;  %v2345_v29 = vld [vmem:[%s5133_s30 + $0x158] sm:$0xff]  ;;  %2115 = vst.msk [vmem:[%s5133_s30 + $0x178] sm:$0xff] %vm1527_vm1, %v2038_v61  ;;  %v1963_v5 = vld [vmem:[%s5133_s30 + $0x188] sm:$0xff]  ;;  %v3544_v22 = vpop.eup %3543  ;;  %v3106_v34 = vsub.f32 %v2952_v17, %v3029_v21  ;;  %v1966_v26 = vld [vmem:[%s5133_s30 + $0x1a0] sm:$0xff] }
 0x1d6   : > { %v2651_v4 = vadd.f32 1e-05, %v2574_v55  ;;  %v2422_v0 = vmul.f32 0.0051020407, %v2345_v29  ;;  %v2954_v53 = vld [vmem:[%s6216_s10 + $0x120] sm:$0xff]  ;;  %v2876_v54 = vmul.f32 %v3544_v22, %v2799_v36  ;;  %v2802_v48 = vld [vmem:[%s6179_s7 + $0x130] sm:$0xff]  ;;  %3553 = vrsqrt.f32 %v2652_v49 }
 0x1d7   : > { %v3105_v15 = vsub.f32 %v2951_v27, %v3028_v16  ;;  %v2577_v33 = vsub.f32 %v2423_v42, %v6104_v45  ;;  %2118 = vst.msk [vmem:[%s5133_s30 + $0x190] sm:$0xff] %vm1527_vm1, %v2041_v63  ;;  %3260 = vst.msk [vmem:[%s5133_s30 + $0x110] sm:$0xff] %vm1527_vm1, %v3106_v34  ;;  %v7479_v10 = vld [vmem:[#allocation35_spill] sm:$0xff]  ;;  %v2953_v38 = vld [vmem:[%s6216_s10 + $0x118] sm:$0xff]  ;;  %v2040_v51 = vadd.f32 %v1963_v5, %v1414_v62  ;;  %v3546_v45 = vpop.eup %3545 }
 0x1d8   : > { %v3031_v6 = vmul.f32 %v2877_v43, %v7479_v10  ;;  %3185 = vst.msk [vmem:[%s3787_s27 + $0x120] sm:$0xff] %vm1527_vm1, %v2877_v43  ;;  %v2801_v25 = vld [vmem:[%s6179_s7 + $0x128] sm:$0xff]  ;;  %3555 = vrsqrt.f32 %v2651_v4  ;;  %v7480_v50 = vld [vmem:[#allocation54_spill] sm:$0xff]  ;;  %v2348_v24 = vld [vmem:[%s5133_s30 + $0x170] sm:$0xff]  ;;  %v2043_v37 = vadd.f32 %v1966_v26, %v1426_v35  ;;  %v3548_v61 = vpop.eup %3547  ;;  %v2879_v21 = vmul.f32 %v3546_v45, %v2802_v48  ;;  %v1434_v34 = vpop.xlane.xlu1 %1433 }
 0x1d9   : > { %v2576_v44 = vsub.f32 %v2422_v0, %v7480_v50  ;;  %3259 = vst.msk [vmem:[%s5133_s30 + $0x108] sm:$0xff] %vm1527_vm1, %v3105_v15  ;;  %v7481_v56 = vld [vmem:[#allocation29_spill] sm:$0xff]  ;;  %3184 = vst.msk [vmem:[%s3787_s27 + $0x118] sm:$0xff] %vm1527_vm1, %v2876_v54  ;;  %v2654_v17 = vadd.f32 1e-05, %v2577_v33  ;;  %v2347_v52 = vld [vmem:[%s5133_s30 + $0x168] sm:$0xff]  ;;  %v2878_v39 = vmul.f32 %v3548_v61, %v2801_v25 }
 0x1da   : > { %v3030_v3 = vmul.f32 %v2876_v54, %v7481_v56  ;;  %v2425_v46 = vmul.f32 0.0051020407, %v2348_v24  ;;  %v3108_v8 = vsub.f32 %v2954_v53, %v3031_v6  ;;  %v2424_v36 = vmul.f32 0.0051020407, %v2347_v52  ;;  %v2350_v47 = vld [vmem:[%s5133_s30 + $0x180] sm:$0xff]  ;;  %2117 = vst.msk [vmem:[%s5133_s30 + $0x188] sm:$0xff] %vm1527_vm1, %v2040_v51 }
 0x1db   : > { %v2653_v27 = vadd.f32 1e-05, %v2576_v44  ;;  %v1965_v55 = vld [vmem:[%s5133_s30 + $0x198] sm:$0xff]  ;;  %v2956_v23 = vld [vmem:[%s6216_s10 + $0x130] sm:$0xff]  ;;  %v2804_v32 = vld [vmem:[%s6179_s7 + $0x140] sm:$0xff]  ;;  %3557 = vrsqrt.f32 %v2654_v17  ;;  %2120 = vst.msk [vmem:[%s5133_s30 + $0x1a0] sm:$0xff] %vm1527_vm1, %v2043_v37 }
 0x1dc   : > { %v3107_v28 = vsub.f32 %v2953_v38, %v3030_v3  ;;  %v2579_v16 = vsub.f32 %v2425_v46, %v6116_v41  ;;  %3262 = vst.msk [vmem:[%s5133_s30 + $0x120] sm:$0xff] %vm1527_vm1, %v3108_v8  ;;  %v7482_v49 = vld [vmem:[#allocation38_spill] sm:$0xff]  ;;  %3187 = vst.msk [vmem:[%s3787_s27 + $0x130] sm:$0xff] %vm1527_vm1, %v2879_v21  ;;  %v2955_v29 = vld [vmem:[%s6216_s10 + $0x128] sm:$0xff]  ;;  %v2578_v5 = vsub.f32 %v2424_v36, %v6096_v11  ;;  %v2427_v62 = vmul.f32 0.0051020407, %v2350_v47  ;;  %v3550_v41 = vpop.eup %3549  ;;  %v1430_v11 = vpop.xlane.xlu0 %1429 }
 0x1dd   : > { %v3033_v42 = vmul.f32 %v2879_v21, %v7482_v49  ;;  %v2803_v63 = vld [vmem:[%s6179_s7 + $0x138] sm:$0xff]  ;;  %3559 = vrsqrt.f32 %v2653_v27  ;;  %3186 = vst.msk [vmem:[%s3787_s27 + $0x128] sm:$0xff] %vm1527_vm1, %v2878_v39  ;;  %v2042_v15 = vadd.f32 %v1965_v55, %v1422_v14  ;;  %v3552_v53 = vpop.eup %3551  ;;  %v2881_v48 = vmul.f32 %v3550_v41, %v2804_v32  ;;  %v1968_v25 = vld [vmem:[%s5133_s30 + $0x1b0] sm:$0xff]  ;;  %v1967_v50 = vld [vmem:[%s5133_s30 + $0x1a8] sm:$0xff]  ;;  %v1442_v61 = vpop.xlane.xlu1 %1441 }
 0x1de   : > { %v2349_v22 = vld [vmem:[%s5133_s30 + $0x178] sm:$0xff]  ;;  %3261 = vst.msk [vmem:[%s5133_s30 + $0x118] sm:$0xff] %vm1527_vm1, %v3107_v28  ;;  %v2656_v0 = vadd.f32 1e-05, %v2579_v16  ;;  %v2655_v33 = vadd.f32 1e-05, %v2578_v5  ;;  %v2880_v51 = vmul.f32 %v3552_v53, %v2803_v63  ;;  %v2045_v55 = vadd.f32 %v1968_v25, %v1434_v34 }
 0x1df   : > { %v7483_v43 = vld [vmem:[#allocation33_spill] sm:$0xff]  ;;  %v2426_v26 = vmul.f32 0.0051020407, %v2349_v22  ;;  %v3110_v54 = vsub.f32 %v2956_v23, %v3033_v42  ;;  %v2352_v38 = vld [vmem:[%s5133_s30 + $0x190] sm:$0xff]  ;;  %v2958_v24 = vld [vmem:[%s6216_s10 + $0x140] sm:$0xff]  ;;  %2119 = vst.msk [vmem:[%s5133_s30 + $0x198] sm:$0xff] %vm1527_vm1, %v2042_v15  ;;  %v2044_v28 = vadd.f32 %v1967_v50, %v1430_v11 }
 0x1e0   : > { %v3032_v4 = vmul.f32 %v2878_v39, %v7483_v43  ;;  %v7484_v10 = vld [vmem:[#allocation61_spill] sm:$0xff]  ;;  %v2806_v35 = vld [vmem:[%s6179_s7 + $0x150] sm:$0xff]  ;;  %3561 = vrsqrt.f32 %v2656_v0  ;;  %3189 = vst.msk [vmem:[%s3787_s27 + $0x140] sm:$0xff] %vm1527_vm1, %v2881_v48  ;;  %v2805_v52 = vld [vmem:[%s6179_s7 + $0x148] sm:$0xff]  ;;  %v2429_v14 = vmul.f32 0.0051020407, %v2352_v38  ;;  %v3554_v8 = vpop.eup %3553  ;;  %v1438_v39 = vpop.xlane.xlu0 %1437 }
 0x1e1   : > { %v2581_v6 = vsub.f32 %v2427_v62, %v7484_v10  ;;  %v7485_v45 = vld [vmem:[#allocation60_spill] sm:$0xff]  ;;  %3264 = vst.msk [vmem:[%s5133_s30 + $0x130] sm:$0xff] %vm1527_vm1, %v3110_v54  ;;  %v2957_v46 = vld [vmem:[%s6216_s10 + $0x138] sm:$0xff]  ;;  %3563 = vrsqrt.f32 %v2655_v33  ;;  %3188 = vst.msk [vmem:[%s3787_s27 + $0x138] sm:$0xff] %vm1527_vm1, %v2880_v51  ;;  %v2883_v49 = vmul.f32 %v3554_v8, %v2806_v35  ;;  %v1450_v54 = vpop.xlane.xlu1 %1449 }
 0x1e2   : > { %v3109_v44 = vsub.f32 %v2955_v29, %v3032_v4  ;;  %v2580_v56 = vsub.f32 %v2426_v26, %v7485_v45  ;;  %v7486_v3 = vld [vmem:[#allocation40_spill] sm:$0xff]  ;;  %v2351_v47 = vld [vmem:[%s5133_s30 + $0x188] sm:$0xff]  ;;  %v1970_v23 = vld [vmem:[%s5133_s30 + $0x1c0] sm:$0xff]  ;;  %v3556_v32 = vpop.eup %3555  ;;  %v2583_v42 = vsub.f32 %v2429_v14, %v6155_v18  ;;  %2122 = vst.msk [vmem:[%s5133_s30 + $0x1b0] sm:$0xff] %vm1527_vm1, %v2045_v55 }
 0x1e3   : > { %v3035_v17 = vmul.f32 %v2881_v48, %v7486_v3  ;;  %v2658_v37 = vadd.f32 1e-05, %v2581_v6  ;;  %v7487_v21 = vld [vmem:[#allocation36_spill] sm:$0xff]  ;;  %v2354_v29 = vld [vmem:[%s5133_s30 + $0x1a0] sm:$0xff]  ;;  %v1969_v63 = vld [vmem:[%s5133_s30 + $0x1b8] sm:$0xff]  ;;  %v2882_v34 = vmul.f32 %v3556_v32, %v2805_v52  ;;  %2121 = vst.msk [vmem:[%s5133_s30 + $0x1a8] sm:$0xff] %vm1527_vm1, %v2044_v28  ;;  %v2047_v53 = vadd.f32 %v1970_v23, %v1442_v61 }
 0x1e4   : > { %3263 = vst.msk [vmem:[%s5133_s30 + $0x128] sm:$0xff] %vm1527_vm1, %v3109_v44  ;;  %v3034_v27 = vmul.f32 %v2880_v51, %v7487_v21  ;;  %v2657_v36 = vadd.f32 1e-05, %v2580_v56  ;;  %v1972_v5 = vld [vmem:[%s5133_s30 + $0x1d0] sm:$0xff]  ;;  %v2808_v41 = vld [vmem:[%s6179_s7 + $0x160] sm:$0xff]  ;;  %3191 = vst.msk [vmem:[%s3787_s27 + $0x150] sm:$0xff] %vm1527_vm1, %v2883_v49  ;;  %v2046_v25 = vadd.f32 %v1969_v63, %v1438_v39 }
 0x1e5   : > { %v3112_v16 = vsub.f32 %v2958_v24, %v3035_v17  ;;  %3565 = vrsqrt.f32 %v2658_v37  ;;  %v2960_v22 = vld [vmem:[%s6216_s10 + $0x150] sm:$0xff]  ;;  %v2428_v43 = vmul.f32 0.0051020407, %v2351_v47  ;;  %v2959_v0 = vld [vmem:[%s6216_s10 + $0x148] sm:$0xff]  ;;  %v2807_v26 = vld [vmem:[%s6179_s7 + $0x158] sm:$0xff]  ;;  %v3558_v48 = vpop.eup %3557  ;;  %3190 = vst.msk [vmem:[%s3787_s27 + $0x148] sm:$0xff] %vm1527_vm1, %v2882_v34  ;;  %v2049_v50 = vadd.f32 %v1972_v5, %v1450_v54  ;;  %v1446_v24 = vpop.xlane.xlu0 %1445 }
 0x1e6   : > { %v3111_v62 = vsub.f32 %v2957_v46, %v3034_v27  ;;  %3567 = vrsqrt.f32 %v2657_v36  ;;  %v7488_v4 = vld [vmem:[#allocation44_spill] sm:$0xff]  ;;  %v2660_v15 = vadd.f32 1e-05, %v2583_v42  ;;  %v2431_v11 = vmul.f32 0.0051020407, %v2354_v29  ;;  %v7489_v33 = vld [vmem:[#allocation41_spill] sm:$0xff]  ;;  %v1458_v39 = vpop.xlane.xlu1 %1457 }
 0x1e7   : > { %3266 = vst.msk [vmem:[%s5133_s30 + $0x140] sm:$0xff] %vm1527_vm1, %v3112_v16  ;;  %v3037_v18 = vmul.f32 %v2883_v49, %v7488_v4  ;;  %v3036_v10 = vmul.f32 %v2882_v34, %v7489_v33  ;;  %v7490_v6 = vld [vmem:[#allocation62_spill] sm:$0xff]  ;;  %v1971_v44 = vld [vmem:[%s5133_s30 + $0x1c8] sm:$0xff]  ;;  %v3560_v35 = vpop.eup %3559  ;;  %v2885_v3 = vmul.f32 %v3558_v48, %v2808_v41  ;;  %v2353_v46 = vld [vmem:[%s5133_s30 + $0x198] sm:$0xff] }
 0x1e8   : > { %3265 = vst.msk [vmem:[%s5133_s30 + $0x138] sm:$0xff] %vm1527_vm1, %v3111_v62  ;;  %v2582_v38 = vsub.f32 %v2428_v43, %v7490_v6  ;;  %v2216_v51 = vld [vmem:[%s3787_s27 + $0x220] sm:$0xff]  ;;  %3569 = vrsqrt.f32 %v2660_v15  ;;  %v2585_v17 = vsub.f32 %v2431_v11, %v6166_v13  ;;  %2124 = vst.msk [vmem:[%s5133_s30 + $0x1c0] sm:$0xff] %vm1527_vm1, %v2047_v53  ;;  %v2884_v14 = vmul.f32 %v3560_v35, %v2807_v26  ;;  %v2810_v61 = vld [vmem:[%s6179_s7 + $0x170] sm:$0xff] }
 0x1e9   : > { %v3114_v45 = vsub.f32 %v2960_v22, %v3037_v18  ;;  %v2962_v56 = vld [vmem:[%s6216_s10 + $0x160] sm:$0xff]  ;;  %v3113_v37 = vsub.f32 %v2959_v0, %v3036_v10  ;;  %v2430_v21 = vmul.f32 0.0051020407, %v2353_v46  ;;  %2123 = vst.msk [vmem:[%s5133_s30 + $0x1b8] sm:$0xff] %vm1527_vm1, %v2046_v25  ;;  %2126 = vst.msk [vmem:[%s5133_s30 + $0x1d0] sm:$0xff] %vm1527_vm1, %v2049_v50  ;;  %v1973_v27 = vld [vmem:[%s5133_s30 + $0x1d8] sm:$0xff]  ;;  %v2048_v23 = vadd.f32 %v1971_v44, %v1446_v24  ;;  %v1454_v5 = vpop.xlane.xlu0 %1453 }
 0x1ea   : > { %v1974_v52 = vld [vmem:[%s5133_s30 + $0x1e0] sm:$0xff]  ;;  %v2659_v8 = vadd.f32 1e-05, %v2582_v38  ;;  %v7491_v13 = vld [vmem:[#allocation49_spill] sm:$0xff]  ;;  %3193 = vst.msk [vmem:[%s3787_s27 + $0x160] sm:$0xff] %vm1527_vm1, %v2885_v3  ;;  %v2809_v55 = vld [vmem:[%s6179_s7 + $0x168] sm:$0xff]  ;;  %v3562_v16 = vpop.eup %3561  ;;  %v2050_v0 = vadd.f32 %v1973_v27, %v1454_v5  ;;  %v6837_v25 = vpop.xlane.xlu1 %1465  ;;  %v6841_v50 = vmul.f32 %v6386_v20, %v6386_v20 }
 0x1eb   : > { %3268 = vst.msk [vmem:[%s5133_s30 + $0x150] sm:$0xff] %vm1527_vm1, %v3114_v45  ;;  %v3039_v36 = vmul.f32 %v2885_v3, %v7491_v13  ;;  %v2961_v47 = vld [vmem:[%s6216_s10 + $0x158] sm:$0xff]  ;;  %v2662_v28 = vadd.f32 1e-05, %v2585_v17  ;;  %v6811_v32 = vmul.f32 0.0051020407, %v2216_v51  ;;  %v2584_v29 = vsub.f32 %v2430_v21, %v6140_v58  ;;  %v3564_v22 = vpop.eup %3563 }
 0x1ec   : > { %3267 = vst.msk [vmem:[%s5133_s30 + $0x148] sm:$0xff] %vm1527_vm1, %v3113_v37  ;;  %v7492_v49 = vld [vmem:[#allocation45_spill] sm:$0xff]  ;;  %3192 = vst.msk [vmem:[%s3787_s27 + $0x158] sm:$0xff] %vm1527_vm1, %v2884_v14  ;;  %3571 = vrsqrt.f32 %v2659_v8  ;;  %v2051_v63 = vadd.f32 %v1974_v52, %v1458_v39  ;;  %v2217_v62 = vld [vmem:[%s3787_s27 + $0x228] sm:$0xff]  ;;  %v2887_v41 = vmul.f32 %v3562_v16, %v2810_v61  ;;  %v2886_v15 = vmul.f32 %v3564_v22, %v2809_v55 }
 0x1ed   : > { %v3038_v42 = vmul.f32 %v2884_v14, %v7492_v49  ;;  %v3116_v34 = vsub.f32 %v2962_v56, %v3039_v36  ;;  %v2812_v43 = vld [vmem:[%s6179_s7 + $0x180] sm:$0xff]  ;;  %3573 = vrsqrt.f32 %v2662_v28  ;;  %v2356_v4 = vld [vmem:[%s5133_s30 + $0x1b0] sm:$0xff]  ;;  %v2355_v18 = vld [vmem:[%s5133_s30 + $0x1a8] sm:$0xff]  ;;  %2125 = vst.msk [vmem:[%s5133_s30 + $0x1c8] sm:$0xff] %vm1527_vm1, %v2048_v23  ;;  %v2661_v53 = vadd.f32 1e-05, %v2584_v29  ;;  %v6853_v46 = vpop.xlane.xlu0 %1461 }
 0x1ee   : > { %v2964_v26 = vld [vmem:[%s6216_s10 + $0x170] sm:$0xff]  ;;  %v2811_v11 = vld [vmem:[%s6179_s7 + $0x178] sm:$0xff]  ;;  %v2433_v54 = vmul.f32 0.0051020407, %v2356_v4  ;;  %2128 = vst.msk [vmem:[%s5133_s30 + $0x1e0] sm:$0xff] %vm1527_vm1, %v2051_v63  ;;  %3195 = vst.msk [vmem:[%s3787_s27 + $0x170] sm:$0xff] %vm1527_vm1, %v2887_v41  ;;  %v1474_v5 = vpop.xlane.xlu1 %1473 }
 0x1ef   : > { %v3115_v58 = vsub.f32 %v2961_v47, %v3038_v42  ;;  %v3566_v48 = vpop.eup %3565  ;;  %3270 = vst.msk [vmem:[%s5133_s30 + $0x160] sm:$0xff] %vm1527_vm1, %v3116_v34  ;;  %v7493_v33 = vld [vmem:[#allocation52_spill] sm:$0xff]  ;;  %v2963_v6 = vld [vmem:[%s6216_s10 + $0x168] sm:$0xff]  ;;  %v2432_v38 = vmul.f32 0.0051020407, %v2355_v18  ;;  %2127 = vst.msk [vmem:[%s5133_s30 + $0x1d8] sm:$0xff] %vm1527_vm1, %v2050_v0  ;;  %3575 = vrsqrt.f32 %v2661_v53 }
 0x1f0   : > { %v3041_v10 = vmul.f32 %v2887_v41, %v7493_v33  ;;  %v6843_v44 = vmul.f32 0.0051020407, %v2217_v62  ;;  %v3568_v24 = vpop.eup %3567  ;;  %v7494_v51 = vld [vmem:[#allocation48_spill] sm:$0xff]  ;;  %3194 = vst.msk [vmem:[%s3787_s27 + $0x168] sm:$0xff] %vm1527_vm1, %v2886_v15  ;;  %v2966_v45 = vld [vmem:[%s6216_s10 + $0x180] sm:$0xff]  ;;  %v2889_v56 = vmul.f32 %v3566_v48, %v2812_v43  ;;  %v2587_v3 = vsub.f32 %v2433_v54, %v6192_v7  ;;  %v2357_v27 = vld [vmem:[%s5133_s30 + $0x1b8] sm:$0xff] }
 0x1f1   : > { %3269 = vst.msk [vmem:[%s5133_s30 + $0x158] sm:$0xff] %vm1527_vm1, %v3115_v58  ;;  %v3040_v35 = vmul.f32 %v2886_v15, %v7494_v51  ;;  %v2358_v17 = vld [vmem:[%s5133_s30 + $0x1c0] sm:$0xff]  ;;  %v2888_v37 = vmul.f32 %v3568_v24, %v2811_v11  ;;  %v2814_v14 = vld [vmem:[%s6179_s7 + $0x190] sm:$0xff]  ;;  %v7496_v47 = vld [vmem:[#allocation55_spill] sm:$0xff]  ;;  %v2434_v23 = vmul.f32 0.0051020407, %v2357_v27  ;;  %v6875_v0 = vpop.xlane.xlu0 %1469 }
 0x1f2   : > { %v3118_v52 = vsub.f32 %v2964_v26, %v3041_v10  ;;  %v7495_v61 = vld [vmem:[#allocation66_spill] sm:$0xff]  ;;  %v2435_v21 = vmul.f32 0.0051020407, %v2358_v17  ;;  %v2360_v13 = vld [vmem:[%s5133_s30 + $0x1d0] sm:$0xff]  ;;  %v3043_v55 = vmul.f32 %v2889_v56, %v7496_v47  ;;  %3197 = vst.msk [vmem:[%s3787_s27 + $0x180] sm:$0xff] %vm1527_vm1, %v2889_v56  ;;  %v2965_v7 = vld [vmem:[%s6216_s10 + $0x178] sm:$0xff]  ;;  %v3570_v39 = vpop.eup %3569 }
 0x1f3   : > { %v2586_v8 = vsub.f32 %v2432_v38, %v7495_v61  ;;  %v3117_v36 = vsub.f32 %v2963_v6, %v3040_v35  ;;  %v2664_v28 = vadd.f32 1e-05, %v2587_v3  ;;  %v7497_v16 = vld [vmem:[#allocation50_spill] sm:$0xff]  ;;  %3196 = vst.msk [vmem:[%s3787_s27 + $0x178] sm:$0xff] %vm1527_vm1, %v2888_v37  ;;  %v2437_v63 = vmul.f32 0.0051020407, %v2360_v13 }
 0x1f4   : > { %3272 = vst.msk [vmem:[%s5133_s30 + $0x170] sm:$0xff] %vm1527_vm1, %v3118_v52  ;;  %v3042_v49 = vmul.f32 %v2888_v37, %v7497_v16  ;;  %v2589_v29 = vsub.f32 %v2435_v21, %v6230_v12  ;;  %v3120_v62 = vsub.f32 %v2966_v45, %v3043_v55  ;;  %v2891_v22 = vmul.f32 %v3570_v39, %v2814_v14  ;;  %v2813_v34 = vld [vmem:[%s6179_s7 + $0x188] sm:$0xff]  ;;  %v7498_v41 = vld [vmem:[#allocation70_spill] sm:$0xff]  ;;  %v1976_v18 = vld [vmem:[%s5133_s30 + $0x1f0] sm:$0xff]  ;;  %v1482_v37 = vpop.xlane.xlu1 %1481 }
 0x1f5   : > { %v2663_v42 = vadd.f32 1e-05, %v2586_v8  ;;  %3271 = vst.msk [vmem:[%s5133_s30 + $0x168] sm:$0xff] %vm1527_vm1, %v3117_v36  ;;  %3577 = vrsqrt.f32 %v2664_v28  ;;  %v2588_v43 = vsub.f32 %v2434_v23, %v7498_v41  ;;  %v2359_v4 = vld [vmem:[%s5133_s30 + $0x1c8] sm:$0xff]  ;;  %v2968_v12 = vld [vmem:[%s6216_s10 + $0x190] sm:$0xff]  ;;  %v2816_v26 = vld [vmem:[%s6179_s7 + $0x1a0] sm:$0xff]  ;;  %v2053_v3 = vadd.f32 %v1976_v18, %v6837_v25  ;;  %v1478_v36 = vpop.xlane.xlu0 %1477 }
 0x1f6   : > { %v3119_v58 = vsub.f32 %v2965_v7, %v3042_v49  ;;  %v2666_v15 = vadd.f32 1e-05, %v2589_v29  ;;  %v7499_v11 = vld [vmem:[#allocation75_spill] sm:$0xff]  ;;  %v2362_v54 = vld [vmem:[%s5133_s30 + $0x1e0] sm:$0xff]  ;;  %v3572_v48 = vpop.eup %3571  ;;  %3274 = vst.msk [vmem:[%s5133_s30 + $0x180] sm:$0xff] %vm1527_vm1, %v3120_v62  ;;  %3199 = vst.msk [vmem:[%s3787_s27 + $0x190] sm:$0xff] %vm1527_vm1, %v2891_v22 }
 0x1f7   : > { %3579 = vrsqrt.f32 %v2663_v42  ;;  %v2591_v53 = vsub.f32 %v2437_v63, %v7499_v11  ;;  %v7500_v33 = vld [vmem:[#allocation58_spill] sm:$0xff]  ;;  %v2665_v6 = vadd.f32 1e-05, %v2588_v43  ;;  %v2436_v38 = vmul.f32 0.0051020407, %v2359_v4  ;;  %v3574_v51 = vpop.eup %3573  ;;  %v2361_v56 = vld [vmem:[%s5133_s30 + $0x1d8] sm:$0xff] }
 0x1f8   : > { %v3045_v10 = vmul.f32 %v2891_v22, %v7500_v33  ;;  %v2439_v24 = vmul.f32 0.0051020407, %v2362_v54  ;;  %3273 = vst.msk [vmem:[%s5133_s30 + $0x178] sm:$0xff] %vm1527_vm1, %v3119_v58  ;;  %v2890_v35 = vmul.f32 %v3572_v48, %v2813_v34  ;;  %3581 = vrsqrt.f32 %v2666_v15  ;;  %v1975_v17 = vld [vmem:[%s5133_s30 + $0x1e8] sm:$0xff]  ;;  %v1978_v52 = vld [vmem:[%s5133_s30 + $0x200] sm:$0xff]  ;;  %v2815_v21 = vld [vmem:[%s6179_s7 + $0x198] sm:$0xff] }
 0x1f9   : > { %v2668_v45 = vadd.f32 1e-05, %v2591_v53  ;;  %v2967_v61 = vld [vmem:[%s6216_s10 + $0x188] sm:$0xff]  ;;  %v2893_v8 = vmul.f32 %v3574_v51, %v2816_v26  ;;  %3583 = vrsqrt.f32 %v2665_v6  ;;  %v7501_v27 = vld [vmem:[#allocation72_spill] sm:$0xff]  ;;  %v2970_v25 = vld [vmem:[%s6216_s10 + $0x1a0] sm:$0xff]  ;;  %2130 = vst.msk [vmem:[%s5133_s30 + $0x1f0] sm:$0xff] %vm1527_vm1, %v2053_v3  ;;  %v3576_v49 = vpop.eup %3575  ;;  %v2052_v62 = vadd.f32 %v1975_v17, %v6853_v46  ;;  %v1490_v26 = vpop.xlane.xlu1 %1489 }
 0x1fa   : > { %v3122_v14 = vsub.f32 %v2968_v12, %v3045_v10  ;;  %v2590_v13 = vsub.f32 %v2436_v38, %v7501_v27  ;;  %v7502_v47 = vld [vmem:[#allocation56_spill] sm:$0xff]  ;;  %3198 = vst.msk [vmem:[%s3787_s27 + $0x188] sm:$0xff] %vm1527_vm1, %v2890_v35  ;;  %v2438_v23 = vmul.f32 0.0051020407, %v2361_v56  ;;  %v1977_v39 = vld [vmem:[%s5133_s30 + $0x1f8] sm:$0xff]  ;;  %v7504_v42 = vld [vmem:[#allocation63_spill] sm:$0xff]  ;;  %v2055_v22 = vadd.f32 %v1978_v52, %v1474_v5  ;;  %v1486_v33 = vpop.xlane.xlu0 %1485 }
 0x1fb   : > { %v3044_v55 = vmul.f32 %v2890_v35, %v7502_v47  ;;  %3585 = vrsqrt.f32 %v2668_v45  ;;  %v7503_v7 = vld [vmem:[#allocation76_spill] sm:$0xff]  ;;  %v3047_v29 = vmul.f32 %v2893_v8, %v7504_v42  ;;  %3201 = vst.msk [vmem:[%s3787_s27 + $0x1a0] sm:$0xff] %vm1527_vm1, %v2893_v8  ;;  %v1979_v34 = vld [vmem:[%s5133_s30 + $0x208] sm:$0xff]  ;;  %v2892_v43 = vmul.f32 %v3576_v49, %v2815_v21  ;;  %v7505_v18 = vld [vmem:[#allocation74_spill] sm:$0xff] }
 0x1fc   : > { %v2593_v28 = vsub.f32 %v2439_v24, %v7503_v7  ;;  %v1980_v16 = vld [vmem:[%s5133_s30 + $0x210] sm:$0xff]  ;;  %3276 = vst.msk [vmem:[%s5133_s30 + $0x190] sm:$0xff] %vm1527_vm1, %v3122_v14  ;;  %v2667_v63 = vadd.f32 1e-05, %v2590_v13  ;;  %v2592_v58 = vsub.f32 %v2438_v23, %v7505_v18  ;;  %v1982_v12 = vld [vmem:[%s5133_s30 + $0x220] sm:$0xff]  ;;  %v1981_v15 = vld [vmem:[%s5133_s30 + $0x218] sm:$0xff]  ;;  %v2054_v5 = vadd.f32 %v1977_v39, %v6875_v0 }
 0x1fd   : > { %v3121_v41 = vsub.f32 %v2967_v61, %v3044_v55  ;;  %v2218_v11 = vld [vmem:[%s3787_s27 + $0x230] sm:$0xff]  ;;  %v3124_v53 = vsub.f32 %v2970_v25, %v3047_v29  ;;  %v2969_v54 = vld [vmem:[%s6216_s10 + $0x198] sm:$0xff]  ;;  %2129 = vst.msk [vmem:[%s5133_s30 + $0x1e8] sm:$0xff] %vm1527_vm1, %v2052_v62  ;;  %2132 = vst.msk [vmem:[%s5133_s30 + $0x200] sm:$0xff] %vm1527_vm1, %v2055_v22  ;;  %v2057_v48 = vadd.f32 %v1980_v16, %v1482_v37  ;;  %v1498_v27 = vpop.xlane.xlu1 %1497 }
 0x1fe   : > { %v2670_v4 = vadd.f32 1e-05, %v2593_v28  ;;  %v2818_v46 = vld [vmem:[%s6179_s7 + $0x1b0] sm:$0xff]  ;;  %3587 = vrsqrt.f32 %v2667_v63  ;;  %v2220_v10 = vld [vmem:[%s3787_s27 + $0x240] sm:$0xff]  ;;  %v7506_v6 = vld [vmem:[#allocation57_spill] sm:$0xff]  ;;  %3200 = vst.msk [vmem:[%s3787_s27 + $0x198] sm:$0xff] %vm1527_vm1, %v2892_v43  ;;  %v2056_v35 = vadd.f32 %v1979_v34, %v1478_v36  ;;  %v6938_v0 = vmul.f32 %v6593_v57, %v6593_v57  ;;  %v1494_v16 = vpop.xlane.xlu0 %1493 }
 0x1ff   : > { %3275 = vst.msk [vmem:[%s5133_s30 + $0x188] sm:$0xff] %vm1527_vm1, %v3121_v41  ;;  %v3046_v38 = vmul.f32 %v2892_v43, %v7506_v6  ;;  %v2817_v24 = vld [vmem:[%s6179_s7 + $0x1a8] sm:$0xff]  ;;  %v2669_v51 = vadd.f32 1e-05, %v2592_v58  ;;  %v1984_v45 = vld [vmem:[%s5133_s30 + $0x230] sm:$0xff]  ;;  %v3578_v56 = vpop.eup %3577  ;;  %3278 = vst.msk [vmem:[%s5133_s30 + $0x1a0] sm:$0xff] %vm1527_vm1, %v3124_v53  ;;  %v2059_v3 = vadd.f32 %v1982_v12, %v1490_v26  ;;  %v2058_v17 = vadd.f32 %v1981_v15, %v1486_v33 }
 0x200   : > { %3589 = vrsqrt.f32 %v2670_v4  ;;  %2131 = vst.msk [vmem:[%s5133_s30 + $0x1f8] sm:$0xff] %vm1527_vm1, %v2054_v5  ;;  %2134 = vst.msk [vmem:[%s5133_s30 + $0x210] sm:$0xff] %vm1527_vm1, %v2057_v48  ;;  %v6940_v52 = vmul.f32 0.0051020407, %v2218_v11  ;;  %v1983_v37 = vld [vmem:[%s5133_s30 + $0x228] sm:$0xff]  ;;  %v2895_v8 = vmul.f32 %v3578_v56, %v2818_v46  ;;  %v2820_v21 = vld [vmem:[%s6179_s7 + $0x1c0] sm:$0xff]  ;;  %v6956_v28 = vmul.f32 %v6811_v32, %v6811_v32 }
 0x201   : > { %v3580_v14 = vpop.eup %3579  ;;  %v3123_v61 = vsub.f32 %v2969_v54, %v3046_v38  ;;  %3591 = vrsqrt.f32 %v2669_v51  ;;  %2133 = vst.msk [vmem:[%s5133_s30 + $0x208] sm:$0xff] %vm1527_vm1, %v2056_v35  ;;  %v6946_v13 = vmul.f32 0.0051020407, %v2220_v10  ;;  %v2219_v36 = vld [vmem:[%s3787_s27 + $0x238] sm:$0xff]  ;;  %v2972_v47 = vld [vmem:[%s6216_s10 + $0x1b0] sm:$0xff]  ;;  %2136 = vst.msk [vmem:[%s5133_s30 + $0x220] sm:$0xff] %vm1527_vm1, %v2059_v3  ;;  %v6960_v23 = vmul.f32 %v6691_v30, %v6691_v30  ;;  %v1506_v10 = vpop.xlane.xlu1 %1505 }
 0x202   : > { %v2894_v55 = vmul.f32 %v3580_v14, %v2817_v24  ;;  %v2819_v25 = vld [vmem:[%s6179_s7 + $0x1b8] sm:$0xff]  ;;  %v2364_v7 = vld [vmem:[%s5133_s30 + $0x1f0] sm:$0xff]  ;;  %2135 = vst.msk [vmem:[%s5133_s30 + $0x218] sm:$0xff] %vm1527_vm1, %v2058_v17  ;;  %v2061_v39 = vadd.f32 %v1984_v45, %v1498_v27  ;;  %v3582_v49 = vpop.eup %3581  ;;  %3203 = vst.msk [vmem:[%s3787_s27 + $0x1b0] sm:$0xff] %vm1527_vm1, %v2895_v8  ;;  %v6973_v34 = vmul.f32 %v6843_v44, %v6843_v44  ;;  %v6985_v15 = vmul.f32 0.0051020407, %v2219_v36  ;;  %v7003_v17 = vpop.xlane.xlu0 %1501 }
 0x203   : > { %3277 = vst.msk [vmem:[%s5133_s30 + $0x198] sm:$0xff] %vm1527_vm1, %v3123_v61  ;;  %v7507_v42 = vld [vmem:[#allocation64_spill] sm:$0xff]  ;;  %v2971_v63 = vld [vmem:[%s6216_s10 + $0x1a8] sm:$0xff]  ;;  %v2441_v22 = vmul.f32 0.0051020407, %v2364_v7  ;;  %v2060_v41 = vadd.f32 %v1983_v37, %v1494_v16  ;;  %v3584_v43 = vpop.eup %3583  ;;  %v2897_v58 = vmul.f32 %v3582_v49, %v2820_v21  ;;  %v6982_v12 = vmul.f32 %v6940_v52, %v6940_v52  ;;  %v1986_v26 = vld [vmem:[%s5133_s30 + $0x240] sm:$0xff] }
 0x204   : > { %v3049_v29 = vmul.f32 %v2895_v8, %v7507_v42  ;;  %v2822_v62 = vld [vmem:[%s6179_s7 + $0x1d0] sm:$0xff]  ;;  %v7508_v4 = vld [vmem:[#allocation59_spill] sm:$0xff]  ;;  %3202 = vst.msk [vmem:[%s3787_s27 + $0x1a8] sm:$0xff] %vm1527_vm1, %v2894_v55  ;;  %2138 = vst.msk [vmem:[%s5133_s30 + $0x230] sm:$0xff] %vm1527_vm1, %v2061_v39  ;;  %v2896_v46 = vmul.f32 %v3584_v43, %v2819_v25  ;;  %v6995_v6 = vmul.f32 %v6946_v13, %v6946_v13 }
 0x205   : > { %v3048_v18 = vmul.f32 %v2894_v55, %v7508_v4  ;;  %v3586_v11 = vpop.eup %3585  ;;  %v2974_v54 = vld [vmem:[%s6216_s10 + $0x1c0] sm:$0xff]  ;;  %v2595_v5 = vsub.f32 %v2441_v22, %v6466_v9  ;;  %v2363_v48 = vld [vmem:[%s5133_s30 + $0x1e8] sm:$0xff]  ;;  %2137 = vst.msk [vmem:[%s5133_s30 + $0x228] sm:$0xff] %vm1527_vm1, %v2060_v41  ;;  %v7509_v24 = vld [vmem:[#allocation68_spill] sm:$0xff]  ;;  %v2063_v36 = vadd.f32 %v1986_v26, %v1506_v10 }
 0x206   : > { %v3126_v53 = vsub.f32 %v2972_v47, %v3049_v29  ;;  %v2366_v33 = vld [vmem:[%s5133_s30 + $0x200] sm:$0xff]  ;;  %v3051_v51 = vmul.f32 %v2897_v58, %v7509_v24  ;;  %3205 = vst.msk [vmem:[%s3787_s27 + $0x1c0] sm:$0xff] %vm1527_vm1, %v2897_v58  ;;  %v2973_v35 = vld [vmem:[%s6216_s10 + $0x1b8] sm:$0xff]  ;;  %v2976_v9 = vld [vmem:[%s6216_s10 + $0x1d0] sm:$0xff]  ;;  %v2899_v45 = vmul.f32 %v3586_v11, %v2822_v62  ;;  %v2440_v3 = vmul.f32 0.0051020407, %v2363_v48 }
 0x207   : > { %v3125_v38 = vsub.f32 %v2971_v63, %v3048_v18  ;;  %v2821_v56 = vld [vmem:[%s6179_s7 + $0x1c8] sm:$0xff]  ;;  %v7510_v37 = vld [vmem:[#allocation65_spill] sm:$0xff]  ;;  %3204 = vst.msk [vmem:[%s3787_s27 + $0x1b8] sm:$0xff] %vm1527_vm1, %v2896_v46  ;;  %v2824_v61 = vld [vmem:[%s6179_s7 + $0x1e0] sm:$0xff]  ;;  %v2672_v8 = vadd.f32 1e-05, %v2595_v5 }
 0x208   : > { %3280 = vst.msk [vmem:[%s5133_s30 + $0x1b0] sm:$0xff] %vm1527_vm1, %v3126_v53  ;;  %v3050_v14 = vmul.f32 %v2896_v46, %v7510_v37  ;;  %v2443_v21 = vmul.f32 0.0051020407, %v2366_v33  ;;  %v2365_v27 = vld [vmem:[%s5133_s30 + $0x1f8] sm:$0xff]  ;;  %v3588_v47 = vpop.eup %3587  ;;  %v3128_v55 = vsub.f32 %v2974_v54, %v3051_v51  ;;  %v7511_v25 = vld [vmem:[#allocation71_spill] sm:$0xff]  ;;  %3207 = vst.msk [vmem:[%s3787_s27 + $0x1d0] sm:$0xff] %vm1527_vm1, %v2899_v45  ;;  %v2594_v39 = vsub.f32 %v2440_v3, %v6287_v2  ;;  %v1514_v53 = vpop.xlane.xlu1 %1513 }
 0x209   : > { %3279 = vst.msk [vmem:[%s5133_s30 + $0x1a8] sm:$0xff] %vm1527_vm1, %v3125_v38  ;;  %v3053_v7 = vmul.f32 %v2899_v45, %v7511_v25  ;;  %v2442_v16 = vmul.f32 0.0051020407, %v2365_v27  ;;  %v2368_v49 = vld [vmem:[%s5133_s30 + $0x210] sm:$0xff]  ;;  %v2367_v42 = vld [vmem:[%s5133_s30 + $0x208] sm:$0xff]  ;;  %v2898_v62 = vmul.f32 %v3588_v47, %v2821_v56  ;;  %v2823_v22 = vld [vmem:[%s6179_s7 + $0x1d8] sm:$0xff]  ;;  %3593 = vrsqrt.f32 %v2672_v8 }
 0x20a   : > { %v3590_v29 = vpop.eup %3589  ;;  %v3127_v63 = vsub.f32 %v2973_v35, %v3050_v14  ;;  %v2597_v41 = vsub.f32 %v2443_v21, %v6567_v31  ;;  %2140 = vst.msk [vmem:[%s5133_s30 + $0x240] sm:$0xff] %vm1527_vm1, %v2063_v36  ;;  %3282 = vst.msk [vmem:[%s5133_s30 + $0x1c0] sm:$0xff] %vm1527_vm1, %v3128_v55  ;;  %v2975_v2 = vld [vmem:[%s6216_s10 + $0x1c8] sm:$0xff]  ;;  %v2978_v4 = vld [vmem:[%s6216_s10 + $0x1e0] sm:$0xff]  ;;  %v2671_v58 = vadd.f32 1e-05, %v2594_v39 }
 0x20b   : > { %v3130_v43 = vsub.f32 %v2976_v9, %v3053_v7  ;;  %v2901_v18 = vmul.f32 %v3590_v29, %v2824_v61  ;;  %v2596_v26 = vsub.f32 %v2442_v16, %v6493_v40  ;;  %v2370_v11 = vld [vmem:[%s5133_s30 + $0x220] sm:$0xff]  ;;  %v3592_v54 = vpop.eup %3591  ;;  %v7512_v31 = vld [vmem:[#allocation67_spill] sm:$0xff]  ;;  %3206 = vst.msk [vmem:[%s3787_s27 + $0x1c8] sm:$0xff] %vm1527_vm1, %v2898_v62  ;;  %v2445_v48 = vmul.f32 0.0051020407, %v2368_v49  ;;  %v7513_v40 = vld [vmem:[#allocation73_spill] sm:$0xff]  ;;  %v1510_v9 = vpop.xlane.xlu0 %1509 }
 0x20c   : > { %3281 = vst.msk [vmem:[%s5133_s30 + $0x1b8] sm:$0xff] %vm1527_vm1, %v3127_v63  ;;  %v3052_v46 = vmul.f32 %v2898_v62, %v7512_v31  ;;  %v2674_v5 = vadd.f32 1e-05, %v2597_v41  ;;  %v2444_v33 = vmul.f32 0.0051020407, %v2367_v42  ;;  %v2900_v38 = vmul.f32 %v3592_v54, %v2823_v22  ;;  %v2369_v51 = vld [vmem:[%s5133_s30 + $0x218] sm:$0xff]  ;;  %v1522_v62 = vpop.xlane.xlu1 %1521 }
 0x20d   : > { %3284 = vst.msk [vmem:[%s5133_s30 + $0x1d0] sm:$0xff] %vm1527_vm1, %v3130_v43  ;;  %v3055_v10 = vmul.f32 %v2901_v18, %v7513_v40  ;;  %3209 = vst.msk [vmem:[%s3787_s27 + $0x1e0] sm:$0xff] %vm1527_vm1, %v2901_v18  ;;  %3595 = vrsqrt.f32 %v2671_v58  ;;  %v2673_v24 = vadd.f32 1e-05, %v2596_v26  ;;  %v1985_v35 = vld [vmem:[%s5133_s30 + $0x238] sm:$0xff]  ;;  %v2599_v3 = vsub.f32 %v2445_v48, %v6938_v0  ;;  %v2372_v14 = vld [vmem:[%s5133_s30 + $0x230] sm:$0xff] }
 0x20e   : > { %v3129_v45 = vsub.f32 %v2975_v2, %v3052_v46  ;;  %v2977_v56 = vld [vmem:[%s6216_s10 + $0x1d8] sm:$0xff]  ;;  %3597 = vrsqrt.f32 %v2674_v5  ;;  %v2598_v37 = vsub.f32 %v2444_v33, %v6841_v50  ;;  %v2371_v61 = vld [vmem:[%s5133_s30 + $0x228] sm:$0xff]  ;;  %3208 = vst.msk [vmem:[%s3787_s27 + $0x1d8] sm:$0xff] %vm1527_vm1, %v2900_v38  ;;  %v2447_v36 = vmul.f32 0.0051020407, %v2370_v11  ;;  %v1988_v47 = vld [vmem:[%s5133_s30 + $0x250] sm:$0xff] }
 0x20f   : > { %v3132_v8 = vsub.f32 %v2978_v4, %v3055_v10  ;;  %v7514_v21 = vld [vmem:[#allocation69_spill] sm:$0xff]  ;;  %3599 = vrsqrt.f32 %v2673_v24  ;;  %v1987_v55 = vld [vmem:[%s5133_s30 + $0x248] sm:$0xff]  ;;  %v2676_v0 = vadd.f32 1e-05, %v2599_v3  ;;  %v2446_v50 = vmul.f32 0.0051020407, %v2369_v51  ;;  %v1518_v58 = vpop.xlane.xlu0 %1517 }
 0x210   : > { %v3054_v27 = vmul.f32 %v2900_v38, %v7514_v21  ;;  %3283 = vst.msk [vmem:[%s5133_s30 + $0x1c8] sm:$0xff] %vm1527_vm1, %v3129_v45  ;;  %v2675_v25 = vadd.f32 1e-05, %v2598_v37  ;;  %v2062_v7 = vadd.f32 %v1985_v35, %v7003_v17  ;;  %v2601_v16 = vsub.f32 %v2447_v36, %v6956_v28  ;;  %v1990_v63 = vld [vmem:[%s5133_s30 + $0x260] sm:$0xff]  ;;  %v2826_v22 = vld [vmem:[%s6179_s7 + $0x1f0] sm:$0xff]  ;;  %v1989_v18 = vld [vmem:[%s5133_s30 + $0x258] sm:$0xff] }
 0x211   : > { %3286 = vst.msk [vmem:[%s5133_s30 + $0x1e0] sm:$0xff] %vm1527_vm1, %v3132_v8  ;;  %v2449_v49 = vmul.f32 0.0051020407, %v2372_v14  ;;  %v2448_v42 = vmul.f32 0.0051020407, %v2371_v61  ;;  %v2374_v29 = vld [vmem:[%s5133_s30 + $0x240] sm:$0xff]  ;;  %3601 = vrsqrt.f32 %v2676_v0  ;;  %v2600_v41 = vsub.f32 %v2446_v50, %v6960_v23 }
 0x212   : > { %v3131_v39 = vsub.f32 %v2977_v56, %v3054_v27  ;;  %v2451_v43 = vmul.f32 0.0051020407, %v2374_v29  ;;  %2139 = vst.msk [vmem:[%s5133_s30 + $0x238] sm:$0xff] %vm1527_vm1, %v2062_v7  ;;  %v2065_v17 = vadd.f32 %v1988_v47, %v1514_v53  ;;  %3603 = vrsqrt.f32 %v2675_v25  ;;  %v2222_v53 = vld [vmem:[%s3787_s27 + $0x250] sm:$0xff]  ;;  %v2825_v46 = vld [vmem:[%s6179_s7 + $0x1e8] sm:$0xff]  ;;  %v2828_v40 = vld [vmem:[%s6179_s7 + $0x200] sm:$0xff] }
 0x213   : > { %v2678_v28 = vadd.f32 1e-05, %v2601_v16  ;;  %v2603_v2 = vsub.f32 %v2449_v49, %v6982_v12  ;;  %v2602_v4 = vsub.f32 %v2448_v42, %v6973_v34  ;;  %v3594_v26 = vpop.eup %3593  ;;  %v2677_v23 = vadd.f32 1e-05, %v2600_v41  ;;  %v2221_v48 = vld [vmem:[%s3787_s27 + $0x248] sm:$0xff]  ;;  %v2980_v33 = vld [vmem:[%s6216_s10 + $0x1f0] sm:$0xff] }
 0x214   : > { %3285 = vst.msk [vmem:[%s5133_s30 + $0x1d8] sm:$0xff] %vm1527_vm1, %v3131_v39  ;;  %v2605_v11 = vsub.f32 %v2451_v43, %v6995_v6  ;;  %2142 = vst.msk [vmem:[%s5133_s30 + $0x250] sm:$0xff] %vm1527_vm1, %v2065_v17  ;;  %v2064_v54 = vadd.f32 %v1987_v55, %v1510_v9  ;;  %v2067_v31 = vadd.f32 %v1990_v63, %v1522_v62  ;;  %v2223_v10 = vld [vmem:[%s3787_s27 + $0x258] sm:$0xff]  ;;  %v7086_v9 = vmul.f32 0.0051020407, %v2222_v53  ;;  %v2224_v37 = vld [vmem:[%s3787_s27 + $0x260] sm:$0xff] }
 0x215   : > { %v2903_v12 = vmul.f32 %v3594_v26, %v2826_v22  ;;  %3605 = vrsqrt.f32 %v2678_v28  ;;  %v2680_v34 = vadd.f32 1e-05, %v2603_v2  ;;  %v2679_v5 = vadd.f32 1e-05, %v2602_v4  ;;  %v2827_v35 = vld [vmem:[%s6179_s7 + $0x1f8] sm:$0xff]  ;;  %v2979_v61 = vld [vmem:[%s6216_s10 + $0x1e8] sm:$0xff] }
 0x216   : > { %3607 = vrsqrt.f32 %v2677_v23  ;;  %v2682_v6 = vadd.f32 1e-05, %v2605_v11  ;;  %2141 = vst.msk [vmem:[%s5133_s30 + $0x248] sm:$0xff] %vm1527_vm1, %v2064_v54  ;;  %2144 = vst.msk [vmem:[%s5133_s30 + $0x260] sm:$0xff] %vm1527_vm1, %v2067_v31  ;;  %v2066_v38 = vadd.f32 %v1989_v18, %v1518_v58  ;;  %v7088_v3 = vmul.f32 0.0051020407, %v2221_v48 }
 0x217   : > { %v3596_v24 = vpop.eup %3595  ;;  %v3057_v51 = vmul.f32 %v2903_v12, %v6238_v1  ;;  %3211 = vst.msk [vmem:[%s3787_s27 + $0x1f0] sm:$0xff] %vm1527_vm1, %v2903_v12  ;;  %3609 = vrsqrt.f32 %v2680_v34  ;;  %v7095_v27 = vmul.f32 0.0051020407, %v2223_v10  ;;  %v2982_v47 = vld [vmem:[%s6216_s10 + $0x200] sm:$0xff]  ;;  %v2830_v0 = vld [vmem:[%s6179_s7 + $0x210] sm:$0xff]  ;;  %v2527_v25 = vmul.f32 %v6985_v15, %v6985_v15  ;;  %v2981_v39 = vld [vmem:[%s6216_s10 + $0x1f8] sm:$0xff] }
 0x218   : > { %v3598_v45 = vpop.eup %3597  ;;  %v2902_v56 = vmul.f32 %v3596_v24, %v2825_v46  ;;  %3611 = vrsqrt.f32 %v2679_v5  ;;  %2143 = vst.msk [vmem:[%s5133_s30 + $0x258] sm:$0xff] %vm1527_vm1, %v2066_v38  ;;  %v2530_v49 = vmul.f32 %v7086_v9, %v7086_v9  ;;  %v7114_v42 = vmul.f32 0.0051020407, %v2224_v37  ;;  %v2832_v28 = vld [vmem:[%s6179_s7 + $0x220] sm:$0xff]  ;;  %v2984_v26 = vld [vmem:[%s6216_s10 + $0x210] sm:$0xff]  ;;  %v2831_v11 = vld [vmem:[%s6179_s7 + $0x218] sm:$0xff] }
 0x219   : > { %v3600_v1 = vpop.eup %3599  ;;  %v3134_v14 = vsub.f32 %v2980_v33, %v3057_v51  ;;  %v2905_v8 = vmul.f32 %v3598_v45, %v2828_v40  ;;  %3613 = vrsqrt.f32 %v2682_v6  ;;  %v2373_v21 = vld [vmem:[%s5133_s30 + $0x238] sm:$0xff]  ;;  %v2529_v2 = vmul.f32 %v7088_v3, %v7088_v3  ;;  %v2983_v46 = vld [vmem:[%s6216_s10 + $0x208] sm:$0xff]  ;;  %v2834_v34 = vld [vmem:[%s6179_s7 + $0x230] sm:$0xff] }
 0x21a   : > { %v3056_v36 = vmul.f32 %v2902_v56, %v6221_v59  ;;  %3210 = vst.msk [vmem:[%s3787_s27 + $0x1e8] sm:$0xff] %vm1527_vm1, %v2902_v56  ;;  %v2904_v55 = vmul.f32 %v3600_v1, %v2827_v35  ;;  %v2450_v50 = vmul.f32 0.0051020407, %v2373_v21  ;;  %v2829_v59 = vld [vmem:[%s6179_s7 + $0x208] sm:$0xff]  ;;  %v2532_v33 = vmul.f32 %v7114_v42, %v7114_v42  ;;  %v2986_v35 = vld [vmem:[%s6216_s10 + $0x220] sm:$0xff]  ;;  %v2985_v21 = vld [vmem:[%s6216_s10 + $0x218] sm:$0xff] }
 0x21b   : > { %3288 = vst.msk [vmem:[%s5133_s30 + $0x1f0] sm:$0xff] %vm1527_vm1, %v3134_v14  ;;  %v3059_v7 = vmul.f32 %v2905_v8, %v6360_v19  ;;  %3213 = vst.msk [vmem:[%s3787_s27 + $0x200] sm:$0xff] %vm1527_vm1, %v2905_v8  ;;  %v2376_v16 = vld [vmem:[%s5133_s30 + $0x250] sm:$0xff]  ;;  %v3602_v29 = vpop.eup %3601  ;;  %v2833_v10 = vld [vmem:[%s6179_s7 + $0x228] sm:$0xff] }
 0x21c   : > { %v3133_v63 = vsub.f32 %v2979_v61, %v3056_v36  ;;  %v3058_v62 = vmul.f32 %v2904_v55, %v6243_v60  ;;  %3212 = vst.msk [vmem:[%s3787_s27 + $0x1f8] sm:$0xff] %vm1527_vm1, %v2904_v55  ;;  %v2604_v19 = vsub.f32 %v2450_v50, %v2527_v25  ;;  %v2453_v22 = vmul.f32 0.0051020407, %v2376_v16  ;;  %v3604_v41 = vpop.eup %3603  ;;  %v2836_v56 = vld [vmem:[%s6179_s7 + $0x240] sm:$0xff] }
 0x21d   : > { %v3136_v43 = vsub.f32 %v2982_v47, %v3059_v7  ;;  %v2907_v17 = vmul.f32 %v3602_v29, %v2830_v0  ;;  %v2375_v4 = vld [vmem:[%s5133_s30 + $0x248] sm:$0xff]  ;;  %v2378_v18 = vld [vmem:[%s5133_s30 + $0x260] sm:$0xff]  ;;  %v7126_v60 = vmul.f32 %v7095_v27, %v7095_v27  ;;  %v2906_v23 = vmul.f32 %v3604_v41, %v2829_v59  ;;  %v2988_v0 = vld [vmem:[%s6216_s10 + $0x230] sm:$0xff] }
 0x21e   : > { %3287 = vst.msk [vmem:[%s5133_s30 + $0x1e8] sm:$0xff] %vm1527_vm1, %v3133_v63  ;;  %v3135_v58 = vsub.f32 %v2981_v39, %v3058_v62  ;;  %v2681_v53 = vadd.f32 1e-05, %v2604_v19  ;;  %v2607_v54 = vsub.f32 %v2453_v22, %v2530_v49  ;;  %v2452_v5 = vmul.f32 0.0051020407, %v2375_v4  ;;  %v2987_v59 = vld [vmem:[%s6216_s10 + $0x228] sm:$0xff] }
 0x21f   : > { %v3606_v31 = vpop.eup %3605  ;;  %3290 = vst.msk [vmem:[%s5133_s30 + $0x200] sm:$0xff] %vm1527_vm1, %v3136_v43  ;;  %v3061_v12 = vmul.f32 %v2907_v17, %v6593_v57  ;;  %3215 = vst.msk [vmem:[%s3787_s27 + $0x210] sm:$0xff] %vm1527_vm1, %v2907_v17  ;;  %v2455_v48 = vmul.f32 0.0051020407, %v2378_v18  ;;  %v3060_v6 = vmul.f32 %v2906_v23, %v6386_v20  ;;  %v2377_v14 = vld [vmem:[%s5133_s30 + $0x258] sm:$0xff]  ;;  %v2990_v63 = vld [vmem:[%s6216_s10 + $0x240] sm:$0xff] }
 0x220   : > { %v3608_v40 = vpop.eup %3607  ;;  %3289 = vst.msk [vmem:[%s5133_s30 + $0x1f8] sm:$0xff] %vm1527_vm1, %v3135_v58  ;;  %3214 = vst.msk [vmem:[%s3787_s27 + $0x208] sm:$0xff] %vm1527_vm1, %v2906_v23  ;;  %v2909_v57 = vmul.f32 %v3606_v31, %v2832_v28  ;;  %3615 = vrsqrt.f32 %v2681_v53  ;;  %v2684_v38 = vadd.f32 1e-05, %v2607_v54  ;;  %v2606_v37 = vsub.f32 %v2452_v5, %v2529_v2  ;;  %v2835_v41 = vld [vmem:[%s6179_s7 + $0x238] sm:$0xff]  ;;  %v2838_v17 = vld [vmem:[%s6179_s7 + $0x250] sm:$0xff] }
 0x221   : > { %v3610_v24 = vpop.eup %3609  ;;  %v3138_v51 = vsub.f32 %v2984_v26, %v3061_v12  ;;  %v2908_v45 = vmul.f32 %v3608_v40, %v2831_v11  ;;  %v2609_v1 = vsub.f32 %v2455_v48, %v2532_v33  ;;  %v3137_v61 = vsub.f32 %v2983_v46, %v3060_v6  ;;  %v2989_v4 = vld [vmem:[%s6216_s10 + $0x238] sm:$0xff]  ;;  %v2837_v58 = vld [vmem:[%s6179_s7 + $0x248] sm:$0xff]  ;;  %v2992_v26 = vld [vmem:[%s6216_s10 + $0x250] sm:$0xff] }
 0x222   : > { %v3612_v20 = vpop.eup %3611  ;;  %v3063_v8 = vmul.f32 %v2909_v57, %v6811_v32  ;;  %3217 = vst.msk [vmem:[%s3787_s27 + $0x220] sm:$0xff] %vm1527_vm1, %v2909_v57  ;;  %v2911_v36 = vmul.f32 %v3610_v24, %v2834_v34  ;;  %3617 = vrsqrt.f32 %v2684_v38  ;;  %v2683_v32 = vadd.f32 1e-05, %v2606_v37  ;;  %v2840_v23 = vld [vmem:[%s6179_s7 + $0x260] sm:$0xff]  ;;  %v2991_v46 = vld [vmem:[%s6216_s10 + $0x248] sm:$0xff]  ;;  %v2993_v38 = vld [vmem:[%s6216_s10 + $0x258] sm:$0xff] }
 0x223   : > { %v3614_v47 = vpop.eup %3613  ;;  %3292 = vst.msk [vmem:[%s5133_s30 + $0x210] sm:$0xff] %vm1527_vm1, %v3138_v51  ;;  %v3062_v55 = vmul.f32 %v2908_v45, %v6691_v30  ;;  %3216 = vst.msk [vmem:[%s3787_s27 + $0x218] sm:$0xff] %vm1527_vm1, %v2908_v45  ;;  %v2910_v25 = vmul.f32 %v3612_v20, %v2833_v10  ;;  %v2686_v50 = vadd.f32 1e-05, %v2609_v1  ;;  %v2454_v16 = vmul.f32 0.0051020407, %v2377_v14 }
 0x224   : > { %3291 = vst.msk [vmem:[%s5133_s30 + $0x208] sm:$0xff] %vm1527_vm1, %v3137_v61  ;;  %v3140_v7 = vsub.f32 %v2986_v35, %v3063_v8  ;;  %v3065_v39 = vmul.f32 %v2911_v36, %v6940_v52  ;;  %3219 = vst.msk [vmem:[%s3787_s27 + $0x230] sm:$0xff] %vm1527_vm1, %v2911_v36  ;;  %v2913_v30 = vmul.f32 %v3614_v47, %v2836_v56  ;;  %3619 = vrsqrt.f32 %v2683_v32  ;;  %v2994_v48 = vld [vmem:[%s6216_s10 + $0x260] sm:$0xff] }
 0x225   : > { %v3139_v49 = vsub.f32 %v2985_v21, %v3062_v55  ;;  %v3064_v29 = vmul.f32 %v2910_v25, %v6843_v44  ;;  %3218 = vst.msk [vmem:[%s3787_s27 + $0x228] sm:$0xff] %vm1527_vm1, %v2910_v25  ;;  %3621 = vrsqrt.f32 %v2686_v50  ;;  %v2608_v19 = vsub.f32 %v2454_v16, %v7126_v60 }
 0x226   : > { %3294 = vst.msk [vmem:[%s5133_s30 + $0x220] sm:$0xff] %vm1527_vm1, %v3140_v7  ;;  %v3142_v52 = vsub.f32 %v2988_v0, %v3065_v39  ;;  %v3067_v62 = vmul.f32 %v2913_v30, %v6946_v13  ;;  %3221 = vst.msk [vmem:[%s3787_s27 + $0x240] sm:$0xff] %vm1527_vm1, %v2913_v30 }
 0x227   : > { %3293 = vst.msk [vmem:[%s5133_s30 + $0x218] sm:$0xff] %vm1527_vm1, %v3139_v49  ;;  %v3141_v44 = vsub.f32 %v2987_v59, %v3064_v29  ;;  %v2685_v43 = vadd.f32 1e-05, %v2608_v19 }
 0x228   : > { %3296 = vst.msk [vmem:[%s5133_s30 + $0x230] sm:$0xff] %vm1527_vm1, %v3142_v52  ;;  %v3144_v22 = vsub.f32 %v2990_v63, %v3067_v62 }
 0x229   : > { %3295 = vst.msk [vmem:[%s5133_s30 + $0x228] sm:$0xff] %vm1527_vm1, %v3141_v44  ;;  %3623 = vrsqrt.f32 %v2685_v43 }
 0x22a   : > { %v3616_v13 = vpop.eup %3615  ;;  %3298 = vst.msk [vmem:[%s5133_s30 + $0x240] sm:$0xff] %vm1527_vm1, %v3144_v22 }
 0x22b   : > { %v2912_v28 = vmul.f32 %v3616_v13, %v2835_v41 }
 0x22c   : > { %v3618_v2 = vpop.eup %3617 }
 0x22d   : > { %v3066_v18 = vmul.f32 %v2912_v28, %v6985_v15  ;;  %3220 = vst.msk [vmem:[%s3787_s27 + $0x238] sm:$0xff] %vm1527_vm1, %v2912_v28  ;;  %v2915_v60 = vmul.f32 %v3618_v2, %v2838_v17 }
 0x22e   : > { %v3620_v11 = vpop.eup %3619 }
 0x22f   : > { %v3143_v53 = vsub.f32 %v2989_v4, %v3066_v18  ;;  %v3069_v54 = vmul.f32 %v2915_v60, %v7086_v9  ;;  %3223 = vst.msk [vmem:[%s3787_s27 + $0x250] sm:$0xff] %vm1527_vm1, %v2915_v60  ;;  %v3622_v31 = vpop.eup %3621  ;;  %v2914_v12 = vmul.f32 %v3620_v11, %v2837_v58  ;;  %v2839_v9 = vld [vmem:[%s6179_s7 + $0x258] sm:$0xff] }
 0x230   : > { %v2917_v34 = vmul.f32 %v3622_v31, %v2840_v23 }
 0x231   : > { %3297 = vst.msk [vmem:[%s5133_s30 + $0x238] sm:$0xff] %vm1527_vm1, %v3143_v53  ;;  %v3146_v15 = vsub.f32 %v2992_v26, %v3069_v54  ;;  %v3068_v5 = vmul.f32 %v2914_v12, %v7088_v3  ;;  %3222 = vst.msk [vmem:[%s3787_s27 + $0x248] sm:$0xff] %vm1527_vm1, %v2914_v12 }
 0x232   : > { %v3071_v33 = vmul.f32 %v2917_v34, %v7114_v42  ;;  %3225 = vst.msk [vmem:[%s3787_s27 + $0x260] sm:$0xff] %vm1527_vm1, %v2917_v34 }
 0x233   : > { %3300 = vst.msk [vmem:[%s5133_s30 + $0x250] sm:$0xff] %vm1527_vm1, %v3146_v15  ;;  %v3624_v40 = vpop.eup %3623  ;;  %v3145_v6 = vsub.f32 %v2991_v46, %v3068_v5 }
 0x234   : > { %v3148_v57 = vsub.f32 %v2994_v48, %v3071_v33  ;;  %v2916_v10 = vmul.f32 %v3624_v40, %v2839_v9 }
 0x235   : > { %3299 = vst.msk [vmem:[%s5133_s30 + $0x248] sm:$0xff] %vm1527_vm1, %v3145_v6 }
 0x236   : > { %3302 = vst.msk [vmem:[%s5133_s30 + $0x260] sm:$0xff] %vm1527_vm1, %v3148_v57  ;;  %v3070_v3 = vmul.f32 %v2916_v10, %v7095_v27  ;;  %3224 = vst.msk [vmem:[%s3787_s27 + $0x258] sm:$0xff] %vm1527_vm1, %v2916_v10 }
 0x238   : > { %v3147_v24 = vsub.f32 %v2993_v38, %v3070_v3 }
 0x23a   : > { %3301 = vst.msk [vmem:[%s5133_s30 + $0x258] sm:$0xff] %vm1527_vm1, %v3147_v24 }
 0x23b PF: > { %s15_s17 = sadd.s32 1, %s3685_s17   ;;  %s7515_s15 = smov %s3681_s16 }
 0x23c   : > { %p12_p5 = scmp.ge.s32.totalorder %s15_s17, 4   ;;  %s7516_s16 = smov %s7518_s18 }
 0x23e   :  { %14 = sbr.rel (!%p12_p5) target bundleno = 2 (0x2), region = 88 }

</bundles_post_ra>
